<compile_context>
chip_gen: v6e
topology: v6e:2x2x1
jax: 0.10.0
libtpu: 0.0.40
codegen_flags: <defaults>
</compile_context>

<pallas_src>
import functools

import jax
import jax.numpy as jnp
from jax.experimental import pallas as pl
from jax.experimental.pallas import tpu as pltpu

KH, KW = 5, 5
PAD = 2
HALO = 2               # 'A' taps have r in {0,1,2} -> at most 2 rows below the tile
LANES = 128

assert HALO <= PAD     # last tile's halo must stay inside the padded array


def _allowed_taps_type_a(kh=KH, kw=KW):
    """Kernel positions kept by the PixelCNN-style 'A' mask (center excluded)."""
    taps = []
    for r in range(kh):
        for c in range(kw):
            if r < kh // 2:
                taps.append((r, c))
            elif r == kh // 2 and c < kw // 2:     # 'A': strictly causal
                taps.append((r, c))
    return tuple(taps)


def _round_up(x, m):
    return ((x + m - 1) // m) * m


def _vmem_capacity_bytes():
    """Physical VMEM of the local TPU (fallback: 64 MiB = v7x per-TC)."""
    try:
        info = pltpu.get_tpu_info()
        for attr in ("vmem_capacity_bytes", "vmem_size_bytes", "vmem_bytes"):
            v = getattr(info, attr, None)
            if v:
                return int(v)
    except Exception:
        pass
    return 64 * 2 ** 20


def _vmem_estimate(th, w, cin, cout_p, n_taps, cb, ob):
    """Per-grid-step VMEM footprint (bytes) used for TH selection / vmem limit."""
    wpad = w + 2 * PAD
    in_tile = 2 * th * wpad * cin * cb          # double-buffered input tile
    halo = 2 * HALO * wpad * cin * cb           # double-buffered halo rows
    weight = n_taps * cin * cout_p * cb         # single-buffered (pl.Buffered(1))
    bias_b = cout_p * 4
    out_tile = 2 * th * w * cout_p * ob         # double-buffered output tile
    patch = 2 * th * w * n_taps * cin * cb      # tap slices + concatenated patch
    acc = th * w * cout_p * 4                   # f32 matmul result
    return in_tile + halo + weight + bias_b + out_tile + patch + acc


def _pick_tile_h(H, W, cin, cout_p, n_taps, cb, ob, budget):
    """Largest row tile (divides H, multiple of HALO) that fits the VMEM budget."""
    cands = [th for th in (64, 32, 16, 8, 4, 2)
             if th <= H and H % th == 0 and th % HALO == 0]
    if not cands:
        raise ValueError("H must be an even number for the tiled kernel")
    for th in cands:                            # biggest block that fits wins
        if _vmem_estimate(th, W, cin, cout_p, n_taps, cb, ob) <= budget:
            return th
    return cands[-1]


def _masked_conv_kernel(x_ref, halo_ref, w_ref, b_ref, o_ref, *, taps, th, w_out):
    # x_ref    : (1, TH,   W+4, Cin)   row-tile of the (top/left/right) padded input
    # halo_ref : (1, 2,    W+4, Cin)   the 2 rows just below the tile
    # w_ref    : (n_taps*Cin, Cout_p)  stacked causal taps (already 'A'-masked)
    # b_ref    : (1, Cout_p)
    # o_ref    : (1, TH, W, Cout_p)
    cin = x_ref.shape[3]
    cout_p = o_ref.shape[3]
    n_taps = len(taps)

    # im2col restricted to the 12 causal taps, built directly from the tile and
    # (for r > 0) the needed halo rows — no (TH+HALO)-row band copy per step.
    cols = []
    for (r, c) in taps:
        if r == 0:
            sl = x_ref[0, :, c:c + w_out, :]
        else:
            sl = jnp.concatenate(
                [x_ref[0, r:th, c:c + w_out, :],
                 halo_ref[0, :r, c:c + w_out, :]], axis=0)
        cols.append(sl)
    patch = jnp.concatenate(cols, axis=-1)               # (TH, W, n_taps*Cin)
    patch = patch.reshape(th * w_out, n_taps * cin)

    # Single MXU matmul, f32 accumulation; bias folded into the epilogue.
    # TODO(synk): pass precision=jax.lax.Precision.HIGHEST here if bit-level
    # parity with the f32 torch conv is required (slower multi-pass matmul).
    acc = jnp.dot(patch, w_ref[...], preferred_element_type=jnp.float32)
    acc = acc + b_ref[...].astype(jnp.float32)

    o_ref[...] = acc.reshape(1, th, w_out, cout_p).astype(o_ref.dtype)


def context_model_forward(x_nchw, weight_oikk, bias, *,
                          compute_dtype=jnp.bfloat16, out_dtype=None,
                          tile_h=None):
    """ContextModel.forward.

    x_nchw      : (N, Cin, H, W)       float32
    weight_oikk : (Cout, Cin, KH, KW)  float32 (raw, un-masked conv weight)
    bias        : (Cout,)              float32
    returns     : (N, Cout, H, W)      out_dtype (defaults to input dtype)
    """
    N, Cin, H, W = x_nchw.shape
    Cout = weight_oikk.shape[0]
    out_dtype = x_nchw.dtype if out_dtype is None else out_dtype
    taps = _allowed_taps_type_a()
    n_taps = len(taps)
    cout_p = _round_up(Cout, LANES)              # lane-dense output channels

    cb = jnp.dtype(compute_dtype).itemsize
    ob = jnp.dtype(out_dtype).itemsize
    vmem_cap = _vmem_capacity_bytes()
    if tile_h is None:
        TH = _pick_tile_h(H, W, Cin, cout_p, n_taps, cb, ob,
                          budget=int(vmem_cap * 0.45))
    else:
        TH = int(tile_h)
    if H % TH != 0 or TH % HALO != 0:
        raise ValueError(f"tile_h={TH} must divide H={H} and be a multiple of {HALO}")
    est = _vmem_estimate(TH, W, Cin, cout_p, n_taps, cb, ob)
    vmem_limit = int(min(max(2 * est, 32 * 2 ** 20), int(vmem_cap * 0.9)))

    # ---- glue: layout plumbing only ----
    # TODO(synk): this block is NCHW at the PyTorch boundary; an NHWC-native
    # caller could skip both transposes (each is a full HBM pass over activations).
    x_nhwc = jnp.transpose(x_nchw, (0, 2, 3, 1)).astype(compute_dtype)
    # Top/left/right zero pad only: the 'A' mask never looks below the current
    # row, so the bottom 2 pad rows of the dense conv are dead and are dropped.
    x_pad = jnp.pad(x_nhwc, ((0, 0), (PAD, 0), (PAD, PAD), (0, 0)))

    # Stack ONLY the 12 allowed ('A'-masked) taps -> (n_taps*Cin, Cout_p).
    # Taps outside the mask never enter the matmul, which is exactly
    # `weight.data *= mask` followed by the conv.
    w_stacked = jnp.concatenate(
        [jnp.transpose(weight_oikk[:, :, r, c]) for (r, c) in taps], axis=0)
    w_stacked = jnp.pad(w_stacked, ((0, 0), (0, cout_p - Cout)))
    w_stacked = w_stacked.astype(compute_dtype)

    b2d = jnp.pad(bias, (0, cout_p - Cout)).reshape(1, cout_p).astype(jnp.float32)

    kernel = functools.partial(_masked_conv_kernel, taps=taps, th=TH, w_out=W)

    out_padded = pl.pallas_call(
        kernel,
        out_shape=jax.ShapeDtypeStruct((N, H, W, cout_p), out_dtype),
        grid_spec=pltpu.PrefetchScalarGridSpec(
            num_scalar_prefetch=0,
            grid=(N, H // TH),
            in_specs=[
                # row-tile of the padded input
                pl.BlockSpec((1, TH, W + 2 * PAD, Cin),
                             lambda n, h: (n, h, 0, 0)),
                # 2-row halo just below the tile (second view of the same array)
                pl.BlockSpec((1, HALO, W + 2 * PAD, Cin),
                             lambda n, h: (n, (h + 1) * (TH // HALO), 0, 0)),
                # stacked weight / bias: constant across the grid -> single buffer
                pl.BlockSpec((n_taps * Cin, cout_p), lambda n, h: (0, 0),
                             pipeline_mode=pl.Buffered(1)),
                pl.BlockSpec((1, cout_p), lambda n, h: (0, 0),
                             pipeline_mode=pl.Buffered(1)),
            ],
            out_specs=pl.BlockSpec((1, TH, W, cout_p),
                                   lambda n, h: (n, h, 0, 0)),
        ),
        compiler_params=pltpu.CompilerParams(
            dimension_semantics=("parallel", "parallel"),
            vmem_limit_bytes=vmem_limit),
    )(x_pad, x_pad, w_stacked, b2d)

    out_nhwc = out_padded[..., :Cout]                    # drop channel padding
    return jnp.transpose(out_nhwc, (0, 3, 1, 2))


def _reference(x_nchw, weight_oikk, bias):
    """Plain-JAX reference (masked conv via lax.conv_general_dilated)."""
    taps = _allowed_taps_type_a()
    mask = jnp.zeros((KH, KW), jnp.float32)
    for (r, c) in taps:
        mask = mask.at[r, c].set(1.0)
    w = weight_oikk * mask[None, None, :, :]
    out = jax.lax.conv_general_dilated(
        x_nchw, w, window_strides=(1, 1), padding=((PAD, PAD), (PAD, PAD)),
        dimension_numbers=("NCHW", "OIHW", "NCHW"))
    return out + bias[None, :, None, None]


if __name__ == "__main__":
    # Small shapes consistent with ContextModel(num_channels=C):
    # input (N, C, H, W), output (N, 2*C, H, W).
    N, C, H, W = 2, 16, 16, 16
    Cout = 2 * C

    key = jax.random.PRNGKey(0)
    kx, kw_, kb = jax.random.split(key, 3)
    x = jax.random.normal(kx, (N, C, H, W), jnp.float32)
    weight = jax.random.normal(kw_, (Cout, C, KH, KW), jnp.float32) * 0.05
    bias = jax.random.normal(kb, (Cout,), jnp.float32) * 0.1

    ref = jax.block_until_ready(_reference(x, weight, bias))

    # Exact-semantics path (f32 on the MXU), auto tile (full-H row tile here).
    out_f32 = jax.block_until_ready(
        context_model_forward(x, weight, bias, compute_dtype=jnp.float32))
    assert out_f32.shape == (N, Cout, H, W)
    assert jnp.allclose(out_f32, ref, atol=1e-3, rtol=1e-3), (
        float(jnp.max(jnp.abs(out_f32 - ref))))

    # Forced TH=8: exercises the multi-row-tile path and the 2-row halo fetch
    # across a tile boundary.
    out_tiled = jax.block_until_ready(
        context_model_forward(x, weight, bias, compute_dtype=jnp.float32,
                              tile_h=8))
    assert jnp.allclose(out_tiled, ref, atol=1e-3, rtol=1e-3), (
        float(jnp.max(jnp.abs(out_tiled - ref))))

    # Fast path (bf16 inputs/weights, f32 accumulation) — looser tolerance.
    out_bf16 = jax.block_until_ready(
        context_model_forward(x, weight, bias, compute_dtype=jnp.bfloat16))
    assert out_bf16.shape == (N, Cout, H, W)
    assert jnp.allclose(out_bf16, ref, atol=5e-2, rtol=5e-2), (
        float(jnp.max(jnp.abs(out_bf16 - ref))))

    print("KERNEL_OK")
</pallas_src>

<mosaic_0001>
module attributes {stable_mosaic.version = 11 : i64} {
  func.func @_masked_conv_kernel(%arg0: i32, %arg1: i32, %arg2: memref<1x16x20x16xf32, #tpu.memory_space<vmem>>, %arg3: memref<1x2x20x16xf32, #tpu.memory_space<vmem>>, %arg4: memref<192x128xf32, #tpu.memory_space<vmem>>, %arg5: memref<1x128xf32, #tpu.memory_space<vmem>>, %arg6: memref<1x16x16x128xf32, #tpu.memory_space<vmem>>) attributes {dimension_semantics = [#tpu.dimension_semantics<parallel>, #tpu.dimension_semantics<parallel>], iteration_bounds = array<i64: 2, 1>, scalar_prefetch = 0 : i64, scratch_operands = 0 : i64, tpu.core_type = #tpu.core_type<tc>, window_params = [{transform_indices = @transform_0, window_bounds = array<i64: 1, 16, 20, 16>}, {transform_indices = @transform_1, window_bounds = array<i64: 1, 2, 20, 16>}, {pipeline_mode = #tpu.pipeline_mode<synchronous>, transform_indices = @transform_2, window_bounds = array<i64: 192, 128>}, {pipeline_mode = #tpu.pipeline_mode<synchronous>, transform_indices = @transform_3, window_bounds = array<i64: 1, 128>}, {transform_indices = @transform_4, window_bounds = array<i64: 1, 16, 16, 128>}]} {
    %c0 = arith.constant 0 : index
    %c0_0 = arith.constant 0 : index
    %c0_1 = arith.constant 0 : index
    %c0_2 = arith.constant 0 : index
    %0 = vector.load %arg2[%c0, %c0_0, %c0_1, %c0_2] : memref<1x16x20x16xf32, #tpu.memory_space<vmem>>, vector<1x16x16x16xf32>
    %1 = vector.shape_cast %0 : vector<1x16x16x16xf32> to vector<16x16x16xf32>
    %c0_3 = arith.constant 0 : index
    %c0_4 = arith.constant 0 : index
    %c1 = arith.constant 1 : index
    %c0_5 = arith.constant 0 : index
    %2 = vector.load %arg2[%c0_3, %c0_4, %c1, %c0_5] : memref<1x16x20x16xf32, #tpu.memory_space<vmem>>, vector<1x16x16x16xf32>
    %3 = vector.shape_cast %2 : vector<1x16x16x16xf32> to vector<16x16x16xf32>
    %c0_6 = arith.constant 0 : index
    %c0_7 = arith.constant 0 : index
    %c2 = arith.constant 2 : index
    %c0_8 = arith.constant 0 : index
    %4 = vector.load %arg2[%c0_6, %c0_7, %c2, %c0_8] : memref<1x16x20x16xf32, #tpu.memory_space<vmem>>, vector<1x16x16x16xf32>
    %5 = vector.shape_cast %4 : vector<1x16x16x16xf32> to vector<16x16x16xf32>
    %c0_9 = arith.constant 0 : index
    %c0_10 = arith.constant 0 : index
    %c3 = arith.constant 3 : index
    %c0_11 = arith.constant 0 : index
    %6 = vector.load %arg2[%c0_9, %c0_10, %c3, %c0_11] : memref<1x16x20x16xf32, #tpu.memory_space<vmem>>, vector<1x16x16x16xf32>
    %7 = vector.shape_cast %6 : vector<1x16x16x16xf32> to vector<16x16x16xf32>
    %c0_12 = arith.constant 0 : index
    %c0_13 = arith.constant 0 : index
    %c4 = arith.constant 4 : index
    %c0_14 = arith.constant 0 : index
    %8 = vector.load %arg2[%c0_12, %c0_13, %c4, %c0_14] : memref<1x16x20x16xf32, #tpu.memory_space<vmem>>, vector<1x16x16x16xf32>
    %9 = vector.shape_cast %8 : vector<1x16x16x16xf32> to vector<16x16x16xf32>
    %c0_15 = arith.constant 0 : index
    %c1_16 = arith.constant 1 : index
    %c0_17 = arith.constant 0 : index
    %c0_18 = arith.constant 0 : index
    %10 = vector.load %arg2[%c0_15, %c1_16, %c0_17, %c0_18] : memref<1x16x20x16xf32, #tpu.memory_space<vmem>>, vector<1x15x16x16xf32>
    %11 = vector.shape_cast %10 : vector<1x15x16x16xf32> to vector<15x16x16xf32>
    %c0_19 = arith.constant 0 : index
    %c0_20 = arith.constant 0 : index
    %c0_21 = arith.constant 0 : index
    %c0_22 = arith.constant 0 : index
    %12 = vector.load %arg3[%c0_19, %c0_20, %c0_21, %c0_22] : memref<1x2x20x16xf32, #tpu.memory_space<vmem>>, vector<1x1x16x16xf32>
    %13 = vector.shape_cast %12 : vector<1x1x16x16xf32> to vector<1x16x16xf32>
    %14 = tpu.concatenate %11, %13 in 0 : vector<15x16x16xf32>, vector<1x16x16xf32> -> vector<16x16x16xf32>
    %c0_23 = arith.constant 0 : index
    %c1_24 = arith.constant 1 : index
    %c1_25 = arith.constant 1 : index
    %c0_26 = arith.constant 0 : index
    %15 = vector.load %arg2[%c0_23, %c1_24, %c1_25, %c0_26] : memref<1x16x20x16xf32, #tpu.memory_space<vmem>>, vector<1x15x16x16xf32>
    %16 = vector.shape_cast %15 : vector<1x15x16x16xf32> to vector<15x16x16xf32>
    %c0_27 = arith.constant 0 : index
    %c0_28 = arith.constant 0 : index
    %c1_29 = arith.constant 1 : index
    %c0_30 = arith.constant 0 : index
    %17 = vector.load %arg3[%c0_27, %c0_28, %c1_29, %c0_30] : memref<1x2x20x16xf32, #tpu.memory_space<vmem>>, vector<1x1x16x16xf32>
    %18 = vector.shape_cast %17 : vector<1x1x16x16xf32> to vector<1x16x16xf32>
    %19 = tpu.concatenate %16, %18 in 0 : vector<15x16x16xf32>, vector<1x16x16xf32> -> vector<16x16x16xf32>
    %c0_31 = arith.constant 0 : index
    %c1_32 = arith.constant 1 : index
    %c2_33 = arith.constant 2 : index
    %c0_34 = arith.constant 0 : index
    %20 = vector.load %arg2[%c0_31, %c1_32, %c2_33, %c0_34] : memref<1x16x20x16xf32, #tpu.memory_space<vmem>>, vector<1x15x16x16xf32>
    %21 = vector.shape_cast %20 : vector<1x15x16x16xf32> to vector<15x16x16xf32>
    %c0_35 = arith.constant 0 : index
    %c0_36 = arith.constant 0 : index
    %c2_37 = arith.constant 2 : index
    %c0_38 = arith.constant 0 : index
    %22 = vector.load %arg3[%c0_35, %c0_36, %c2_37, %c0_38] : memref<1x2x20x16xf32, #tpu.memory_space<vmem>>, vector<1x1x16x16xf32>
    %23 = vector.shape_cast %22 : vector<1x1x16x16xf32> to vector<1x16x16xf32>
    %24 = tpu.concatenate %21, %23 in 0 : vector<15x16x16xf32>, vector<1x16x16xf32> -> vector<16x16x16xf32>
    %c0_39 = arith.constant 0 : index
    %c1_40 = arith.constant 1 : index
    %c3_41 = arith.constant 3 : index
    %c0_42 = arith.constant 0 : index
    %25 = vector.load %arg2[%c0_39, %c1_40, %c3_41, %c0_42] : memref<1x16x20x16xf32, #tpu.memory_space<vmem>>, vector<1x15x16x16xf32>
    %26 = vector.shape_cast %25 : vector<1x15x16x16xf32> to vector<15x16x16xf32>
    %c0_43 = arith.constant 0 : index
    %c0_44 = arith.constant 0 : index
    %c3_45 = arith.constant 3 : index
    %c0_46 = arith.constant 0 : index
    %27 = vector.load %arg3[%c0_43, %c0_44, %c3_45, %c0_46] : memref<1x2x20x16xf32, #tpu.memory_space<vmem>>, vector<1x1x16x16xf32>
    %28 = vector.shape_cast %27 : vector<1x1x16x16xf32> to vector<1x16x16xf32>
    %29 = tpu.concatenate %26, %28 in 0 : vector<15x16x16xf32>, vector<1x16x16xf32> -> vector<16x16x16xf32>
    %c0_47 = arith.constant 0 : index
    %c1_48 = arith.constant 1 : index
    %c4_49 = arith.constant 4 : index
    %c0_50 = arith.constant 0 : index
    %30 = vector.load %arg2[%c0_47, %c1_48, %c4_49, %c0_50] : memref<1x16x20x16xf32, #tpu.memory_space<vmem>>, vector<1x15x16x16xf32>
    %31 = vector.shape_cast %30 : vector<1x15x16x16xf32> to vector<15x16x16xf32>
    %c0_51 = arith.constant 0 : index
    %c0_52 = arith.constant 0 : index
    %c4_53 = arith.constant 4 : index
    %c0_54 = arith.constant 0 : index
    %32 = vector.load %arg3[%c0_51, %c0_52, %c4_53, %c0_54] : memref<1x2x20x16xf32, #tpu.memory_space<vmem>>, vector<1x1x16x16xf32>
    %33 = vector.shape_cast %32 : vector<1x1x16x16xf32> to vector<1x16x16xf32>
    %34 = tpu.concatenate %31, %33 in 0 : vector<15x16x16xf32>, vector<1x16x16xf32> -> vector<16x16x16xf32>
    %c0_55 = arith.constant 0 : index
    %c2_56 = arith.constant 2 : index
    %c0_57 = arith.constant 0 : index
    %c0_58 = arith.constant 0 : index
    %35 = vector.load %arg2[%c0_55, %c2_56, %c0_57, %c0_58] : memref<1x16x20x16xf32, #tpu.memory_space<vmem>>, vector<1x14x16x16xf32>
    %36 = vector.shape_cast %35 : vector<1x14x16x16xf32> to vector<14x16x16xf32>
    %c0_59 = arith.constant 0 : index
    %c0_60 = arith.constant 0 : index
    %c0_61 = arith.constant 0 : index
    %c0_62 = arith.constant 0 : index
    %37 = vector.load %arg3[%c0_59, %c0_60, %c0_61, %c0_62] : memref<1x2x20x16xf32, #tpu.memory_space<vmem>>, vector<1x2x16x16xf32>
    %38 = vector.shape_cast %37 : vector<1x2x16x16xf32> to vector<2x16x16xf32>
    %39 = tpu.concatenate %36, %38 in 0 : vector<14x16x16xf32>, vector<2x16x16xf32> -> vector<16x16x16xf32>
    %c0_63 = arith.constant 0 : index
    %c2_64 = arith.constant 2 : index
    %c1_65 = arith.constant 1 : index
    %c0_66 = arith.constant 0 : index
    %40 = vector.load %arg2[%c0_63, %c2_64, %c1_65, %c0_66] : memref<1x16x20x16xf32, #tpu.memory_space<vmem>>, vector<1x14x16x16xf32>
    %41 = vector.shape_cast %40 : vector<1x14x16x16xf32> to vector<14x16x16xf32>
    %c0_67 = arith.constant 0 : index
    %c0_68 = arith.constant 0 : index
    %c1_69 = arith.constant 1 : index
    %c0_70 = arith.constant 0 : index
    %42 = vector.load %arg3[%c0_67, %c0_68, %c1_69, %c0_70] : memref<1x2x20x16xf32, #tpu.memory_space<vmem>>, vector<1x2x16x16xf32>
    %43 = vector.shape_cast %42 : vector<1x2x16x16xf32> to vector<2x16x16xf32>
    %44 = tpu.concatenate %41, %43 in 0 : vector<14x16x16xf32>, vector<2x16x16xf32> -> vector<16x16x16xf32>
    %45 = tpu.concatenate %1, %3, %5, %7, %9, %14, %19, %24, %29, %34, %39, %44 in 2 : vector<16x16x16xf32>, vector<16x16x16xf32>, vector<16x16x16xf32>, vector<16x16x16xf32>, vector<16x16x16xf32>, vector<16x16x16xf32>, vector<16x16x16xf32>, vector<16x16x16xf32>, vector<16x16x16xf32>, vector<16x16x16xf32>, vector<16x16x16xf32>, vector<16x16x16xf32> -> vector<16x16x192xf32>
    %46 = vector.shape_cast %45 : vector<16x16x192xf32> to vector<256x192xf32>
    %c0_71 = arith.constant 0 : index
    %c0_72 = arith.constant 0 : index
    %47 = vector.load %arg4[%c0_71, %c0_72] : memref<192x128xf32, #tpu.memory_space<vmem>>, vector<192x128xf32>
    %cst = arith.constant dense<0.000000e+00> : vector<256x128xf32>
    %48 = tpu.matmul %46, %47, %cst {dimension_numbers = #tpu.dot_dimension_numbers<[1], [0], [0], [1], [0, 0, 1, 1], [], []>} : vector<256x192xf32>, vector<192x128xf32>, vector<256x128xf32> -> vector<256x128xf32>
    %c0_73 = arith.constant 0 : index
    %c0_74 = arith.constant 0 : index
    %49 = vector.load %arg5[%c0_73, %c0_74] : memref<1x128xf32, #tpu.memory_space<vmem>>, vector<1x128xf32>
    %50 = vector.broadcast %49 : vector<1x128xf32> to vector<256x128xf32>
    %51 = arith.addf %48, %50 : vector<256x128xf32>
    %52 = vector.shape_cast %51 : vector<256x128xf32> to vector<1x16x16x128xf32>
    %c0_75 = arith.constant 0 : index
    %c0_76 = arith.constant 0 : index
    %c0_77 = arith.constant 0 : index
    %c0_78 = arith.constant 0 : index
    %53 = vector.load %arg6[%c0_75, %c0_76, %c0_77, %c0_78] : memref<1x16x16x128xf32, #tpu.memory_space<vmem>>, vector<1x16x16x128xf32>
    tpu.vector_store %arg6[%c0_75, %c0_76, %c0_77, %c0_78], %52 {strides = array<i32>} : memref<1x16x16x128xf32, #tpu.memory_space<vmem>>, vector<1x16x16x128xf32>,
    return
  }
  func.func @transform_0(%arg0: i32, %arg1: i32) -> (i32, i32, i32, i32) {
    %c0_i32 = arith.constant 0 : i32
    %c0_i32_0 = arith.constant 0 : i32
    %c0_i32_1 = arith.constant 0 : i32
    return %arg0, %arg1, %c0_i32, %c0_i32_0 : i32, i32, i32, i32
  }
  func.func @transform_1(%arg0: i32, %arg1: i32) -> (i32, i32, i32, i32) {
    %c1_i32 = arith.constant 1 : i32
    %0 = arith.addi %arg1, %c1_i32 : i32
    %c8_i32 = arith.constant 8 : i32
    %1 = arith.muli %0, %c8_i32 : i32
    %c0_i32 = arith.constant 0 : i32
    %c0_i32_0 = arith.constant 0 : i32
    %c0_i32_1 = arith.constant 0 : i32
    return %arg0, %1, %c0_i32, %c0_i32_0 : i32, i32, i32, i32
  }
  func.func @transform_2(%arg0: i32, %arg1: i32) -> (i32, i32) {
    %c0_i32 = arith.constant 0 : i32
    %c0_i32_0 = arith.constant 0 : i32
    %c0_i32_1 = arith.constant 0 : i32
    return %c0_i32, %c0_i32_0 : i32, i32
  }
  func.func @transform_3(%arg0: i32, %arg1: i32) -> (i32, i32) {
    %c0_i32 = arith.constant 0 : i32
    %c0_i32_0 = arith.constant 0 : i32
    %c0_i32_1 = arith.constant 0 : i32
    return %c0_i32, %c0_i32_0 : i32, i32
  }
  func.func @transform_4(%arg0: i32, %arg1: i32) -> (i32, i32, i32, i32) {
    %c0_i32 = arith.constant 0 : i32
    %c0_i32_0 = arith.constant 0 : i32
    %c0_i32_1 = arith.constant 0 : i32
    return %arg0, %arg1, %c0_i32, %c0_i32_0 : i32, i32, i32, i32
  }
}

</mosaic_0001>

<bundles_post_ra>
// kernel: tpu_custom_call.1
= control target key start
LH: loop header
LB: loop body
LE: loop exit
PB: predicated region body
PF: predicated region fallthrough
CT: control target
= control target key end

     0   :  { %9 = vsyncpa [#allocation3], 0  ;;  %s5605_s0 = inlined_call_operand.vmem [shape: f32[2,18,20,16], index: 0, kind: input, shape index: {}]   ;;  %s5606_s1 = inlined_call_operand.vmem [shape: f32[2,18,20,16], index: 1, kind: input, shape index: {}]   ;;  %s5607_s2 = inlined_call_operand.vmem [shape: f32[192,128], index: 2, kind: input, shape index: {}]   ;;  %s5608_s3 = inlined_call_operand.vmem [shape: f32[1,128], index: 3, kind: input, shape index: {}]   ;;  %s5609_s4 = inlined_call_operand.hbm [shape: f32[2,16,16,128], index: 4, kind: output, shape index: {}]  }
   0x1   :  { %11 = vsyncpa [#allocation3 + $0x1], 0  ;;  %s3871_s15 = smov 0   ;;  %s3873_s16 = smov 0  }
   0x2   :  { %s3875_s17 = smov 0   ;;  %s3877_s18 = smov 0  }
   0x3   :  { %s3879_s19 = smov 0   ;;  %s3881_s20 = smov 0  }
   0x4 LB: > { %s2797_s21 = sadd.s32 4294967295, %s3833_s20   ;;  %s2798_s22 = sadd.s32 4294967294, %s3833_s20   ;;  %s3833_s20 = sphi %s3881_s20, %s17_s20   ;;  %s3829_s19 = sphi %s3879_s19, %s5758_s19   ;;  %s3825_s18 = sphi %s3877_s18, %s5757_s18   ;;  %s3821_s17 = sphi %s3875_s17, %s5756_s17   ;;  %s3817_s16 = sphi %s3873_s16, %s5755_s16   ;;  %s3813_s15 = sphi %s3871_s15, %s5754_s15  }
   0x5   : > { %s29_s23 = sadd.s32 1, %s3829_s19  ;;  %s140_s24 = sadd.s32 1, %s3821_s17 }
   0x6   : > { %p31_p0 = scmp.ge.s32.totalorder %s29_s23, 2  ;;  %p150_p1 = scmp.ne.s32.totalorder %s3821_s17, %s3817_s16 }
   0x7   : > { %p151_p2 = scmp.eq.s32.totalorder %s2797_s21, 1  ;;  %p156_p3 = scmp.ne.s32.totalorder %s3817_s16, %s3813_s15 }
   0x8   : > { %s5760_s23 = smov (%p31_p0, %s29_s23), 0  ;;  %p157_p5 = scmp.eq.s32.totalorder %s2798_s22, 1 }
   0x9   : > { %p3911_p4 = por %p151_p2, %p150_p1  ;;  %s135_s26 = ssub.s32 %s3829_s19, %s5760_s23 }
   0xa   : > { %p2801_p6 = scmp.ge.s32.totalorder %s3833_s20, 1  ;;  %p138_p7 = scmp.eq.s32.totalorder %s135_s26, 0 }
   0xb   : > { %p3918_p8 = por %p157_p5, %p156_p3  ;;  %p223_p9 = scmp.lt.s32.totalorder %s3833_s20, 3 }
   0xc   : > { %s3924_s28 = scalar_select %p138_p7, %s3821_s17, %s140_s24  }
   0xd   : > { %p224_p10 = pnand %p2801_p6, %p223_p9 }
   0xf   : > { %227 = sbr.rel (%p224_p10) target bundleno = 769 (0x301), region = 36 }
  0x14   : > { %p277_p11 = scmp.lt.s32.totalorder %s3825_s18, 1  ;;  %s3835_s8 = smov 16   ;;  %vm1966_vm0 = vcmask 130048   ;;  %vm1999_vm1 = vcmask 261120   ;;  %vm2032_vm2 = vcmask 392192   ;;  %vm2065_vm3 = vcmask 523264  }
  0x15   : > { %s3836_s9 = smov 32   ;;  %s3837_s10 = smov 48   ;;  %vm2098_vm4 = vcmask 654336   ;;  %vm2131_vm5 = vcmask 785408   ;;  %vm2164_vm6 = vcmask 916480  }
  0x16   : > { %s3928_s29 = scalar_select %p277_p11, %s3825_s18, 1 }
  0x17   : > { %s3838_s11 = smov 64   ;;  %s3842_s5 = smov 112  }
  0x18   : > { %s3100_s30 = smul.u32 432, %s3928_s29 }
  0x1a   : > { %s3936_s7 = scalar_lea.vmem %s5605_s0, %s3100_s30  ;;  %s3050_s22 = sadd.s32 384, %s3100_s30 }
  0x1b   : > { %v3939_v0 = vld [vmem:[%s3936_s7 + $0x31] sm:$0xff]  ;;  %v345_v1 = vld [vmem:[%s3936_s7 + $0x39] sm:$0xff]  ;;  %v340_v2 = vld [vmem:[%s3936_s7 + $0x1] sm:$0xff]  ;;  %s4360_s12 = scalar_lea.vmem %s5606_s1, %s3050_s22 }
  0x1c   : > { %v3178_v3 = vpack.i.bf16 %v345_v1, %v3939_v0  ;;  %v341_v4 = vld [vmem:[%s3936_s7 + $0x9] sm:$0xff]  ;;  %v347_v6 = vld [vmem:[%s3936_s7 + $0x51] sm:$0xff]  ;;  %v3948_v8 = vld [vmem:[%s3936_s7 + $0x19] sm:$0xff] }
  0x1d   : > { %v346_v5 = vld [vmem:[%s3936_s7 + $0x49] sm:$0xff]  ;;  %v3168_v7 = vpack.i.bf16 %v341_v4, %v340_v2  ;;  %v343_v9 = vld [vmem:[%s3936_s7 + $0x21] sm:$0xff]  ;;  %v350_v12 = vld [vmem:[%s3936_s7 + $0x79] sm:$0xff] }
  0x1e   : > { %3179 = vrot.lane.b32.xlu1 %v3178_v3, %s3835_s8  ;;  %v3183_v10 = vpack.i.bf16 %v347_v6, %v346_v5  ;;  %v3173_v11 = vpack.i.bf16 %v343_v9, %v3948_v8  ;;  %v351_v13 = vld [vmem:[%s3936_s7 + $0x81] sm:$0xff]  ;;  %v349_v15 = vld [vmem:[%s3936_s7 + $0x69] sm:$0xff]  ;;  %v355_v19 = vld [vmem:[%s3936_s7 + $0xb1] sm:$0xff] }
  0x1f   : > { %3169 = vrot.lane.b32.xlu0 %v3168_v7, %s3835_s8  ;;  %v348_v14 = vld [vmem:[%s3936_s7 + $0x61] sm:$0xff]  ;;  %v3193_v16 = vpack.i.bf16 %v351_v13, %v350_v12  ;;  %v354_v18 = vld [vmem:[%s3936_s7 + $0xa9] sm:$0xff]  ;;  %v352_v20 = vld [vmem:[%s3936_s7 + $0x91] sm:$0xff] }
  0x20   : > { %v3188_v17 = vpack.i.bf16 %v349_v15, %v348_v14  ;;  %v353_v21 = vld [vmem:[%s3936_s7 + $0x99] sm:$0xff]  ;;  %v3203_v22 = vpack.i.bf16 %v355_v19, %v354_v18  ;;  %v359_v25 = vld [vmem:[%s3936_s7 + $0xe1] sm:$0xff]  ;;  %v357_v27 = vld [vmem:[%s3936_s7 + $0xc9] sm:$0xff] }
  0x21   : > { %v3198_v23 = vpack.i.bf16 %v353_v21, %v352_v20  ;;  %v3967_v24 = vld [vmem:[%s3936_s7 + $0xd9] sm:$0xff]  ;;  %v356_v26 = vld [vmem:[%s3936_s7 + $0xc1] sm:$0xff]  ;;  %v362_v30 = vld [vmem:[%s3936_s7 + $0x109] sm:$0xff] }
  0x22   : > { %3184 = vrot.lane.b32.xlu1 %v3183_v10, %s3835_s8  ;;  %v3213_v28 = vpack.i.bf16 %v359_v25, %v3967_v24  ;;  %v3208_v29 = vpack.i.bf16 %v357_v27, %v356_v26  ;;  %v363_v31 = vld [vmem:[%s3936_s7 + $0x111] sm:$0xff]  ;;  %v361_v33 = vld [vmem:[%s3936_s7 + $0xf9] sm:$0xff]  ;;  %v367_v37 = vld [vmem:[%s3936_s7 + $0x141] sm:$0xff]  ;;  %v3568_v58 = vpack.i.bf16 %v3967_v24, %v3948_v8 }
  0x23   : > { %3174 = vrot.lane.b32.xlu0 %v3173_v11, %s3835_s8  ;;  %v3978_v32 = vld [vmem:[%s3936_s7 + $0xf1] sm:$0xff]  ;;  %v3223_v34 = vpack.i.bf16 %v363_v31, %v362_v30  ;;  %v366_v36 = vld [vmem:[%s3936_s7 + $0x139] sm:$0xff]  ;;  %v364_v38 = vld [vmem:[%s3936_s7 + $0x121] sm:$0xff] }
  0x24   : > { %v3218_v35 = vpack.i.bf16 %v361_v33, %v3978_v32  ;;  %v365_v39 = vld [vmem:[%s3936_s7 + $0x129] sm:$0xff]  ;;  %v3233_v40 = vpack.i.bf16 %v367_v37, %v366_v36  ;;  %v371_v43 = vld [vmem:[%s3936_s7 + $0x171] sm:$0xff]  ;;  %v369_v45 = vld [vmem:[%s3936_s7 + $0x159] sm:$0xff] }
  0x25   : > { %v3228_v41 = vpack.i.bf16 %v365_v39, %v364_v38  ;;  %v370_v42 = vld [vmem:[%s3936_s7 + $0x169] sm:$0xff]  ;;  %v368_v44 = vld [vmem:[%s3936_s7 + $0x151] sm:$0xff]  ;;  %v3997_v48 = vld [vmem:[%s3936_s7 + $0x1a] sm:$0xff] }
  0x26   : > { %3194 = vrot.lane.b32.xlu1 %v3193_v16, %s3835_s8  ;;  %v3243_v46 = vpack.i.bf16 %v371_v43, %v370_v42  ;;  %v3238_v47 = vpack.i.bf16 %v369_v45, %v368_v44  ;;  %v375_v49 = vld [vmem:[%s3936_s7 + $0x22] sm:$0xff]  ;;  %v373_v51 = vld [vmem:[%s3936_s7 + $0xa] sm:$0xff]  ;;  %v379_v55 = vld [vmem:[%s3936_s7 + $0x52] sm:$0xff] }
  0x27   : > { %3189 = vrot.lane.b32.xlu0 %v3188_v17, %s3835_s8  ;;  %v372_v50 = vld [vmem:[%s3936_s7 + $0x2] sm:$0xff]  ;;  %v3253_v52 = vpack.i.bf16 %v375_v49, %v3997_v48  ;;  %v378_v54 = vld [vmem:[%s3936_s7 + $0x4a] sm:$0xff]  ;;  %v376_v56 = vld [vmem:[%s3936_s7 + $0x32] sm:$0xff] }
  0x28   : > { %v3248_v53 = vpack.i.bf16 %v373_v51, %v372_v50  ;;  %v377_v57 = vld [vmem:[%s3936_s7 + $0x3a] sm:$0xff]  ;;  %v3263_v59 = vpack.i.bf16 %v379_v55, %v378_v54  ;;  %v383_v62 = vld [vmem:[%s3936_s7 + $0x82] sm:$0xff]  ;;  %v381_v1 = vld [vmem:[%s3936_s7 + $0x6a] sm:$0xff] }
  0x29   : > { %v3258_v60 = vpack.i.bf16 %v377_v57, %v376_v56  ;;  %v382_v61 = vld [vmem:[%s3936_s7 + $0x7a] sm:$0xff]  ;;  %v380_v63 = vld [vmem:[%s3936_s7 + $0x62] sm:$0xff]  ;;  %v386_v4 = vld [vmem:[%s3936_s7 + $0xaa] sm:$0xff] }
  0x2a   : > { %3204 = vrot.lane.b32.xlu1 %v3203_v22, %s3835_s8  ;;  %v3273_v2 = vpack.i.bf16 %v383_v62, %v382_v61  ;;  %v3268_v3 = vpack.i.bf16 %v381_v1, %v380_v63  ;;  %v387_v5 = vld [vmem:[%s3936_s7 + $0xb2] sm:$0xff]  ;;  %v385_v7 = vld [vmem:[%s3936_s7 + $0x9a] sm:$0xff]  ;;  %v4029_v12 = vld [vmem:[%s3936_s7 + $0xe2] sm:$0xff] }
  0x2b   : > { %3199 = vrot.lane.b32.xlu0 %v3198_v23, %s3835_s8  ;;  %v384_v6 = vld [vmem:[%s3936_s7 + $0x92] sm:$0xff]  ;;  %v3283_v9 = vpack.i.bf16 %v387_v5, %v386_v4  ;;  %v4026_v11 = vld [vmem:[%s3936_s7 + $0xda] sm:$0xff]  ;;  %v388_v13 = vld [vmem:[%s3936_s7 + $0xc2] sm:$0xff] }
  0x2c   : > { %v3278_v10 = vpack.i.bf16 %v385_v7, %v384_v6  ;;  %v389_v14 = vld [vmem:[%s3936_s7 + $0xca] sm:$0xff]  ;;  %v3293_v16 = vpack.i.bf16 %v4029_v12, %v4026_v11  ;;  %v395_v19 = vld [vmem:[%s3936_s7 + $0x112] sm:$0xff]  ;;  %v393_v21 = vld [vmem:[%s3936_s7 + $0xfa] sm:$0xff] }
  0x2d   : > { %v3288_v17 = vpack.i.bf16 %v389_v14, %v388_v13  ;;  %v394_v18 = vld [vmem:[%s3936_s7 + $0x10a] sm:$0xff]  ;;  %v392_v20 = vld [vmem:[%s3936_s7 + $0xf2] sm:$0xff]  ;;  %v398_v25 = vld [vmem:[%s3936_s7 + $0x13a] sm:$0xff] }
  0x2e   : > { %3214 = vrot.lane.b32.xlu1 %v3213_v28, %s3835_s8  ;;  %v3303_v22 = vpack.i.bf16 %v395_v19, %v394_v18  ;;  %v3298_v23 = vpack.i.bf16 %v393_v21, %v392_v20  ;;  %v399_v26 = vld [vmem:[%s3936_s7 + $0x142] sm:$0xff]  ;;  %v397_v28 = vld [vmem:[%s3936_s7 + $0x12a] sm:$0xff]  ;;  %v403_v33 = vld [vmem:[%s3936_s7 + $0x172] sm:$0xff] }
  0x2f   : > { %3209 = vrot.lane.b32.xlu0 %v3208_v29, %s3835_s8  ;;  %v396_v27 = vld [vmem:[%s3936_s7 + $0x122] sm:$0xff]  ;;  %v3313_v29 = vpack.i.bf16 %v399_v26, %v398_v25  ;;  %v402_v31 = vld [vmem:[%s3936_s7 + $0x16a] sm:$0xff]  ;;  %v411_v45 = vld [vmem:[%s3936_s7 + $0x53] sm:$0xff] }
  0x30   : > { %v3308_v30 = vpack.i.bf16 %v397_v28, %v396_v27  ;;  %v3323_v36 = vpack.i.bf16 %v403_v33, %v402_v31  ;;  %v406_v38 = vld [vmem:[%s3936_s7 + $0x1b] sm:$0xff]  ;;  %v407_v39 = vld [vmem:[%s3936_s7 + $0x23] sm:$0xff]  ;;  %v410_v44 = vld [vmem:[%s3936_s7 + $0x4b] sm:$0xff] }
  0x31   : > { %v3333_v42 = vpack.i.bf16 %v407_v39, %v406_v38  ;;  %v3343_v49 = vpack.i.bf16 %v411_v45, %v410_v44  ;;  %v414_v51 = vld [vmem:[%s3936_s7 + $0x7b] sm:$0xff]  ;;  %v413_v54 = vld [vmem:[%s3936_s7 + $0x6b] sm:$0xff]  ;;  %v431_v18 = vld [vmem:[%s3936_s7 + $0x143] sm:$0xff] }
  0x32   : > { %3224 = vrot.lane.b32.xlu1 %v3223_v34, %s3835_s8  ;;  %v400_v34 = vld [vmem:[%s3936_s7 + $0x152] sm:$0xff]  ;;  %v417_v61 = vld [vmem:[%s3936_s7 + $0x9b] sm:$0xff]  ;;  %v428_v19 = vld [vmem:[%s3936_s7 + $0x123] sm:$0xff] }
  0x33   : > { %3219 = vrot.lane.b32.xlu0 %v3218_v35, %s3835_s8  ;;  %v401_v35 = vld [vmem:[%s3936_s7 + $0x15a] sm:$0xff]  ;;  %v418_v57 = vld [vmem:[%s3936_s7 + $0xab] sm:$0xff] }
  0x34   : > { %v3318_v37 = vpack.i.bf16 %v401_v35, %v400_v34  ;;  %v422_v1 = vld [vmem:[%s3936_s7 + $0xdb] sm:$0xff]  ;;  %v421_v4 = vld [vmem:[%s3936_s7 + $0xcb] sm:$0xff]  ;;  %v435_v25 = vld [vmem:[%s3936_s7 + $0x173] sm:$0xff] }
  0x35   : > { %v426_v7 = vld [vmem:[%s3936_s7 + $0x10b] sm:$0xff]  ;;  %v425_v13 = vld [vmem:[%s3936_s7 + $0xfb] sm:$0xff]  ;;  %v432_v26 = vld [vmem:[%s3936_s7 + $0x153] sm:$0xff] }
  0x36   : > { %3234 = vrot.lane.b32.xlu1 %v3233_v40, %s3835_s8  ;;  %v404_v40 = vld [vmem:[%s3936_s7 + $0x3] sm:$0xff]  ;;  %v429_v20 = vld [vmem:[%s3936_s7 + $0x12b] sm:$0xff]  ;;  %v433_v27 = vld [vmem:[%s3936_s7 + $0x15b] sm:$0xff] }
  0x37   : > { %3229 = vrot.lane.b32.xlu0 %v3228_v41, %s3835_s8  ;;  %v405_v41 = vld [vmem:[%s3936_s7 + $0xb] sm:$0xff]  ;;  %v443_v38 = vld [vmem:[%s3936_s7 + $0x54] sm:$0xff]  ;;  %v2313_v8 = vld [vmem:[%s5607_s2 + $0xa0] sm:$0xff] }
  0x38   : > { %v3328_v43 = vpack.i.bf16 %v405_v41, %v404_v40  ;;  %v4109_v31 = vld [vmem:[%s3936_s7 + $0x24] sm:$0xff]  ;;  %v437_v34 = vld [vmem:[%s3936_s7 + $0xc] sm:$0xff]  ;;  %v4120_v39 = vld [vmem:[%s3936_s7 + $0x34] sm:$0xff] }
  0x39   : > { %v436_v33 = vld [vmem:[%s3936_s7 + $0x4] sm:$0xff]  ;;  %v4123_v40 = vld [vmem:[%s3936_s7 + $0x3c] sm:$0xff] }
  0x3a   : > { %3244 = vrot.lane.b32.xlu1 %v3243_v46, %s3835_s8  ;;  %v408_v46 = vld [vmem:[%s3936_s7 + $0x33] sm:$0xff]  ;;  %v447_v44 = vld [vmem:[%s3936_s7 + $0x84] sm:$0xff] }
  0x3b   : > { %3239 = vrot.lane.b32.xlu0 %v3238_v47, %s3835_s8  ;;  %v409_v47 = vld [vmem:[%s3936_s7 + $0x3b] sm:$0xff]  ;;  %v444_v45 = vld [vmem:[%s3936_s7 + $0x64] sm:$0xff] }
  0x3c   : > { %v3338_v50 = vpack.i.bf16 %v409_v47, %v408_v46  ;;  %v445_v46 = vld [vmem:[%s3936_s7 + $0x6c] sm:$0xff] }
  0x3e   : > { %3254 = vrot.lane.b32.xlu1 %v3253_v52, %s3836_s9  ;;  %v415_v52 = vld [vmem:[%s3936_s7 + $0x83] sm:$0xff] }
  0x3f   : > { %3249 = vrot.lane.b32.xlu0 %v3248_v53, %s3836_s9  ;;  %v412_v53 = vld [vmem:[%s3936_s7 + $0x63] sm:$0xff]  ;;  %v3353_v55 = vpack.i.bf16 %v415_v52, %v414_v51  ;;  %v451_v51 = vld [vmem:[%s3936_s7 + $0xb4] sm:$0xff] }
  0x40   : > { %v3348_v56 = vpack.i.bf16 %v413_v54, %v412_v53  ;;  %v448_v52 = vld [vmem:[%s3936_s7 + $0x94] sm:$0xff]  ;;  %v449_v53 = vld [vmem:[%s3936_s7 + $0x9c] sm:$0xff] }
  0x42   : > { %3264 = vrot.lane.b32.xlu1 %v3263_v59, %s3836_s9  ;;  %v419_v59 = vld [vmem:[%s3936_s7 + $0xb3] sm:$0xff] }
  0x43   : > { %3259 = vrot.lane.b32.xlu0 %v3258_v60, %s3836_s9  ;;  %v416_v60 = vld [vmem:[%s3936_s7 + $0x93] sm:$0xff]  ;;  %v3363_v62 = vpack.i.bf16 %v419_v59, %v418_v57  ;;  %v4145_v57 = vld [vmem:[%s3936_s7 + $0xe4] sm:$0xff] }
  0x44   : > { %v3358_v63 = vpack.i.bf16 %v417_v61, %v416_v60  ;;  %v452_v59 = vld [vmem:[%s3936_s7 + $0xc4] sm:$0xff]  ;;  %v453_v60 = vld [vmem:[%s3936_s7 + $0xcc] sm:$0xff] }
  0x46   : > { %3274 = vrot.lane.b32.xlu1 %v3273_v2, %s3836_s9  ;;  %v423_v2 = vld [vmem:[%s3936_s7 + $0xe3] sm:$0xff] }
  0x47   : > { %3269 = vrot.lane.b32.xlu0 %v3268_v3, %s3836_s9  ;;  %v420_v3 = vld [vmem:[%s3936_s7 + $0xc3] sm:$0xff]  ;;  %v3373_v5 = vpack.i.bf16 %v423_v2, %v422_v1  ;;  %v459_v1 = vld [vmem:[%s3936_s7 + $0x114] sm:$0xff] }
  0x48   : > { %v3368_v6 = vpack.i.bf16 %v421_v4, %v420_v3  ;;  %v4158_v2 = vld [vmem:[%s3936_s7 + $0xf4] sm:$0xff]  ;;  %v4161_v3 = vld [vmem:[%s3936_s7 + $0xfc] sm:$0xff] }
  0x4a   : > { %3284 = vrot.lane.b32.xlu1 %v3283_v9, %s3836_s9  ;;  %v427_v9 = vld [vmem:[%s3936_s7 + $0x113] sm:$0xff] }
  0x4b   : > { %3279 = vrot.lane.b32.xlu0 %v3278_v10, %s3836_s9  ;;  %v424_v10 = vld [vmem:[%s3936_s7 + $0xf3] sm:$0xff]  ;;  %v3383_v14 = vpack.i.bf16 %v427_v9, %v426_v7  ;;  %v463_v7 = vld [vmem:[%s3936_s7 + $0x144] sm:$0xff] }
  0x4e   : > { %3294 = vrot.lane.b32.xlu1 %v3293_v16, %s3836_s9  ;;  %v3378_v16 = vpack.i.bf16 %v425_v13, %v424_v10  ;;  %v460_v10 = vld [vmem:[%s3936_s7 + $0x124] sm:$0xff]  ;;  %v461_v13 = vld [vmem:[%s3936_s7 + $0x12c] sm:$0xff] }
  0x4f   : > { %3289 = vrot.lane.b32.xlu0 %v3288_v17, %s3836_s9  ;;  %v430_v17 = vld [vmem:[%s3936_s7 + $0x13b] sm:$0xff] }
  0x50   : > { %v3393_v21 = vpack.i.bf16 %v431_v18, %v430_v17  ;;  %v2308_v17 = vld [vmem:[%s5607_s2 + $0x78] sm:$0xff] }
  0x52   : > { %3304 = vrot.lane.b32.xlu1 %v3303_v22, %s3836_s9  ;;  %v3388_v22 = vpack.i.bf16 %v429_v20, %v428_v19  ;;  %v3468_v19 = vpack.i.bf16 %v461_v13, %v460_v10  ;;  %v466_v20 = vld [vmem:[%s3936_s7 + $0x16c] sm:$0xff] }
  0x53   : > { %3299 = vrot.lane.b32.xlu0 %v3298_v23, %s3836_s9  ;;  %v434_v23 = vld [vmem:[%s3936_s7 + $0x16b] sm:$0xff] }
  0x54   : > { %v3403_v28 = vpack.i.bf16 %v435_v25, %v434_v23  ;;  %v464_v25 = vld [vmem:[%s3936_s7 + $0x154] sm:$0xff] }
  0x56   : > { %3314 = vrot.lane.b32.xlu1 %v3313_v29, %s3836_s9  ;;  %v3398_v29 = vpack.i.bf16 %v433_v27, %v432_v26  ;;  %v465_v26 = vld [vmem:[%s3936_s7 + $0x15c] sm:$0xff] }
  0x57   : > { %3309 = vrot.lane.b32.xlu0 %v3308_v30, %s3836_s9  ;;  %v4106_v30 = vld [vmem:[%s3936_s7 + $0x1c] sm:$0xff] }
  0x58   : > { %v3413_v35 = vpack.i.bf16 %v4109_v31, %v4106_v30 }
  0x5a   : > { %3324 = vrot.lane.b32.xlu1 %v3323_v36, %s3836_s9  ;;  %v3408_v36 = vpack.i.bf16 %v437_v34, %v436_v33  ;;  %v3478_v33 = vpack.i.bf16 %v465_v26, %v464_v25  ;;  %v2305_v34 = vld [vmem:[%s5607_s2 + $0x60] sm:$0xff] }
  0x5b   : > { %3319 = vrot.lane.b32.xlu0 %v3318_v37, %s3836_s9  ;;  %v442_v37 = vld [vmem:[%s3936_s7 + $0x4c] sm:$0xff] }
  0x5c   : > { %v3423_v41 = vpack.i.bf16 %v443_v38, %v442_v37  ;;  %v4212_v37 = vld [vmem:[%s3936_s7 + $0x38] sm:$0xff] }
  0x5e   : > { %3334 = vrot.lane.b32.xlu1 %v3333_v42, %s3837_s10  ;;  %v3418_v42 = vpack.i.bf16 %v4123_v40, %v4120_v39 }
  0x5f   : > { %3329 = vrot.lane.b32.xlu0 %v3328_v43, %s3837_s10  ;;  %v446_v43 = vld [vmem:[%s3936_s7 + $0x7c] sm:$0xff] }
  0x60   : > { %v3433_v47 = vpack.i.bf16 %v447_v44, %v446_v43  ;;  %v2304_v44 = vld [vmem:[%s5607_s2 + $0x58] sm:$0xff] }
  0x62   : > { %3344 = vrot.lane.b32.xlu1 %v3343_v49, %s3837_s10  ;;  %v3428_v49 = vpack.i.bf16 %v445_v46, %v444_v45 }
  0x63   : > { %3339 = vrot.lane.b32.xlu0 %v3338_v50, %s3837_s10  ;;  %v450_v50 = vld [vmem:[%s3936_s7 + $0xac] sm:$0xff] }
  0x64   : > { %v3443_v54 = vpack.i.bf16 %v451_v51, %v450_v50  ;;  %v2303_v51 = vld [vmem:[%s5607_s2 + $0x50] sm:$0xff] }
  0x66   : > { %3354 = vrot.lane.b32.xlu1 %v3353_v55, %s3837_s10  ;;  %v3438_v55 = vpack.i.bf16 %v449_v53, %v448_v52  ;;  %v4241_v52 = vld [vmem:[%s3936_s7 + $0x48] sm:$0xff]  ;;  %v4244_v53 = vld [vmem:[%s3936_s7 + $0x50] sm:$0xff] }
  0x67   : > { %3349 = vrot.lane.b32.xlu0 %v3348_v56, %s3837_s10  ;;  %v4142_v56 = vld [vmem:[%s3936_s7 + $0xdc] sm:$0xff] }
  0x68   : > { %v3453_v61 = vpack.i.bf16 %v4145_v57, %v4142_v56 }
  0x6a   : > { %3364 = vrot.lane.b32.xlu1 %v3363_v62, %s3837_s10  ;;  %v3448_v62 = vpack.i.bf16 %v453_v60, %v452_v59  ;;  %v2302_v59 = vld [vmem:[%s5607_s2 + $0x48] sm:$0xff] }
  0x6b   : > { %3359 = vrot.lane.b32.xlu0 %v3358_v63, %s3837_s10  ;;  %v4154_v63 = vld [vmem:[%s3936_s7 + $0x10c] sm:$0xff] }
  0x6c   : > { %v3463_v4 = vpack.i.bf16 %v459_v1, %v4154_v63 }
  0x6e   : > { %3374 = vrot.lane.b32.xlu1 %v3373_v5, %s3837_s10  ;;  %v3458_v5 = vpack.i.bf16 %v4161_v3, %v4158_v2 }
  0x6f   : > { %3369 = vrot.lane.b32.xlu0 %v3368_v6, %s3837_s10  ;;  %v462_v6 = vld [vmem:[%s3936_s7 + $0x13c] sm:$0xff] }
  0x70   : > { %v3473_v18 = vpack.i.bf16 %v463_v7, %v462_v6  ;;  %v2301_v7 = vld [vmem:[%s5607_s2 + $0x40] sm:$0xff] }
  0x72   : > { %3384 = vrot.lane.b32.xlu1 %v3383_v14, %s3837_s10 }
  0x73   : > { %3379 = vrot.lane.b32.xlu0 %v3378_v16, %s3837_s10  ;;  %v3839_v16 = vmov 0.0  }
  0x74   : > { %2420 = vmatprep.subr.mxu0 %v3839_v16  ;;  %3052 = vmatprep.subr.mxu1 %v3839_v16 }
  0x75   : > { %2421 = vmatpush1.msra.mxu0 %v2308_v17  ;;  %3076 = vmatpush1.msra.mxu1 %v2308_v17  ;;  %v4276_v17 = vld [vmem:[%s3936_s7 + $0xc0] sm:$0xff] }
  0x76   : > { %3394 = vrot.lane.b32.xlu1 %v3393_v21, %s3837_s10  ;;  %v467_v21 = vld [vmem:[%s3936_s7 + $0x174] sm:$0xff]  ;;  %2422 = vmatprep.subr.mxu0 %v3839_v16 }
  0x77   : > { %3389 = vrot.lane.b32.xlu0 %v3388_v22, %s3837_s10  ;;  %v2307_v22 = vld [vmem:[%s5607_s2 + $0x70] sm:$0xff]  ;;  %3053 = vmatprep.subr.mxu1 %v3839_v16 }
  0x78   : > { %2423 = vmatpush1.msra.mxu0 %v2307_v22  ;;  %3077 = vmatpush1.msra.mxu1 %v2307_v22  ;;  %v323_v22 = vld [vmem:[%s3936_s7 + $0xb0] sm:$0xff] }
  0x79   : > { %2424 = vmatprep.subr.mxu0 %v3839_v16  ;;  %3054 = vmatprep.subr.mxu1 %v3839_v16 }
  0x7a   : > { %3404 = vrot.lane.b32.xlu1 %v3403_v28, %s3837_s10  ;;  %v2306_v28 = vld [vmem:[%s5607_s2 + $0x68] sm:$0xff] }
  0x7b   : > { %3399 = vrot.lane.b32.xlu0 %v3398_v29, %s3837_s10  ;;  %v3483_v29 = vpack.i.bf16 %v467_v21, %v466_v20  ;;  %2425 = vmatpush1.msra.mxu0 %v2306_v28  ;;  %v2300_v20 = vld [vmem:[%s5607_s2 + $0x38] sm:$0xff]  ;;  %v322_v21 = vld [vmem:[%s3936_s7 + $0xa8] sm:$0xff] }
  0x7c   : > { %3078 = vmatpush1.msra.mxu1 %v2306_v28  ;;  %2426 = vmatprep.subr.mxu0 %v3839_v16  ;;  %v3518_v26 = vpack.i.bf16 %v323_v22, %v322_v21  ;;  %v2299_v28 = vld [vmem:[%s5607_s2 + $0x30] sm:$0xff]  ;;  %v337_v21 = vld [vmem:[%s3936_s7 + $0x158] sm:$0xff] }
  0x7d   : > { %3055 = vmatprep.subr.mxu1 %v3839_v16  ;;  %2427 = vmatpush1.msra.mxu0 %v2305_v34 }
  0x7e   : > { %3414 = vrot.lane.b32.xlu1 %v3413_v35, %s3838_s11  ;;  %3079 = vmatpush1.msra.mxu1 %v2305_v34  ;;  %v4303_v34 = vld [vmem:[%s3936_s7 + $0xf8] sm:$0xff] }
  0x7f   : > { %3409 = vrot.lane.b32.xlu0 %v3408_v36, %s3838_s11  ;;  %v4209_v36 = vld [vmem:[%s3936_s7 + $0x30] sm:$0xff]  ;;  %2428 = vmatprep.subr.mxu0 %v3839_v16 }
  0x80   : > { %v3493_v43 = vpack.i.bf16 %v4212_v37, %v4209_v36  ;;  %3056 = vmatprep.subr.mxu1 %v3839_v16  ;;  %2429 = vmatpush1.msra.mxu0 %v2304_v44 }
  0x81   : > { %3080 = vmatpush1.msra.mxu1 %v2304_v44  ;;  %2430 = vmatprep.subr.mxu0 %v3839_v16 }
  0x82   : > { %3424 = vrot.lane.b32.xlu1 %v3423_v41, %s3838_s11  ;;  %v310_v41 = vld [vmem:[%s3936_s7 + $0x18] sm:$0xff]  ;;  %3057 = vmatprep.subr.mxu1 %v3839_v16 }
  0x83   : > { %3419 = vrot.lane.b32.xlu0 %v3418_v42, %s3838_s11  ;;  %v311_v42 = vld [vmem:[%s3936_s7 + $0x20] sm:$0xff]  ;;  %2431 = vmatpush1.msra.mxu0 %v2303_v51 }
  0x84   : > { %v3488_v45 = vpack.i.bf16 %v311_v42, %v310_v41  ;;  %3081 = vmatpush1.msra.mxu1 %v2303_v51  ;;  %2432 = vmatprep.subr.mxu0 %v3839_v16  ;;  %v4310_v42 = vld [vmem:[%s3936_s7 + $0xd8] sm:$0xff] }
  0x85   : > { %3058 = vmatprep.subr.mxu1 %v3839_v16  ;;  %2433 = vmatpush1.msra.mxu0 %v2302_v59 }
  0x86   : > { %3434 = vrot.lane.b32.xlu1 %v3433_v47, %s3838_s11  ;;  %v4232_v47 = vld [vmem:[%s3936_s7 + $0x60] sm:$0xff]  ;;  %3082 = vmatpush1.msra.mxu1 %v2302_v59 }
  0x87   : > { %3429 = vrot.lane.b32.xlu0 %v3428_v49, %s3838_s11  ;;  %v317_v49 = vld [vmem:[%s3936_s7 + $0x68] sm:$0xff]  ;;  %2434 = vmatprep.subr.mxu0 %v3839_v16 }
  0x88   : > { %3059 = vmatprep.subr.mxu1 %v3839_v16  ;;  %2435 = vmatpush1.msra.mxu0 %v2301_v7 }
  0x89   : > { %3083 = vmatpush1.msra.mxu1 %v2301_v7  ;;  %2436 = vmatprep.subr.mxu0 %v3839_v16  ;;  %v2296_v7 = vld [vmem:[%s5607_s2 + $0x18] sm:$0xff] }
  0x8a   : > { %3444 = vrot.lane.b32.xlu1 %v3443_v54, %s3838_s11  ;;  %v3503_v54 = vpack.i.bf16 %v317_v49, %v4232_v47  ;;  %3060 = vmatprep.subr.mxu1 %v3839_v16 }
  0x8b   : > { %3439 = vrot.lane.b32.xlu0 %v3438_v55, %s3838_s11  ;;  %v3498_v55 = vpack.i.bf16 %v4244_v53, %v4241_v52  ;;  %2437 = vmatpush1.msra.mxu0 %v2300_v20 }
  0x8c   : > { %3084 = vmatpush1.msra.mxu1 %v2300_v20  ;;  %2438 = vmatprep.subr.mxu0 %v3839_v16  ;;  %v336_v20 = vld [vmem:[%s3936_s7 + $0x150] sm:$0xff] }
  0x8d   : > { %3061 = vmatprep.subr.mxu1 %v3839_v16  ;;  %2439 = vmatpush1.msra.mxu0 %v2299_v28 }
  0x8e   : > { %3454 = vrot.lane.b32.xlu1 %v3453_v61, %s3838_s11  ;;  %v320_v61 = vld [vmem:[%s3936_s7 + $0x90] sm:$0xff]  ;;  %3085 = vmatpush1.msra.mxu1 %v2299_v28  ;;  %v3553_v28 = vpack.i.bf16 %v337_v21, %v336_v20  ;;  %v2294_v20 = vld [vmem:[%s5607_s2 + $0x8] sm:$0xff] }
  0x8f   : > { %3449 = vrot.lane.b32.xlu0 %v3448_v62, %s3838_s11  ;;  %v321_v62 = vld [vmem:[%s3936_s7 + $0x98] sm:$0xff]  ;;  %2440 = vmatprep.subr.mxu0 %v3839_v16  ;;  %v338_v21 = vld [vmem:[%s3936_s7 + $0x168] sm:$0xff] }
  0x90   : > { %v4170_v9 = vpop.permute.xlu1 %3179  ;;  %v3513_v6 = vpack.i.bf16 %v321_v62, %v320_v61  ;;  %3062 = vmatprep.subr.mxu1 %v3839_v16  ;;  %v2297_v61 = vld [vmem:[%s5607_s2 + $0x20] sm:$0xff]  ;;  %v4339_v62 = vld [vmem:[%s3936_s7 + $0x108] sm:$0xff] }
  0x91   : > { %v4174_v14 = vpop.permute.xlu0 %3169 }
  0x92   : > { %3464 = vrot.lane.b32.xlu1 %v3463_v4, %s3838_s11  ;;  %v318_v4 = vld [vmem:[%s3936_s7 + $0x78] sm:$0xff] }
  0x93   : > { %3459 = vrot.lane.b32.xlu0 %v3458_v5, %s3838_s11  ;;  %v319_v5 = vld [vmem:[%s3936_s7 + $0x80] sm:$0xff] }
  0x94   : > { %v4188_v23 = vpop.permute.xlu1 %3184  ;;  %v3508_v10 = vpack.i.bf16 %v319_v5, %v318_v4  ;;  %v4342_v4 = vld [vmem:[%s3936_s7 + $0x110] sm:$0xff] }
  0x95   : > { %v4194_v27 = vpop.permute.xlu0 %3174 }
  0x96   : > { %3474 = vrot.lane.b32.xlu1 %v3473_v18, %s3838_s11  ;;  %v4279_v18 = vld [vmem:[%s3936_s7 + $0xc8] sm:$0xff] }
  0x97   : > { %3469 = vrot.lane.b32.xlu0 %v3468_v19, %s3838_s11  ;;  %v3523_v25 = vpack.i.bf16 %v4279_v18, %v4276_v17 }
  0x98   : > { %v4206_v35 = vpop.permute.xlu1 %3194 }
  0x99   : > { %5659 = vst [vmem:[#allocation5_spill] sm:$0xff] %v4206_v35  ;;  %v4214_v38 = vpop.permute.xlu0 %3189 }
  0x9a   : > { %5660 = vst [vmem:[#allocation6_spill] sm:$0xff] %v4214_v38  ;;  %3484 = vrot.lane.b32.xlu1 %v3483_v29, %s3838_s11 }
  0x9b   : > { %3479 = vrot.lane.b32.xlu0 %v3478_v33, %s3838_s11  ;;  %s3840_s11 = smov 80   ;;  %v4300_v33 = vld [vmem:[%s3936_s7 + $0xf0] sm:$0xff] }
  0x9c   : > { %v4227_v46 = vpop.permute.xlu1 %3204  ;;  %v3533_v44 = vpack.i.bf16 %v4303_v34, %v4300_v33 }
  0x9d   : > { %5661 = vst [vmem:[#allocation7_spill] sm:$0xff] %v4227_v46  ;;  %v4235_v50 = vpop.permute.xlu0 %3199 }
  0x9e   : > { %5662 = vst [vmem:[#allocation8_spill] sm:$0xff] %v4235_v50  ;;  %3494 = vrot.lane.b32.xlu1 %v3493_v43, %s3840_s11  ;;  %v327_v43 = vld [vmem:[%s3936_s7 + $0xe0] sm:$0xff] }
  0x9f   : > { %3489 = vrot.lane.b32.xlu0 %v3488_v45, %s3840_s11  ;;  %v2298_v45 = vld [vmem:[%s5607_s2 + $0x28] sm:$0xff]  ;;  %v3528_v49 = vpack.i.bf16 %v327_v43, %v4310_v42  ;;  %v2295_v43 = vld [vmem:[%s5607_s2 + $0x10] sm:$0xff] }
  0xa0   : > { %v4256_v60 = vpop.permute.xlu1 %3214  ;;  %2441 = vmatpush1.msra.mxu0 %v2298_v45  ;;  %3086 = vmatpush1.msra.mxu1 %v2298_v45  ;;  %v499_v45 = vld [vmem:[%s4360_s12] sm:$0xff] }
  0xa1   : > { %v4260_v1 = vpop.permute.xlu0 %3209  ;;  %2442 = vmatprep.subr.mxu0 %v3839_v16  ;;  %3063 = vmatprep.subr.mxu1 %v3839_v16 }
  0xa2   : > { %3504 = vrot.lane.b32.xlu1 %v3503_v54, %s3840_s11  ;;  %v4326_v54 = vld [vmem:[%s3936_s7 + $0x120] sm:$0xff]  ;;  %2443 = vmatpush1.msra.mxu0 %v2297_v61 }
  0xa3   : > { %3499 = vrot.lane.b32.xlu0 %v3498_v55, %s3840_s11  ;;  %v4329_v55 = vld [vmem:[%s3936_s7 + $0x128] sm:$0xff]  ;;  %3087 = vmatpush1.msra.mxu1 %v2297_v61 }
  0xa4   : > { %v4271_v13 = vpop.permute.xlu1 %3224  ;;  %v3543_v5 = vpack.i.bf16 %v4329_v55, %v4326_v54  ;;  %2444 = vmatprep.subr.mxu0 %v3839_v16  ;;  %3064 = vmatprep.subr.mxu1 %v3839_v16 }
  0xa5   : > { %v4281_v19 = vpop.permute.xlu0 %3219  ;;  %2445 = vmatpush1.msra.mxu0 %v2296_v7  ;;  %3088 = vmatpush1.msra.mxu1 %v2296_v7 }
  0xa6   : > { %3514 = vrot.lane.b32.xlu1 %v3513_v6, %s3840_s11  ;;  %v3538_v6 = vpack.i.bf16 %v4342_v4, %v4339_v62  ;;  %2446 = vmatprep.subr.mxu0 %v3839_v16 }
  0xa7   : > { %3509 = vrot.lane.b32.xlu0 %v3508_v10, %s3840_s11  ;;  %3065 = vmatprep.subr.mxu1 %v3839_v16 }
  0xa8   : > { %v4297_v29 = vpop.permute.xlu1 %3234  ;;  %2447 = vmatpush1.msra.mxu0 %v2295_v43  ;;  %3089 = vmatpush1.msra.mxu1 %v2295_v43 }
  0xa9   : > { %5663 = vst [vmem:[#allocation9_spill] sm:$0xff] %v4297_v29  ;;  %v4305_v41 = vpop.permute.xlu0 %3229  ;;  %2448 = vmatprep.subr.mxu0 %v3839_v16  ;;  %3066 = vmatprep.subr.mxu1 %v3839_v16 }
  0xaa   : > { %5664 = vst [vmem:[#allocation10_spill] sm:$0xff] %v4305_v41  ;;  %3524 = vrot.lane.b32.xlu1 %v3523_v25, %s3840_s11  ;;  %v334_v25 = vld [vmem:[%s3936_s7 + $0x138] sm:$0xff]  ;;  %2449 = vmatpush1.msra.mxu0 %v2294_v20 }
  0xab   : > { %3519 = vrot.lane.b32.xlu0 %v3518_v26, %s3840_s11  ;;  %v335_v26 = vld [vmem:[%s3936_s7 + $0x140] sm:$0xff]  ;;  %3090 = vmatpush1.msra.mxu1 %v2294_v20  ;;  %v2314_v20 = vld [vmem:[%s5607_s2 + $0xa8] sm:$0xff] }
  0xac   : > { %v4321_v51 = vpop.permute.xlu1 %3244  ;;  %2450 = vmatprep.subr.mxu0 %v3839_v16  ;;  %3067 = vmatprep.subr.mxu1 %v3839_v16 }
  0xad   : > { %5665 = vst [vmem:[#allocation11_spill] sm:$0xff] %v4321_v51  ;;  %v4331_v59 = vpop.permute.xlu0 %3239  ;;  %v2884_v51 = vld [vmem:[%s3936_s7 + $0xfa] sm:$0xff] }
  0xae   : > { %5666 = vst [vmem:[#allocation12_spill] sm:$0xff] %v4331_v59  ;;  %3534 = vrot.lane.b32.xlu1 %v3533_v44, %s3840_s11  ;;  %v3548_v44 = vpack.i.bf16 %v335_v26, %v334_v25  ;;  %v2293_v26 = vld [vmem:[%s5607_s2] sm:$0xff]  ;;  %v2930_v59 = vld [vmem:[%s3936_s7 + $0x54] sm:$0xff] }
  0xaf   : > { %3529 = vrot.lane.b32.xlu0 %v3528_v49, %s3840_s11  ;;  %v500_v49 = vld [vmem:[%s4360_s12 + $0x8] sm:$0xff]  ;;  %2451 = vmatpush1.msra.mxu0 %v2293_v26 }
  0xb0   : > { %v4355_v10 = vpop.permute.xlu1 %3254  ;;  %v3563_v25 = vpack.i.bf16 %v500_v49, %v499_v45  ;;  %3091 = vmatpush1.msra.mxu1 %v2293_v26  ;;  %2468 = vmatprep.subr.mxu0 %v3839_v16  ;;  %v2315_v49 = vld [vmem:[%s5607_s2 + $0xb0] sm:$0xff] }
  0xb1   : > { %v4364_v22 = vpop.permute.xlu0 %3249  ;;  %3068 = vmatprep.subr.mxu1 %v3839_v16 }
  0xb2   : > { %3544 = vrot.lane.b32.xlu1 %v3543_v5, %s3840_s11 }
  0xb3   : > { %3539 = vrot.lane.b32.xlu0 %v3538_v6, %s3840_s11  ;;  %v339_v6 = vld [vmem:[%s3936_s7 + $0x170] sm:$0xff] }
  0xb4   : > { %v4377_v61 = vpop.permute.xlu1 %3264  ;;  %v3558_v7 = vpack.i.bf16 %v339_v6, %v338_v21 }
  0xb5   : > { %v4381_v5 = vpop.permute.xlu0 %3259 }
  0xb6   : > { %3554 = vrot.lane.b32.xlu1 %v3553_v28, %s3840_s11  ;;  %v2316_v28 = vld [vmem:[%s5607_s2 + $0xb8] sm:$0xff] }
  0xb7   : > { %3549 = vrot.lane.b32.xlu0 %v3548_v44, %s3840_s11  ;;  %2469 = vmatpush2.msra.mxu0 %v2316_v28 }
  0xb8   : > { %v4395_v43 = vpop.permute.xlu1 %3274  ;;  %3092 = vmatpush2.msra.mxu1 %v2316_v28  ;;  %2470 = vmatprep.subr.mxu0 %v3839_v16  ;;  %v2852_v28 = vld [vmem:[%s3936_s7 + $0xe1] sm:$0xff] }
  0xb9   : > { %5667 = vst [vmem:[#allocation13_spill] sm:$0xff] %v4395_v43  ;;  %v4397_v15 = vpop.permute.xlu0 %3269  ;;  %3069 = vmatprep.subr.mxu1 %v3839_v16  ;;  %2471 = vmatpush2.msra.mxu0 %v2315_v49 }
  0xba   : > { %5668 = vst [vmem:[#allocation14_spill] sm:$0xff] %v4397_v15  ;;  %3564 = vrot.lane.b32.xlu1 %v3563_v25, %s3840_s11  ;;  %3093 = vmatpush2.msra.mxu1 %v2315_v49 }
  0xbb   : > { %3559 = vrot.lane.b32.xlu0 %v3558_v7, %s3840_s11  ;;  %s3841_s11 = smov 96   ;;  %2472 = vmatprep.subr.mxu0 %v3839_v16 }
  0xbc   : > { %v4406_v44 = vpop.permute.xlu1 %3284  ;;  %3070 = vmatprep.subr.mxu1 %v3839_v16  ;;  %2473 = vmatpush2.msra.mxu0 %v2314_v20 }
  0xbd   : > { %5669 = vst [vmem:[#allocation15_spill] sm:$0xff] %v4406_v44  ;;  %v4410_v45 = vpop.permute.xlu0 %3279  ;;  %3094 = vmatpush2.msra.mxu1 %v2314_v20  ;;  %2474 = vmatprep.subr.mxu0 %v3839_v16 }
  0xbe   : > { %5670 = vst [vmem:[#allocation16_spill] sm:$0xff] %v4410_v45  ;;  %1618 = vrot.lane.b32.xlu1 %v4106_v30, %s3835_s8  ;;  %3071 = vmatprep.subr.mxu1 %v3839_v16  ;;  %v2312_v30 = vld [vmem:[%s5607_s2 + $0x98] sm:$0xff]  ;;  %v3003_v45 = vld [vmem:[%s3936_s7 + $0x121] sm:$0xff] }
  0xbf   : > { %3569 = vrot.lane.b32.xlu0 %v3568_v58, %s3841_s11  ;;  %2475 = vmatpush2.msra.mxu0 %v2313_v8 }
  0xc0   : > { %v4426_v21 = vpop.permute.xlu1 %3294  ;;  %3095 = vmatpush2.msra.mxu1 %v2313_v8  ;;  %2476 = vmatprep.subr.mxu0 %v3839_v16 }
  0xc1   : > { %v4428_v6 = vpop.permute.xlu0 %3289  ;;  %3072 = vmatprep.subr.mxu1 %v3839_v16  ;;  %2477 = vmatpush2.msra.mxu0 %v2312_v30 }
  0xc2   : > { %1744 = vrot.lane.b32.xlu1 %v4209_v36, %s3836_s9  ;;  %3096 = vmatpush2.msra.mxu1 %v2312_v30 }
  0xc3   : > { %1650 = vrot.lane.b32.xlu0 %v4142_v56, %s3835_s8  ;;  %v2311_v56 = vld [vmem:[%s5607_s2 + $0x90] sm:$0xff]  ;;  %2478 = vmatprep.subr.mxu0 %v3839_v16 }
  0xc4   : > { %v4439_v24 = vpop.permute.xlu1 %3304  ;;  %3073 = vmatprep.subr.mxu1 %v3839_v16  ;;  %2479 = vmatpush2.msra.mxu0 %v2311_v56 }
  0xc5   : > { %5671 = vst [vmem:[#allocation17_spill] sm:$0xff] %v4439_v24  ;;  %v4443_v58 = vpop.permute.xlu0 %3299  ;;  %3097 = vmatpush2.msra.mxu1 %v2311_v56  ;;  %2480 = vmatprep.subr.mxu0 %v3839_v16  ;;  %v3000_v56 = vld [vmem:[%s3936_s7 + $0xf9] sm:$0xff] }
  0xc6   : > { %1870 = vrot.lane.b32.xlu1 %v3939_v0, %s3837_s10  ;;  %v5674_v0 = vpack.i.bf16 %v4026_v11, %v3997_v48  ;;  %3074 = vmatprep.subr.mxu1 %v3839_v16  ;;  %v2309_v48 = vld [vmem:[%s5607_s2 + $0x80] sm:$0xff] }
  0xc7   : > { %1776 = vrot.lane.b32.xlu0 %v4300_v33, %s3836_s9  ;;  %v2310_v33 = vld [vmem:[%s5607_s2 + $0x88] sm:$0xff] }
  0xc8   : > { %v4457_v36 = vpop.permute.xlu1 %3314  ;;  %2481 = vmatpush2.msra.mxu0 %v2310_v33  ;;  %3098 = vmatpush2.msra.mxu1 %v2310_v33  ;;  %v2836_v11 = vld [vmem:[%s3936_s7 + $0x21] sm:$0xff] }
  0xc9   : > { %5672 = vst [vmem:[#allocation18_spill] sm:$0xff] %v4457_v36  ;;  %v4459_v25 = vpop.permute.xlu0 %3309  ;;  %2482 = vmatprep.subr.mxu0 %v3839_v16  ;;  %3075 = vmatprep.subr.mxu1 %v3839_v16  ;;  %v3578_v20 = vpack.i.bf16 %v2852_v28, %v2836_v11  ;;  %v2853_v11 = vld [vmem:[%s3936_s7 + $0xf1] sm:$0xff]  ;;  %v2871_v36 = vld [vmem:[%s3936_s7 + $0x62] sm:$0xff] }
  0xca   : > { %5673 = vst [vmem:[#allocation19_spill] sm:$0xff] %v4459_v25  ;;  %3574 = vrot.lane.b32.xlu1 %v5674_v0, %s3842_s5  ;;  %2483 = vmatpush2.msra.mxu0 %v2309_v48  ;;  %v3291_v25 = vunpack.i.l.bf16 %v4428_v6 }
  0xcb   : > { %1902 = vrot.lane.b32.xlu0 %v3978_v32, %s3837_s10  ;;  %3099 = vmatpush2.msra.mxu1 %v2309_v48  ;;  %v2837_v48 = vld [vmem:[%s3936_s7 + $0x31] sm:$0xff] }
  0xcc   : > { %v4472_v7 = vpop.permute.xlu1 %3324 }
  0xcd   : > { %5675 = vst [vmem:[#allocation20_spill] sm:$0xff] %v4472_v7  ;;  %v4476_v26 = vpop.permute.xlu0 %3319 }
  0xce   : > { %5676 = vst [vmem:[#allocation21_spill] sm:$0xff] %v4476_v26  ;;  %1652 = vrot.lane.b32.xlu1 %v4145_v57, %s3835_s8  ;;  %v2984_v57 = vld [vmem:[%s3936_s7 + $0x39] sm:$0xff] }
  0xcf   : > { %1620 = vrot.lane.b32.xlu0 %v4109_v31, %s3835_s8  ;;  %v2866_v31 = vld [vmem:[%s3936_s7 + $0x22] sm:$0xff] }
  0xd0   : > { %v4487_v32 = vpop.permute.xlu1 %3334  ;;  %v3583_v30 = vpack.i.bf16 %v4029_v12, %v2866_v31  ;;  %v3588_v31 = vpack.i.bf16 %v2853_v11, %v2837_v48 }
  0xd1   : > { %v4491_v49 = vpop.permute.xlu0 %3329 }
  0xd2   : > { %1778 = vrot.lane.b32.xlu1 %v4303_v34, %s3836_s9 }
  0xd3   : > { %1746 = vrot.lane.b32.xlu0 %v4212_v37, %s3836_s9 }
  0xd4   : > { %v4499_v16 = vpop.permute.xlu1 %3344 }
  0xd5   : > { %5677 = vst [vmem:[#allocation22_spill] sm:$0xff] %v4499_v16  ;;  %v4501_v8 = vpop.permute.xlu0 %3339  ;;  %v4726_v16 = vld [vmem:[%s3936_s7 + $0x141] sm:$0xff] }
  0xd6   : > { %1872 = vrot.lane.b32.xlu1 %v2984_v57, %s3837_s10 }
  0xd7   : > { %3579 = vrot.lane.b32.xlu0 %v3578_v20, %s3841_s11  ;;  %v2985_v20 = vld [vmem:[%s3936_s7 + $0x49] sm:$0xff] }
  0xd8   : > { %v4506_v34 = vpop.permute.xlu1 %3354 }
  0xd9   : > { %5678 = vst [vmem:[#allocation23_spill] sm:$0xff] %v4506_v34  ;;  %v4509_v37 = vpop.permute.xlu0 %3349 }
  0xda   : > { %5679 = vst [vmem:[#allocation24_spill] sm:$0xff] %v4509_v37  ;;  %3584 = vrot.lane.b32.xlu1 %v3583_v30, %s3842_s5  ;;  %v2867_v30 = vld [vmem:[%s3936_s7 + $0x32] sm:$0xff]  ;;  %v3211_v37 = vunpack.i.l.bf16 %v4260_v1 }
  0xdb   : > { %1904 = vrot.lane.b32.xlu0 %v3000_v56, %s3837_s10 }
  0xdc   : > { %v4513_v0 = vpop.permute.xlu1 %3364 }
  0xdd   : > { %5680 = vst [vmem:[#allocation25_spill] sm:$0xff] %v4513_v0  ;;  %v4515_v33 = vpop.permute.xlu0 %3359 }
  0xde   : > { %5681 = vst [vmem:[#allocation26_spill] sm:$0xff] %v4515_v33  ;;  %1654 = vrot.lane.b32.xlu1 %v4158_v2, %s3835_s8  ;;  %v2883_v2 = vld [vmem:[%s3936_s7 + $0xf2] sm:$0xff] }
  0xdf   : > { %1622 = vrot.lane.b32.xlu0 %v4120_v39, %s3835_s8  ;;  %v3593_v7 = vpack.i.bf16 %v2883_v2, %v2867_v30  ;;  %v3598_v2 = vpack.i.bf16 %v3000_v56, %v2984_v57  ;;  %v2929_v56 = vld [vmem:[%s3936_s7 + $0x4c] sm:$0xff] }
  0xe0   : > { %v4521_v12 = vpop.permute.xlu1 %3374 }
  0xe1   : > { %v4525_v28 = vpop.permute.xlu0 %3369 }
  0xe2   : > { %1780 = vrot.lane.b32.xlu1 %v4339_v62, %s3836_s9  ;;  %v3001_v62 = vld [vmem:[%s3936_s7 + $0x109] sm:$0xff]  ;;  %v3371_v15 = vunpack.i.l.bf16 %v4525_v28 }
  0xe3   : > { %1748 = vrot.lane.b32.xlu0 %v4241_v52, %s3836_s9 }
  0xe4   : > { %v4534_v0 = vpop.permute.xlu1 %3384 }
  0xe5   : > { %5682 = vst [vmem:[#allocation27_spill] sm:$0xff] %v4534_v0  ;;  %v4536_v39 = vpop.permute.xlu0 %3379 }
  0xe6   : > { %1874 = vrot.lane.b32.xlu1 %v2985_v20, %s3837_s10 }
  0xe7   : > { %3589 = vrot.lane.b32.xlu0 %v3588_v31, %s3841_s11 }
  0xe8   : > { %v4540_v44 = vpop.permute.xlu1 %3394 }
  0xe9   : > { %5683 = vst [vmem:[#allocation28_spill] sm:$0xff] %v4540_v44  ;;  %v4543_v52 = vpop.permute.xlu0 %3389 }
  0xea   : > { %5684 = vst [vmem:[#allocation29_spill] sm:$0xff] %v4543_v52  ;;  %3594 = vrot.lane.b32.xlu1 %v3593_v7, %s3842_s5  ;;  %v2986_v7 = vld [vmem:[%s3936_s7 + $0x51] sm:$0xff]  ;;  %v308_v52 = vld [vmem:[%s3936_s7] sm:$0xff] }
  0xeb   : > { %1906 = vrot.lane.b32.xlu0 %v3001_v62, %s3837_s10 }
  0xec   : > { %v4547_v48 = vpop.permute.xlu1 %3404 }
  0xed   : > { %5685 = vst [vmem:[#allocation30_spill] sm:$0xff] %v4547_v48  ;;  %v4549_v11 = vpop.permute.xlu0 %3399  ;;  %v2868_v48 = vld [vmem:[%s3936_s7 + $0x3a] sm:$0xff] }
  0xee   : > { %5686 = vst [vmem:[#allocation31_spill] sm:$0xff] %v4549_v11  ;;  %1656 = vrot.lane.b32.xlu1 %v4161_v3, %s3835_s8 }
  0xef   : > { %1624 = vrot.lane.b32.xlu0 %v4123_v40, %s3835_s8  ;;  %v3603_v40 = vpack.i.bf16 %v2884_v51, %v2868_v48 }
  0xf0   : > { %v4555_v31 = vpop.permute.xlu1 %3414 }
  0xf1   : > { %v4557_v30 = vpop.permute.xlu0 %3409 }
  0xf2   : > { %1782 = vrot.lane.b32.xlu1 %v4342_v4, %s3836_s9  ;;  %v3002_v4 = vld [vmem:[%s3936_s7 + $0x111] sm:$0xff]  ;;  %v3411_v41 = vunpack.i.l.bf16 %v4557_v30 }
  0xf3   : > { %1750 = vrot.lane.b32.xlu0 %v4244_v53, %s3836_s9 }
  0xf4   : > { %v4566_v3 = vpop.permute.xlu1 %3424 }
  0xf5   : > { %5687 = vst [vmem:[#allocation32_spill] sm:$0xff] %v4566_v3  ;;  %v4568_v46 = vpop.permute.xlu0 %3419 }
  0xf6   : > { %1876 = vrot.lane.b32.xlu1 %v2986_v7, %s3837_s10 }
  0xf7   : > { %3599 = vrot.lane.b32.xlu0 %v3598_v2, %s3841_s11  ;;  %v2987_v2 = vld [vmem:[%s3936_s7 + $0x61] sm:$0xff] }
  0xf8   : > { %v4572_v11 = vpop.permute.xlu1 %3434 }
  0xf9   : > { %5688 = vst [vmem:[#allocation33_spill] sm:$0xff] %v4572_v11  ;;  %v4575_v53 = vpop.permute.xlu0 %3429 }
  0xfa   : > { %5689 = vst [vmem:[#allocation34_spill] sm:$0xff] %v4575_v53  ;;  %3604 = vrot.lane.b32.xlu1 %v3603_v40, %s3842_s5  ;;  %v3608_v40 = vpack.i.bf16 %v3001_v62, %v2985_v20  ;;  %v2946_v20 = vld [vmem:[%s3936_s7 + $0x114] sm:$0xff] }
  0xfb   : > { %1908 = vrot.lane.b32.xlu0 %v3002_v4, %s3837_s10 }
  0xfc   : > { %v4579_v57 = vpop.permute.xlu1 %3444 }
  0xfd   : > { %5690 = vst [vmem:[#allocation35_spill] sm:$0xff] %v4579_v57  ;;  %v4582_v33 = vpop.permute.xlu0 %3439  ;;  %v2869_v57 = vld [vmem:[%s3936_s7 + $0x4a] sm:$0xff] }
  0xfe   : > { %5691 = vst [vmem:[#allocation36_spill] sm:$0xff] %v4582_v33  ;;  %1658 = vrot.lane.b32.xlu1 %v4154_v63, %s3835_s8  ;;  %v2885_v33 = vld [vmem:[%s3936_s7 + $0x10a] sm:$0xff] }
  0xff   : > { %1626 = vrot.lane.b32.xlu0 %v2929_v56, %s3835_s8  ;;  %v3613_v56 = vpack.i.bf16 %v2885_v33, %v2869_v57  ;;  %v2960_v57 = vld [vmem:[%s3936_s7 + $0x68] sm:$0xff] }
 0x100   : > { %v4587_v51 = vpop.permute.xlu1 %3454 }
 0x101   : > { %v4589_v48 = vpop.permute.xlu0 %3449 }
 0x102   : > { %1784 = vrot.lane.b32.xlu1 %v4326_v54, %s3836_s9 }
 0x103   : > { %1752 = vrot.lane.b32.xlu0 %v4232_v47, %s3836_s9 }
 0x104   : > { %v4598_v63 = vpop.permute.xlu1 %3464 }
 0x105   : > { %5692 = vst [vmem:[#allocation37_spill] sm:$0xff] %v4598_v63  ;;  %v4600_v26 = vpop.permute.xlu0 %3459 }
 0x106   : > { %1878 = vrot.lane.b32.xlu1 %v2987_v2, %s3837_s10 }
 0x107   : > { %3609 = vrot.lane.b32.xlu0 %v3608_v40, %s3841_s11 }
 0x108   : > { %v4604_v54 = vpop.permute.xlu1 %3474 }
 0x109   : > { %5693 = vst [vmem:[#allocation38_spill] sm:$0xff] %v4604_v54  ;;  %v4607_v47 = vpop.permute.xlu0 %3469 }
 0x10a   : > { %5694 = vst [vmem:[#allocation39_spill] sm:$0xff] %v4607_v47  ;;  %3614 = vrot.lane.b32.xlu1 %v3613_v56, %s3842_s5  ;;  %v4628_v56 = vld [vmem:[%s3936_s7 + $0x69] sm:$0xff] }
 0x10b   : > { %1910 = vrot.lane.b32.xlu0 %v3003_v45, %s3837_s10  ;;  %v2888_v47 = vld [vmem:[%s3936_s7 + $0x12a] sm:$0xff] }
 0x10c   : > { %v4612_v62 = vpop.permute.xlu1 %3484 }
 0x10d   : > { %5695 = vst [vmem:[#allocation40_spill] sm:$0xff] %v4612_v62  ;;  %v4615_v50 = vpop.permute.xlu0 %3479  ;;  %v3618_v62 = vpack.i.bf16 %v3002_v4, %v2986_v7  ;;  %v2947_v4 = vld [vmem:[%s3936_s7 + $0x124] sm:$0xff] }
 0x10e   : > { %5696 = vst [vmem:[#allocation41_spill] sm:$0xff] %v4615_v50  ;;  %1660 = vrot.lane.b32.xlu1 %v2946_v20, %s3835_s8  ;;  %v2870_v50 = vld [vmem:[%s3936_s7 + $0x52] sm:$0xff] }
 0x10f   : > { %1628 = vrot.lane.b32.xlu0 %v2930_v59, %s3835_s8  ;;  %v2886_v20 = vld [vmem:[%s3936_s7 + $0x112] sm:$0xff] }
 0x110   : > { %v4619_v33 = vpop.permute.xlu1 %3494  ;;  %v3623_v11 = vpack.i.bf16 %v2886_v20, %v2870_v50  ;;  %v2931_v50 = vld [vmem:[%s3936_s7 + $0x64] sm:$0xff] }
 0x111   : > { %v4622_v40 = vpop.permute.xlu0 %3489 }
 0x112   : > { %1786 = vrot.lane.b32.xlu1 %v4329_v55, %s3836_s9  ;;  %v3491_v63 = vunpack.i.l.bf16 %v4622_v40 }
 0x113   : > { %1754 = vrot.lane.b32.xlu0 %v2960_v57, %s3836_s9  ;;  %v4642_v57 = vld [vmem:[%s3936_s7 + $0x129] sm:$0xff] }
 0x114   : > { %v4632_v54 = vpop.permute.xlu1 %3504 }
 0x115   : > { %5697 = vst [vmem:[#allocation42_spill] sm:$0xff] %v4632_v54  ;;  %v4634_v59 = vpop.permute.xlu0 %3499  ;;  %v3451_v54 = vunpack.i.l.bf16 %v4589_v48 }
 0x116   : > { %1880 = vrot.lane.b32.xlu1 %v4628_v56, %s3837_s10 }
 0x117   : > { %3619 = vrot.lane.b32.xlu0 %v3618_v62, %s3841_s11  ;;  %v2977_v62 = vld [vmem:[%s3936_s7 + $0x138] sm:$0xff] }
 0x118   : > { %v4639_v55 = vpop.permute.xlu1 %3514 }
 0x119   : > { %5698 = vst [vmem:[#allocation43_spill] sm:$0xff] %v4639_v55  ;;  %v4644_v7 = vpop.permute.xlu0 %3509 }
 0x11a   : > { %5699 = vst [vmem:[#allocation44_spill] sm:$0xff] %v4644_v7  ;;  %3624 = vrot.lane.b32.xlu1 %v3623_v11, %s3842_s5  ;;  %v2961_v11 = vld [vmem:[%s3936_s7 + $0x78] sm:$0xff]  ;;  %v4702_v7 = vld [vmem:[%s3936_s7 + $0x81] sm:$0xff] }
 0x11b   : > { %1912 = vrot.lane.b32.xlu0 %v4642_v57, %s3837_s10 }
 0x11c   : > { %v4650_v44 = vpop.permute.xlu1 %3524 }
 0x11d   : > { %5700 = vst [vmem:[#allocation45_spill] sm:$0xff] %v4650_v44  ;;  %v4653_v20 = vpop.permute.xlu0 %3519  ;;  %v4666_v44 = vld [vmem:[%s3936_s7 + $0x79] sm:$0xff] }
 0x11e   : > { %5701 = vst [vmem:[#allocation46_spill] sm:$0xff] %v4653_v20  ;;  %1662 = vrot.lane.b32.xlu1 %v2947_v4, %s3835_s8  ;;  %v3628_v20 = vpack.i.bf16 %v3003_v45, %v2987_v2  ;;  %v2887_v4 = vld [vmem:[%s3936_s7 + $0x122] sm:$0xff]  ;;  %v2948_v2 = vld [vmem:[%s3936_s7 + $0x12c] sm:$0xff] }
 0x11f   : > { %1630 = vrot.lane.b32.xlu0 %v2931_v50, %s3835_s8  ;;  %v3633_v29 = vpack.i.bf16 %v2887_v4, %v2871_v36  ;;  %v2932_v36 = vld [vmem:[%s3936_s7 + $0x6c] sm:$0xff]  ;;  %v2978_v4 = vld [vmem:[%s3936_s7 + $0x140] sm:$0xff] }
 0x120   : > { %v4658_v55 = vpop.permute.xlu1 %3534 }
 0x121   : > { %v4661_v34 = vpop.permute.xlu0 %3529 }
 0x122   : > { %1788 = vrot.lane.b32.xlu1 %v2977_v62, %s3836_s9 }
 0x123   : > { %1756 = vrot.lane.b32.xlu0 %v2961_v11, %s3836_s9  ;;  %v4680_v11 = vld [vmem:[%s3936_s7 + $0x139] sm:$0xff] }
 0x124   : > { %v4670_v43 = vpop.permute.xlu1 %3544 }
 0x125   : > { %5702 = vst [vmem:[#allocation47_spill] sm:$0xff] %v4670_v43  ;;  %v4672_v50 = vpop.permute.xlu0 %3539 }
 0x126   : > { %1882 = vrot.lane.b32.xlu1 %v4666_v44, %s3837_s10 }
 0x127   : > { %3629 = vrot.lane.b32.xlu0 %v3628_v20, %s3841_s11 }
 0x128   : > { %v4677_v62 = vpop.permute.xlu1 %3554 }
 0x129   : > { %5703 = vst [vmem:[#allocation48_spill] sm:$0xff] %v4677_v62  ;;  %v4682_v45 = vpop.permute.xlu0 %3549 }
 0x12a   : > { %5704 = vst [vmem:[#allocation49_spill] sm:$0xff] %v4682_v45  ;;  %3634 = vrot.lane.b32.xlu1 %v3633_v29, %s3842_s5  ;;  %v2962_v29 = vld [vmem:[%s3936_s7 + $0x80] sm:$0xff] }
 0x12b   : > { %1914 = vrot.lane.b32.xlu0 %v4680_v11, %s3837_s10 }
 0x12c   : > { %v4688_v35 = vpop.permute.xlu1 %3564 }
 0x12d   : > { %5705 = vst [vmem:[#allocation50_spill] sm:$0xff] %v4688_v35  ;;  %v4691_v20 = vpop.permute.xlu0 %3559  ;;  %v3638_v35 = vpack.i.bf16 %v4642_v57, %v4628_v56  ;;  %v3331_v56 = vunpack.i.l.bf16 %v4491_v49 }
 0x12e   : > { %5706 = vst [vmem:[#allocation51_spill] sm:$0xff] %v4691_v20  ;;  %1664 = vrot.lane.b32.xlu1 %v2948_v2, %s3835_s8  ;;  %v2872_v20 = vld [vmem:[%s3936_s7 + $0x6a] sm:$0xff]  ;;  %v3171_v2 = vunpack.i.l.bf16 %v4174_v14 }
 0x12f   : > { %1632 = vrot.lane.b32.xlu0 %v2932_v36, %s3835_s8  ;;  %v2895_v36 = vld [vmem:[%s3936_s7 + $0x1b] sm:$0xff]  ;;  %v3643_v57 = vpack.i.bf16 %v2888_v47, %v2872_v20  ;;  %v1983_v47 = vsel %vm1966_vm0, %v4276_v17, %v3211_v37 }
 0x130   : > { %v1619_v62 = vpop.permute.xlu1 %1618  ;;  %v1967_v43 = vsel %vm1966_vm0, %v308_v52, %v3171_v2  ;;  %v2911_v20 = vld [vmem:[%s3936_s7 + $0xdb] sm:$0xff]  ;;  %v2016_v2 = vsel %vm1999_vm1, %v1983_v47, %v3291_v25 }
 0x131   : > { %v4697_v45 = vpop.permute.xlu0 %3569  ;;  %v2197_v38 = vsel %vm1966_vm0, %v2895_v36, %v1619_v62  ;;  %v2049_v17 = vsel %vm2032_vm2, %v2016_v2, %v3371_v15  ;;  %v2949_v37 = vld [vmem:[%s3936_s7 + $0x13c] sm:$0xff]  ;;  %v4764_v2 = vld [vmem:[%s3936_s7 + $0x91] sm:$0xff] }
 0x132   : > { %1790 = vrot.lane.b32.xlu1 %v2978_v4, %s3836_s9  ;;  %v3251_v4 = vunpack.i.l.bf16 %v4364_v22  ;;  %v3571_v24 = vunpack.i.l.bf16 %v4697_v45  ;;  %v2082_v25 = vsel %vm2065_vm3, %v2049_v17, %v3451_v54  ;;  %v2889_v17 = vld [vmem:[%s3936_s7 + $0x13a] sm:$0xff] }
 0x133   : > { %1758 = vrot.lane.b32.xlu0 %v2962_v29, %s3836_s9 }
 0x134   : > { %v1745_v53 = vpop.permute.xlu1 %1744  ;;  %v2000_v62 = vsel %vm1999_vm1, %v1967_v43, %v3251_v4  ;;  %v2933_v4 = vld [vmem:[%s3936_s7 + $0x7c] sm:$0xff] }
 0x135   : > { %v1651_v29 = vpop.permute.xlu0 %1650  ;;  %v2229_v3 = vsel %vm1999_vm1, %v2197_v38, %v1745_v53  ;;  %v2033_v38 = vsel %vm2032_vm2, %v2000_v62, %v3331_v56  ;;  %v3572_v53 = vunpack.i.h.bf16 %v4697_v45 }
 0x136   : > { %1884 = vrot.lane.b32.xlu1 %v4702_v7, %s3837_s10  ;;  %v2066_v43 = vsel %vm2065_vm3, %v2033_v38, %v3411_v41  ;;  %v3648_v38 = vpack.i.bf16 %v4680_v11, %v4666_v44  ;;  %v3412_v11 = vunpack.i.h.bf16 %v4557_v30 }
 0x137   : > { %3639 = vrot.lane.b32.xlu0 %v3638_v35, %s3841_s11  ;;  %v3531_v35 = vunpack.i.l.bf16 %v4661_v34  ;;  %v2099_v45 = vsel %vm2098_vm4, %v2066_v43, %v3491_v63  ;;  %v3172_v43 = vunpack.i.h.bf16 %v4174_v14  ;;  %v3372_v14 = vunpack.i.h.bf16 %v4525_v28 }
 0x138   : > { %v1871_v0 = vpop.permute.xlu1 %1870 }
 0x139   : > { %v1777_v36 = vpop.permute.xlu0 %1776  ;;  %v2261_v52 = vsel %vm2032_vm2, %v2229_v3, %v1871_v0  ;;  %v2213_v0 = vsel %vm1966_vm0, %v2911_v20, %v1651_v29  ;;  %v2115_v47 = vsel %vm2098_vm4, %v2082_v25, %v3531_v35  ;;  %v2132_v29 = vsel %vm2131_vm5, %v2099_v45, %v3571_v24  ;;  %v2979_v20 = vld [vmem:[%s3936_s7 + $0x150] sm:$0xff] }
 0x13a   : > { %3644 = vrot.lane.b32.xlu1 %v3643_v57, %s3842_s5  ;;  %3012 = vmatprep.mubr.msk.f32.mxu0 %vm2065_vm3, %v2261_v52  ;;  %v2245_v56 = vsel %vm1999_vm1, %v2213_v0, %v1777_v36  ;;  %v2148_v62 = vsel %vm2131_vm5, %v2115_v47, %v3572_v53  ;;  %v2963_v52 = vld [vmem:[%s3936_s7 + $0x90] sm:$0xff]  ;;  %v2873_v53 = vld [vmem:[%s3936_s7 + $0x7a] sm:$0xff]  ;;  %v309_v0 = vld [vmem:[%s3936_s7 + $0x8] sm:$0xff] }
 0x13b   : > { %1916 = vrot.lane.b32.xlu0 %v4726_v16, %s3837_s10  ;;  %v3653_v44 = vpack.i.bf16 %v2889_v17, %v2873_v53  ;;  %v4788_v47 = vld [vmem:[%s3936_s7 + $0x151] sm:$0xff]  ;;  %v2934_v17 = vld [vmem:[%s3936_s7 + $0x84] sm:$0xff] }
 0x13c   : > { %v3575_v3 = vpop.permute.xlu1 %3574 }
 0x13d   : > { %v3577_v15 = vunpack.i.h.bf16 %v3575_v3  ;;  %v3576_v41 = vunpack.i.l.bf16 %v3575_v3  ;;  %v1903_v57 = vpop.permute.xlu0 %1902  ;;  %v3212_v3 = vunpack.i.h.bf16 %v4260_v1  ;;  %v1968_v1 = vsel %vm1966_vm0, %v309_v0, %v3172_v43 }
 0x13e   : > { %1666 = vrot.lane.b32.xlu1 %v2949_v37, %s3835_s8  ;;  %v2277_v54 = vsel %vm2032_vm2, %v2245_v56, %v1903_v57  ;;  %v2896_v37 = vld [vmem:[%s3936_s7 + $0x23] sm:$0xff]  ;;  %v3292_v56 = vunpack.i.h.bf16 %v4428_v6  ;;  %v3492_v6 = vunpack.i.h.bf16 %v4622_v40 }
 0x13f   : > { %1634 = vrot.lane.b32.xlu0 %v2933_v4, %s3835_s8  ;;  %3028 = vmatprep.mubr.msk.f32.mxu1 %vm2065_vm3, %v2277_v54  ;;  %v2165_v63 = vsel %vm2164_vm6, %v2132_v29, %v3576_v41  ;;  %v2181_v35 = vsel %vm2164_vm6, %v2148_v62, %v3577_v15  ;;  %v3252_v4 = vunpack.i.h.bf16 %v4364_v22  ;;  %v3332_v15 = vunpack.i.h.bf16 %v4491_v49  ;;  %v2912_v29 = vld [vmem:[%s3936_s7 + $0xe3] sm:$0xff] }
 0x140   : > { %v1653_v36 = vpop.permute.xlu1 %1652  ;;  %2485 = vmatmul.mubr.f32.vlgmr.msra.gmra.mxu0 %v2165_v63  ;;  %2565 = vmatmul.mubr.f32.vlgmr.msra.gmra.mxu1 %v2181_v35  ;;  %v3452_v22 = vunpack.i.h.bf16 %v4589_v48  ;;  %v1984_v28 = vsel %vm1966_vm0, %v4279_v18, %v3212_v3  ;;  %v3532_v54 = vunpack.i.h.bf16 %v4661_v34  ;;  %v2950_v34 = vld [vmem:[%s3936_s7 + $0x144] sm:$0xff] }
 0x141   : > { %v1621_v24 = vpop.permute.xlu0 %1620  ;;  %v2001_v30 = vsel %vm1999_vm1, %v1968_v1, %v3252_v4  ;;  %v2017_v40 = vsel %vm1999_vm1, %v1984_v28, %v3292_v56  ;;  %v3176_v28 = vunpack.i.l.bf16 %v4194_v27 }
 0x142   : > { %1792 = vrot.lane.b32.xlu1 %v2979_v20, %s3836_s9  ;;  %v2198_v41 = vsel %vm1966_vm0, %v2896_v37, %v1621_v24  ;;  %v2034_v63 = vsel %vm2032_vm2, %v2001_v30, %v3332_v15  ;;  %v2050_v18 = vsel %vm2032_vm2, %v2017_v40, %v3372_v14  ;;  %v2980_v14 = vld [vmem:[%s3936_s7 + $0x158] sm:$0xff]  ;;  %v3296_v40 = vunpack.i.l.bf16 %v4426_v21 }
 0x143   : > { %1760 = vrot.lane.b32.xlu0 %v2963_v52, %s3836_s9  ;;  %v2067_v52 = vsel %vm2065_vm3, %v2034_v63, %v3412_v11  ;;  %v2083_v24 = vsel %vm2065_vm3, %v2050_v18, %v3452_v22  ;;  %v4824_v22 = vld [vmem:[%s3936_s7 + $0x99] sm:$0xff]  ;;  %v3336_v63 = vunpack.i.l.bf16 %v4487_v32 }
 0x144   : > { %v1779_v25 = vpop.permute.xlu1 %1778  ;;  %v2100_v43 = vsel %vm2098_vm4, %v2067_v52, %v3492_v6  ;;  %v3658_v6 = vpack.i.bf16 %v4726_v16, %v4702_v7  ;;  %v2897_v30 = vld [vmem:[%s3936_s7 + $0x33] sm:$0xff]  ;;  %v3376_v7 = vunpack.i.l.bf16 %v4521_v12 }
 0x145   : > { %v1747_v45 = vpop.permute.xlu0 %1746  ;;  %v3728_v18 = vld [vmem:[%s3936_s7 + $0x18] sm:$0xff] }
 0x146   : > { %1886 = vrot.lane.b32.xlu1 %v4764_v2, %s3837_s10  ;;  %v2230_v49 = vsel %vm1999_vm1, %v2198_v41, %v1747_v45  ;;  %v2116_v45 = vsel %vm2098_vm4, %v2083_v24, %v3532_v54  ;;  %v2964_v41 = vld [vmem:[%s3936_s7 + $0x98] sm:$0xff]  ;;  %v1969_v52 = vsel %vm1966_vm0, %v3728_v18, %v3176_v28  ;;  %v3496_v24 = vunpack.i.l.bf16 %v4619_v33 }
 0x147   : > { %3649 = vrot.lane.b32.xlu0 %v3648_v38, %s3841_s11  ;;  %v2214_v38 = vsel %vm1966_vm0, %v2912_v29, %v1653_v36  ;;  %v3216_v29 = vunpack.i.l.bf16 %v4256_v60 }
 0x148   : > { %v1873_v57 = vpop.permute.xlu1 %1872  ;;  %v2246_v37 = vsel %vm1999_vm1, %v2214_v38, %v1779_v25 }
 0x149   : > { %v2262_v62 = vsel %vm2032_vm2, %v2230_v49, %v1873_v57  ;;  %v3580_v48 = vpop.permute.xlu0 %3579  ;;  %v2874_v49 = vld [vmem:[%s3936_s7 + $0x82] sm:$0xff] }
 0x14a   : > { %v3582_v35 = vunpack.i.h.bf16 %v3580_v48  ;;  %v3581_v20 = vunpack.i.l.bf16 %v3580_v48  ;;  %3654 = vrot.lane.b32.xlu1 %v3653_v44, %s3842_s5  ;;  %3013 = vmatprep.mubr.msk.f32.mxu0 %vm2065_vm3, %v2262_v62  ;;  %v2890_v57 = vld [vmem:[%s3936_s7 + $0x142] sm:$0xff]  ;;  %v3256_v62 = vunpack.i.l.bf16 %v4355_v10 }
 0x14b   : > { %1918 = vrot.lane.b32.xlu0 %v4788_v47, %s3837_s10  ;;  %v3663_v16 = vpack.i.bf16 %v2890_v57, %v2874_v49  ;;  %v2935_v49 = vld [vmem:[%s3936_s7 + $0x94] sm:$0xff] }
 0x14c   : > { %v3585_v53 = vpop.permute.xlu1 %3584  ;;  %v2133_v36 = vsel %vm2131_vm5, %v2100_v43, %v3581_v20  ;;  %v2149_v15 = vsel %vm2131_vm5, %v2116_v45, %v3582_v35  ;;  %v3416_v35 = vunpack.i.l.bf16 %v4555_v31  ;;  %v1985_v43 = vsel %vm1966_vm0, %v4310_v42, %v3216_v29 }
 0x14d   : > { %v3587_v0 = vunpack.i.h.bf16 %v3585_v53  ;;  %v3586_v3 = vunpack.i.l.bf16 %v3585_v53  ;;  %v1905_v4 = vpop.permute.xlu0 %1904 }
 0x14e   : > { %v2278_v56 = vsel %vm2032_vm2, %v2246_v37, %v1905_v4  ;;  %1668 = vrot.lane.b32.xlu1 %v2950_v34, %s3835_s8  ;;  %v3456_v34 = vunpack.i.l.bf16 %v4587_v51  ;;  %v2002_v37 = vsel %vm1999_vm1, %v1969_v52, %v3256_v62  ;;  %v4884_v52 = vld [vmem:[%s3936_s7 + $0xa9] sm:$0xff] }
 0x14f   : > { %1636 = vrot.lane.b32.xlu0 %v2934_v17, %s3835_s8  ;;  %3029 = vmatprep.mubr.msk.f32.mxu1 %vm2065_vm3, %v2278_v56  ;;  %v2166_v25 = vsel %vm2164_vm6, %v2133_v36, %v3586_v3  ;;  %v2182_v44 = vsel %vm2164_vm6, %v2149_v15, %v3587_v0  ;;  %v4848_v17 = vld [vmem:[%s3936_s7 + $0x159] sm:$0xff]  ;;  %v3536_v0 = vunpack.i.l.bf16 %v4658_v55  ;;  %v2018_v56 = vsel %vm1999_vm1, %v1985_v43, %v3296_v40 }
 0x150   : > { %v1655_v11 = vpop.permute.xlu1 %1654  ;;  %2490 = vmatmul.mubr.f32.gmra.mxu0 %v2166_v25  ;;  %2570 = vmatmul.mubr.f32.gmra.mxu1 %v2182_v44  ;;  %v2913_v3 = vld [vmem:[%s3936_s7 + $0xf3] sm:$0xff]  ;;  %v2035_v36 = vsel %vm2032_vm2, %v2002_v37, %v3336_v63  ;;  %v2051_v42 = vsel %vm2032_vm2, %v2018_v56, %v3376_v7  ;;  %v2981_v7 = vld [vmem:[%s3936_s7 + $0x168] sm:$0xff]  ;;  %v2898_v43 = vld [vmem:[%s3936_s7 + $0x3b] sm:$0xff]  ;;  %v3337_v56 = vunpack.i.h.bf16 %v4487_v32  ;;  %v3497_v32 = vunpack.i.h.bf16 %v4619_v33 }
 0x151   : > { %v1623_v1 = vpop.permute.xlu0 %1622  ;;  %v2068_v44 = vsel %vm2065_vm3, %v2035_v36, %v3416_v35 }
 0x152   : > { %1794 = vrot.lane.b32.xlu1 %v2980_v14, %s3836_s9  ;;  %v2199_v20 = vsel %vm1966_vm0, %v2897_v30, %v1623_v1  ;;  %v2951_v14 = vld [vmem:[%s3936_s7 + $0x154] sm:$0xff]  ;;  %v2215_v1 = vsel %vm1966_vm0, %v2913_v3, %v1655_v11  ;;  %v2101_v57 = vsel %vm2098_vm4, %v2068_v44, %v3496_v24  ;;  %v3257_v3 = vunpack.i.h.bf16 %v4355_v10  ;;  %v3729_v10 = vld [vmem:[%s3936_s7 + $0x20] sm:$0xff] }
 0x153   : > { %1762 = vrot.lane.b32.xlu0 %v2964_v41, %s3836_s9  ;;  %v2084_v41 = vsel %vm2065_vm3, %v2051_v42, %v3456_v34  ;;  %v3668_v34 = vpack.i.bf16 %v4788_v47, %v4764_v2  ;;  %v2875_v24 = vld [vmem:[%s3936_s7 + $0x92] sm:$0xff]  ;;  %v3417_v47 = vunpack.i.h.bf16 %v4555_v31  ;;  %v4908_v42 = vld [vmem:[%s3936_s7 + $0x169] sm:$0xff]  ;;  %v3730_v44 = vld [vmem:[%s3936_s7 + $0xe0] sm:$0xff] }
 0x154   : > { %v1781_v54 = vpop.permute.xlu1 %1780 }
 0x155   : > { %v1749_v48 = vpop.permute.xlu0 %1748  ;;  %v2247_v28 = vsel %vm1999_vm1, %v2215_v1, %v1781_v54 }
 0x156   : > { %1888 = vrot.lane.b32.xlu1 %v4824_v22, %s3837_s10  ;;  %v2231_v38 = vsel %vm1999_vm1, %v2199_v20, %v1749_v48  ;;  %v2117_v48 = vsel %vm2098_vm4, %v2084_v41, %v3536_v0  ;;  %v2965_v20 = vld [vmem:[%s3936_s7 + $0xa8] sm:$0xff]  ;;  %v3217_v0 = vunpack.i.h.bf16 %v4256_v60  ;;  %v2914_v41 = vld [vmem:[%s3936_s7 + $0xfb] sm:$0xff] }
 0x157   : > { %3659 = vrot.lane.b32.xlu0 %v3658_v6, %s3841_s11 }
 0x158   : > { %v1875_v53 = vpop.permute.xlu1 %1874 }
 0x159   : > { %v2263_v4 = vsel %vm2032_vm2, %v2231_v38, %v1875_v53  ;;  %v3590_v45 = vpop.permute.xlu0 %3589  ;;  %v2891_v38 = vld [vmem:[%s3936_s7 + $0x152] sm:$0xff]  ;;  %v3177_v53 = vunpack.i.h.bf16 %v4194_v27  ;;  %v3377_v27 = vunpack.i.h.bf16 %v4521_v12  ;;  %v1986_v12 = vsel %vm1966_vm0, %v3730_v44, %v3217_v0 }
 0x15a   : > { %v3592_v15 = vunpack.i.h.bf16 %v3590_v45  ;;  %v3591_v25 = vunpack.i.l.bf16 %v3590_v45  ;;  %3664 = vrot.lane.b32.xlu1 %v3663_v16, %s3842_s5  ;;  %3014 = vmatprep.mubr.msk.f32.mxu0 %vm2065_vm3, %v2263_v4  ;;  %v3297_v45 = vunpack.i.h.bf16 %v4426_v21  ;;  %v3673_v2 = vpack.i.bf16 %v2891_v38, %v2875_v24  ;;  %v3731_v44 = vld [vmem:[%s3936_s7 + $0x30] sm:$0xff] }
 0x15b   : > { %1920 = vrot.lane.b32.xlu0 %v4848_v17, %s3837_s10  ;;  %v1970_v36 = vsel %vm1966_vm0, %v3729_v10, %v3177_v53  ;;  %v3457_v21 = vunpack.i.h.bf16 %v4587_v51  ;;  %v2982_v53 = vld [vmem:[%s3936_s7 + $0x170] sm:$0xff]  ;;  %v3261_v10 = vunpack.i.l.bf16 %v4381_v5 }
 0x15c   : > { %v3595_v6 = vpop.permute.xlu1 %3594  ;;  %v2134_v11 = vsel %vm2131_vm5, %v2101_v57, %v3591_v25  ;;  %v2150_v63 = vsel %vm2131_vm5, %v2117_v48, %v3592_v15  ;;  %v2003_v31 = vsel %vm1999_vm1, %v1970_v36, %v3257_v3  ;;  %v2019_v33 = vsel %vm1999_vm1, %v1986_v12, %v3297_v45  ;;  %v4944_v3 = vld [vmem:[%s3936_s7 + $0xb1] sm:$0xff]  ;;  %v2876_v45 = vld [vmem:[%s3936_s7 + $0x9a] sm:$0xff] }
 0x15d   : > { %v3597_v30 = vunpack.i.h.bf16 %v3595_v6  ;;  %v3596_v29 = vunpack.i.l.bf16 %v3595_v6  ;;  %v1907_v62 = vpop.permute.xlu0 %1906  ;;  %v2036_v6 = vsel %vm2032_vm2, %v2003_v31, %v3337_v56  ;;  %v2892_v56 = vld [vmem:[%s3936_s7 + $0x15a] sm:$0xff]  ;;  %v3461_v31 = vunpack.i.l.bf16 %v4600_v26 }
 0x15e   : > { %v2279_v40 = vsel %vm2032_vm2, %v2247_v28, %v1907_v62  ;;  %1670 = vrot.lane.b32.xlu1 %v2951_v14, %s3835_s8  ;;  %v3537_v14 = vunpack.i.h.bf16 %v4658_v55  ;;  %v2052_v28 = vsel %vm2032_vm2, %v2019_v33, %v3377_v27  ;;  %v2952_v55 = vld [vmem:[%s3936_s7 + $0x15c] sm:$0xff]  ;;  %v2899_v27 = vld [vmem:[%s3936_s7 + $0x4b] sm:$0xff] }
 0x15f   : > { %1638 = vrot.lane.b32.xlu0 %v2935_v49, %s3835_s8  ;;  %3030 = vmatprep.mubr.msk.f32.mxu1 %vm2065_vm3, %v2279_v40  ;;  %v2167_v54 = vsel %vm2164_vm6, %v2134_v11, %v3596_v29  ;;  %v2183_v16 = vsel %vm2164_vm6, %v2150_v63, %v3597_v30  ;;  %v2069_v30 = vsel %vm2065_vm3, %v2036_v6, %v3417_v47  ;;  %v2936_v40 = vld [vmem:[%s3936_s7 + $0x9c] sm:$0xff]  ;;  %v3732_v33 = vld [vmem:[%s3936_s7 + $0xf0] sm:$0xff] }
 0x160   : > { %v1657_v35 = vpop.permute.xlu1 %1656  ;;  %2495 = vmatmul.mubr.f32.gmra.mxu0 %v2167_v54  ;;  %2575 = vmatmul.mubr.f32.gmra.mxu1 %v2183_v16  ;;  %v2085_v29 = vsel %vm2065_vm3, %v2052_v28, %v3457_v21  ;;  %v2102_v11 = vsel %vm2098_vm4, %v2069_v30, %v3497_v32  ;;  %v3301_v21 = vunpack.i.l.bf16 %v4443_v58  ;;  %v3341_v32 = vunpack.i.l.bf16 %v4501_v8  ;;  %v2915_v28 = vld [vmem:[%s3936_s7 + $0x10b] sm:$0xff] }
 0x161   : > { %v1625_v18 = vpop.permute.xlu0 %1624  ;;  %v2216_v62 = vsel %vm1966_vm0, %v2914_v41, %v1657_v35 }
 0x162   : > { %1796 = vrot.lane.b32.xlu1 %v2981_v7, %s3836_s9  ;;  %v2200_v60 = vsel %vm1966_vm0, %v2898_v43, %v1625_v18 }
 0x163   : > { %1764 = vrot.lane.b32.xlu0 %v2965_v20, %s3836_s9  ;;  %v2118_v20 = vsel %vm2098_vm4, %v2085_v29, %v3537_v14  ;;  %v3501_v14 = vunpack.i.l.bf16 %v4634_v59 }
 0x164   : > { %v1783_v37 = vpop.permute.xlu1 %1782 }
 0x165   : > { %v1751_v4 = vpop.permute.xlu0 %1750  ;;  %v2248_v63 = vsel %vm1999_vm1, %v2216_v62, %v1783_v37  ;;  %v2966_v37 = vld [vmem:[%s3936_s7 + $0xb0] sm:$0xff] }
 0x166   : > { %1890 = vrot.lane.b32.xlu1 %v4884_v52, %s3837_s10  ;;  %v2232_v15 = vsel %vm1999_vm1, %v2200_v60, %v1751_v4  ;;  %v3678_v4 = vpack.i.bf16 %v4848_v17, %v4824_v22  ;;  %v3221_v60 = vunpack.i.l.bf16 %v4281_v19  ;;  %v3683_v22 = vpack.i.bf16 %v2892_v56, %v2876_v45 }
 0x167   : > { %3669 = vrot.lane.b32.xlu0 %v3668_v34, %s3841_s11  ;;  %v3381_v17 = vunpack.i.l.bf16 %v4536_v39 }
 0x168   : > { %v1877_v25 = vpop.permute.xlu1 %1876  ;;  %v1987_v6 = vsel %vm1966_vm0, %v3732_v33, %v3221_v60  ;;  %v3733_v60 = vld [vmem:[%s4360_s12] sm:$0xff] }
 0x169   : > { %v2264_v1 = vsel %vm2032_vm2, %v2232_v15, %v1877_v25  ;;  %v3600_v51 = vpop.permute.xlu0 %3599  ;;  %v3421_v15 = vunpack.i.l.bf16 %v4568_v46  ;;  %v2020_v29 = vsel %vm1999_vm1, %v1987_v6, %v3301_v21  ;;  %v2877_v21 = vld [vmem:[%s3936_s7 + $0xaa] sm:$0xff]  ;;  %v5028_v6 = vld [vmem:[%s4360_s12 + $0x1] sm:$0xff] }
 0x16a   : > { %v3602_v49 = vunpack.i.h.bf16 %v3600_v51  ;;  %v3601_v57 = vunpack.i.l.bf16 %v3600_v51  ;;  %3674 = vrot.lane.b32.xlu1 %v3673_v2, %s3842_s5  ;;  %3015 = vmatprep.mubr.msk.f32.mxu0 %vm2065_vm3, %v2264_v1  ;;  %v3181_v2 = vunpack.i.l.bf16 %v4170_v9  ;;  %v4968_v51 = vld [vmem:[%s3936_s7 + $0x171] sm:$0xff] }
 0x16b   : > { %1922 = vrot.lane.b32.xlu0 %v4908_v42, %s3837_s10 }
 0x16c   : > { %v3605_v48 = vpop.permute.xlu1 %3604  ;;  %v2135_v35 = vsel %vm2131_vm5, %v2102_v11, %v3601_v57  ;;  %v2151_v34 = vsel %vm2131_vm5, %v2118_v20, %v3602_v49  ;;  %v1971_v12 = vsel %vm1966_vm0, %v3731_v44, %v3181_v2  ;;  %v3541_v57 = vunpack.i.l.bf16 %v4672_v50 }
 0x16d   : > { %v3607_v54 = vunpack.i.h.bf16 %v3605_v48  ;;  %v3606_v16 = vunpack.i.l.bf16 %v3605_v48  ;;  %v1909_v7 = vpop.permute.xlu0 %1908  ;;  %v2004_v49 = vsel %vm1999_vm1, %v1971_v12, %v3261_v10  ;;  %v2053_v11 = vsel %vm2032_vm2, %v2020_v29, %v3381_v17  ;;  %v5004_v10 = vld [vmem:[%s3936_s7 + $0xc1] sm:$0xff]  ;;  %v2900_v17 = vld [vmem:[%s3936_s7 + $0x53] sm:$0xff] }
 0x16e   : > { %v2280_v18 = vsel %vm2032_vm2, %v2248_v63, %v1909_v7  ;;  %1672 = vrot.lane.b32.xlu1 %v2952_v55, %s3835_s8  ;;  %v2037_v62 = vsel %vm2032_vm2, %v2004_v49, %v3341_v32  ;;  %v2893_v32 = vld [vmem:[%s3936_s7 + $0x16a] sm:$0xff]  ;;  %v3262_v44 = vunpack.i.h.bf16 %v4381_v5  ;;  %v3734_v5 = vld [vmem:[%s3936_s7 + $0x38] sm:$0xff] }
 0x16f   : > { %1640 = vrot.lane.b32.xlu0 %v2936_v40, %s3835_s8  ;;  %3031 = vmatprep.mubr.msk.f32.mxu1 %vm2065_vm3, %v2280_v18  ;;  %v2168_v24 = vsel %vm2164_vm6, %v2135_v35, %v3606_v16  ;;  %v2184_v38 = vsel %vm2164_vm6, %v2151_v34, %v3607_v54  ;;  %v2070_v63 = vsel %vm2065_vm3, %v2037_v62, %v3421_v15  ;;  %v2953_v54 = vld [vmem:[%s3936_s7 + $0x16c] sm:$0xff]  ;;  %v3735_v49 = vld [vmem:[%s3936_s7 + $0xf8] sm:$0xff] }
 0x170   : > { %v1659_v43 = vpop.permute.xlu1 %1658  ;;  %2500 = vmatmul.mubr.f32.gmra.mxu0 %v2168_v24  ;;  %2580 = vmatmul.mubr.f32.gmra.mxu1 %v2184_v38  ;;  %v2086_v16 = vsel %vm2065_vm3, %v2053_v11, %v3461_v31  ;;  %v2937_v18 = vld [vmem:[%s3936_s7 + $0xac] sm:$0xff]  ;;  %v2103_v35 = vsel %vm2098_vm4, %v2070_v63, %v3501_v14  ;;  %v3302_v31 = vunpack.i.h.bf16 %v4443_v58  ;;  %v3342_v14 = vunpack.i.h.bf16 %v4501_v8 }
 0x171   : > { %v1627_v0 = vpop.permute.xlu0 %1626  ;;  %v2217_v7 = vsel %vm1966_vm0, %v2915_v28, %v1659_v43  ;;  %v3462_v58 = vunpack.i.h.bf16 %v4600_v26  ;;  %v3502_v8 = vunpack.i.h.bf16 %v4634_v59  ;;  %v2916_v28 = vld [vmem:[%s3936_s7 + $0x113] sm:$0xff] }
 0x172   : > { %1798 = vrot.lane.b32.xlu1 %v2982_v53, %s3836_s9  ;;  %v2201_v25 = vsel %vm1966_vm0, %v2899_v27, %v1627_v0  ;;  %v2967_v27 = vld [vmem:[%s3936_s7 + $0xc0] sm:$0xff] }
 0x173   : > { %1766 = vrot.lane.b32.xlu0 %v2966_v37, %s3836_s9  ;;  %v2119_v37 = vsel %vm2098_vm4, %v2086_v16, %v3541_v57  ;;  %v3542_v57 = vunpack.i.h.bf16 %v4672_v50  ;;  %v2954_v50 = vld [vmem:[%s3936_s7 + $0x174] sm:$0xff] }
 0x174   : > { %v1785_v47 = vpop.permute.xlu1 %1784  ;;  %v2938_v16 = vld [vmem:[%s3936_s7 + $0xb4] sm:$0xff] }
 0x175   : > { %v1753_v36 = vpop.permute.xlu0 %1752  ;;  %v2249_v34 = vsel %vm1999_vm1, %v2217_v7, %v1785_v47 }
 0x176   : > { %1892 = vrot.lane.b32.xlu1 %v4944_v3, %s3837_s10  ;;  %v2233_v41 = vsel %vm1999_vm1, %v2201_v25, %v1753_v36  ;;  %v3688_v36 = vpack.i.bf16 %v4908_v42, %v4884_v52  ;;  %v3222_v25 = vunpack.i.h.bf16 %v4281_v19  ;;  %v3693_v52 = vpack.i.bf16 %v2893_v32, %v2877_v21  ;;  %v2901_v32 = vld [vmem:[%s3936_s7 + $0x63] sm:$0xff] }
 0x177   : > { %3679 = vrot.lane.b32.xlu0 %v3678_v4, %s3841_s11  ;;  %v3422_v42 = vunpack.i.h.bf16 %v4568_v46  ;;  %v3186_v21 = vunpack.i.l.bf16 %v4188_v23 }
 0x178   : > { %v1879_v1 = vpop.permute.xlu1 %1878  ;;  %v1988_v46 = vsel %vm1966_vm0, %v3735_v49, %v3222_v25 }
 0x179   : > { %v2265_v30 = vsel %vm2032_vm2, %v2233_v41, %v1879_v1  ;;  %v3610_v55 = vpop.permute.xlu0 %3609  ;;  %v2021_v59 = vsel %vm1999_vm1, %v1988_v46, %v3302_v31  ;;  %v5708_v31 = vld [vmem:[#allocation22_spill] sm:$0xff] }
 0x17a   : > { %v3612_v48 = vunpack.i.h.bf16 %v3610_v55  ;;  %v3611_v40 = vunpack.i.l.bf16 %v3610_v55  ;;  %3684 = vrot.lane.b32.xlu1 %v3683_v22, %s3842_s5  ;;  %3016 = vmatprep.mubr.msk.f32.mxu0 %vm2065_vm3, %v2265_v30  ;;  %v3182_v22 = vunpack.i.h.bf16 %v4170_v9  ;;  %v3382_v9 = vunpack.i.h.bf16 %v4536_v39 }
 0x17b   : > { %1924 = vrot.lane.b32.xlu0 %v4968_v51, %s3837_s10 }
 0x17c   : > { %v3615_v20 = vpop.permute.xlu1 %3614  ;;  %v2136_v43 = vsel %vm2131_vm5, %v2103_v35, %v3611_v40  ;;  %v2152_v4 = vsel %vm2131_vm5, %v2119_v37, %v3612_v48  ;;  %v1972_v41 = vsel %vm1966_vm0, %v3734_v5, %v3182_v22  ;;  %v2054_v48 = vsel %vm2032_vm2, %v2021_v59, %v3382_v9  ;;  %v5710_v9 = vld [vmem:[#allocation32_spill] sm:$0xff]  ;;  %v3737_v5 = vld [vmem:[%s3936_s7 + $0x48] sm:$0xff] }
 0x17d   : > { %v3617_v24 = vunpack.i.h.bf16 %v3615_v20  ;;  %v3616_v38 = vunpack.i.l.bf16 %v3615_v20  ;;  %v1911_v53 = vpop.permute.xlu0 %1910  ;;  %v2005_v39 = vsel %vm1999_vm1, %v1972_v41, %v3262_v44  ;;  %v2087_v11 = vsel %vm2065_vm3, %v2054_v48, %v3462_v58  ;;  %v5707_v44 = vld [vmem:[#allocation17_spill] sm:$0xff] }
 0x17e   : > { %v2281_v0 = vsel %vm2032_vm2, %v2249_v34, %v1911_v53  ;;  %1674 = vrot.lane.b32.xlu1 %v2953_v54, %s3835_s8  ;;  %v2038_v55 = vsel %vm2032_vm2, %v2005_v39, %v3342_v14  ;;  %v3346_v14 = vunpack.i.l.bf16 %v5708_v31  ;;  %v1973_v41 = vsel %vm1966_vm0, %v3737_v5, %v3186_v21  ;;  %v5711_v58 = vld [vmem:[#allocation37_spill] sm:$0xff]  ;;  %v5088_v39 = vld [vmem:[%s4360_s12 + $0x9] sm:$0xff] }
 0x17f   : > { %1642 = vrot.lane.b32.xlu0 %v2937_v18, %s3835_s8  ;;  %3032 = vmatprep.mubr.msk.f32.mxu1 %vm2065_vm3, %v2281_v0  ;;  %v2169_v45 = vsel %vm2164_vm6, %v2136_v43, %v3616_v38  ;;  %v2185_v56 = vsel %vm2164_vm6, %v2152_v4, %v3617_v24  ;;  %v2071_v40 = vsel %vm2065_vm3, %v2038_v55, %v3422_v42  ;;  %v3426_v42 = vunpack.i.l.bf16 %v5710_v9  ;;  %v2917_v55 = vld [vmem:[%s3936_s7 + $0x123] sm:$0xff] }
 0x180   : > { %v1661_v2 = vpop.permute.xlu1 %1660  ;;  %2505 = vmatmul.mubr.f32.gmra.mxu0 %v2169_v45  ;;  %2585 = vmatmul.mubr.f32.gmra.mxu1 %v2185_v56  ;;  %v2104_v7 = vsel %vm2098_vm4, %v2071_v40, %v3502_v8  ;;  %v2120_v24 = vsel %vm2098_vm4, %v2087_v11, %v3542_v57  ;;  %v2968_v45 = vld [vmem:[%s3936_s7 + $0xc8] sm:$0xff]  ;;  %v3466_v8 = vunpack.i.l.bf16 %v5711_v58 }
 0x181   : > { %v1629_v47 = vpop.permute.xlu0 %1628  ;;  %v2218_v63 = vsel %vm1966_vm0, %v2916_v28, %v1661_v2  ;;  %v3736_v2 = vld [vmem:[%s4360_s12 + $0x8] sm:$0xff] }
 0x182   : > { %1800 = vrot.lane.b32.xlu1 %v3733_v60, %s3836_s9  ;;  %v2202_v19 = vsel %vm1966_vm0, %v2900_v17, %v1629_v47  ;;  %v3698_v47 = vpack.i.bf16 %v4968_v51, %v4944_v3  ;;  %v2878_v60 = vld [vmem:[%s3936_s7 + $0xb2] sm:$0xff]  ;;  %v3226_v17 = vunpack.i.l.bf16 %v4271_v13  ;;  %v3738_v57 = vld [vmem:[%s3936_s7 + $0x108] sm:$0xff] }
 0x183   : > { %1768 = vrot.lane.b32.xlu0 %v2967_v27, %s3836_s9  ;;  %v5064_v27 = vld [vmem:[%s3936_s7 + $0xc9] sm:$0xff] }
 0x184   : > { %v1787_v15 = vpop.permute.xlu1 %1786  ;;  %v5709_v51 = vld [vmem:[#allocation27_spill] sm:$0xff]  ;;  %v1989_v28 = vsel %vm1966_vm0, %v3738_v57, %v3226_v17  ;;  %v2879_v17 = vld [vmem:[%s3936_s7 + $0xc2] sm:$0xff] }
 0x185   : > { %v1755_v12 = vpop.permute.xlu0 %1754  ;;  %v2250_v20 = vsel %vm1999_vm1, %v2218_v63, %v1787_v15  ;;  %v3266_v15 = vunpack.i.l.bf16 %v4377_v61  ;;  %v3387_v5 = vunpack.i.h.bf16 %v5709_v51 }
 0x186   : > { %1894 = vrot.lane.b32.xlu1 %v5004_v10, %s3837_s10  ;;  %v2234_v1 = vsel %vm1999_vm1, %v2202_v19, %v1755_v12  ;;  %v3306_v12 = vunpack.i.l.bf16 %v5707_v44 }
 0x187   : > { %3689 = vrot.lane.b32.xlu0 %v3688_v36, %s3841_s11  ;;  %v2894_v36 = vld [vmem:[%s3936_s7 + $0x172] sm:$0xff] }
 0x188   : > { %v1881_v33 = vpop.permute.xlu1 %1880  ;;  %v3703_v3 = vpack.i.bf16 %v2894_v36, %v2878_v60  ;;  %v2022_v48 = vsel %vm1999_vm1, %v1989_v28, %v3306_v12  ;;  %v2969_v36 = vld [vmem:[%s3936_s7 + $0xd8] sm:$0xff]  ;;  %v2902_v12 = vld [vmem:[%s3936_s7 + $0x6b] sm:$0xff] }
 0x189   : > { %v2266_v30 = vsel %vm2032_vm2, %v2234_v1, %v1881_v33  ;;  %v3620_v26 = vpop.permute.xlu0 %3619  ;;  %v5712_v1 = vld [vmem:[#allocation42_spill] sm:$0xff] }
 0x18a   : > { %v3622_v29 = vunpack.i.h.bf16 %v3620_v26  ;;  %v3621_v62 = vunpack.i.l.bf16 %v3620_v26  ;;  %3694 = vrot.lane.b32.xlu1 %v3693_v52, %s3842_s5  ;;  %3017 = vmatprep.mubr.msk.f32.mxu0 %vm2065_vm3, %v2266_v30  ;;  %v3386_v52 = vunpack.i.l.bf16 %v5709_v51  ;;  %v3506_v33 = vunpack.i.l.bf16 %v5712_v1  ;;  %v5713_v26 = vld [vmem:[#allocation47_spill] sm:$0xff] }
 0x18b   : > { %1926 = vrot.lane.b32.xlu0 %v5028_v6, %s3837_s10  ;;  %v2006_v30 = vsel %vm1999_vm1, %v1973_v41, %v3266_v15  ;;  %v3546_v59 = vunpack.i.l.bf16 %v5713_v26  ;;  %v563_v15 = vld [vmem:[%s4360_s12 + $0x2] sm:$0xff]  ;;  %v3547_v57 = vunpack.i.h.bf16 %v5713_v26  ;;  %v2918_v28 = vld [vmem:[%s3936_s7 + $0x12b] sm:$0xff] }
 0x18c   : > { %v3625_v54 = vpop.permute.xlu1 %3624  ;;  %v2137_v53 = vsel %vm2131_vm5, %v2104_v7, %v3621_v62  ;;  %v2153_v37 = vsel %vm2131_vm5, %v2120_v24, %v3622_v29  ;;  %v2039_v40 = vsel %vm2032_vm2, %v2006_v30, %v3346_v14  ;;  %v2055_v63 = vsel %vm2032_vm2, %v2022_v48, %v3386_v52  ;;  %v628_v26 = vld [vmem:[%s4360_s12 + $0xc] sm:$0xff] }
 0x18d   : > { %v3627_v18 = vunpack.i.h.bf16 %v3625_v54  ;;  %v3626_v35 = vunpack.i.l.bf16 %v3625_v54  ;;  %v1913_v34 = vpop.permute.xlu0 %1912  ;;  %v2072_v54 = vsel %vm2065_vm3, %v2039_v40, %v3426_v42  ;;  %v2088_v7 = vsel %vm2065_vm3, %v2055_v63, %v3466_v8  ;;  %v2940_v63 = vld [vmem:[%s3936_s7 + $0xcc] sm:$0xff] }
 0x18e   : > { %v2282_v38 = vsel %vm2032_vm2, %v2250_v20, %v1913_v34  ;;  %1676 = vrot.lane.b32.xlu1 %v2954_v50, %s3835_s8  ;;  %v2105_v34 = vsel %vm2098_vm4, %v2072_v54, %v3506_v33  ;;  %v3267_v52 = vunpack.i.h.bf16 %v4377_v61  ;;  %v3467_v8 = vunpack.i.h.bf16 %v5711_v58 }
 0x18f   : > { %1644 = vrot.lane.b32.xlu0 %v2938_v16, %s3835_s8  ;;  %3033 = vmatprep.mubr.msk.f32.mxu1 %vm2065_vm3, %v2282_v38  ;;  %v2170_v0 = vsel %vm2164_vm6, %v2137_v53, %v3626_v35  ;;  %v2186_v43 = vsel %vm2164_vm6, %v2153_v37, %v3627_v18  ;;  %v627_v16 = vld [vmem:[%s4360_s12 + $0x4] sm:$0xff] }
 0x190   : > { %v1663_v4 = vpop.permute.xlu1 %1662  ;;  %2510 = vmatmul.mubr.f32.gmra.mxu0 %v2170_v0  ;;  %2590 = vmatmul.mubr.f32.gmra.mxu1 %v2186_v43  ;;  %v2939_v35 = vld [vmem:[%s3936_s7 + $0xc4] sm:$0xff]  ;;  %v2121_v0 = vsel %vm2098_vm4, %v2088_v7, %v3546_v59 }
 0x191   : > { %v1631_v56 = vpop.permute.xlu0 %1630  ;;  %v2219_v20 = vsel %vm1966_vm0, %v2917_v55, %v1663_v4 }
 0x192   : > { %1802 = vrot.lane.b32.xlu1 %v3736_v2, %s3836_s9  ;;  %v2203_v19 = vsel %vm1966_vm0, %v2901_v32, %v1631_v56  ;;  %v3708_v32 = vpack.i.bf16 %v5028_v6, %v5004_v10  ;;  %v3347_v10 = vunpack.i.h.bf16 %v5708_v31  ;;  %v3713_v6 = vpack.i.bf16 %v563_v15, %v2879_v17  ;;  %v5715_v17 = vld [vmem:[#allocation10_spill] sm:$0xff] }
 0x193   : > { %1770 = vrot.lane.b32.xlu0 %v2968_v45, %s3836_s9  ;;  %v3231_v15 = vunpack.i.l.bf16 %v5715_v17 }
 0x194   : > { %v1789_v22 = vpop.permute.xlu1 %1788 }
 0x195   : > { %v1757_v25 = vpop.permute.xlu0 %1756  ;;  %v2251_v24 = vsel %vm1999_vm1, %v2219_v20, %v1789_v22  ;;  %v2997_v22 = vld [vmem:[%s3936_s7 + $0xd9] sm:$0xff] }
 0x196   : > { %1896 = vrot.lane.b32.xlu1 %v5064_v27, %s3837_s10  ;;  %v2235_v49 = vsel %vm1999_vm1, %v2203_v19, %v1757_v25  ;;  %v3187_v25 = vunpack.i.h.bf16 %v4188_v23  ;;  %v3307_v19 = vunpack.i.h.bf16 %v5707_v44  ;;  %v3427_v23 = vunpack.i.h.bf16 %v5710_v9 }
 0x197   : > { %3699 = vrot.lane.b32.xlu0 %v3698_v47, %s3841_s11  ;;  %v658_v47 = vld [vmem:[%s4360_s12 + $0x18] sm:$0xff]  ;;  %v3507_v44 = vunpack.i.h.bf16 %v5712_v1 }
 0x198   : > { %v1883_v46 = vpop.permute.xlu1 %1882 }
 0x199   : > { %v2267_v29 = vsel %vm2032_vm2, %v2235_v49, %v1883_v46  ;;  %v3630_v62 = vpop.permute.xlu0 %3629  ;;  %v688_v49 = vld [vmem:[%s4360_s12 + $0x19] sm:$0xff]  ;;  %v3740_v46 = vld [vmem:[%s3936_s7 + $0x110] sm:$0xff] }
 0x19a   : > { %v3632_v50 = vunpack.i.h.bf16 %v3630_v62  ;;  %v3631_v11 = vunpack.i.l.bf16 %v3630_v62  ;;  %3704 = vrot.lane.b32.xlu1 %v3703_v3, %s3842_s5  ;;  %3018 = vmatprep.mubr.msk.f32.mxu0 %vm2065_vm3, %v2267_v29  ;;  %v3227_v3 = vunpack.i.h.bf16 %v4271_v13  ;;  %v3739_v13 = vld [vmem:[%s3936_s7 + $0x50] sm:$0xff] }
 0x19b   : > { %1928 = vrot.lane.b32.xlu0 %v5088_v39, %s3837_s10  ;;  %v1974_v61 = vsel %vm1966_vm0, %v3739_v13, %v3187_v25  ;;  %v5716_v25 = vld [vmem:[#allocation14_spill] sm:$0xff] }
 0x19c   : > { %v3635_v18 = vpop.permute.xlu1 %3634  ;;  %v2138_v4 = vsel %vm2131_vm5, %v2105_v34, %v3631_v11  ;;  %v2154_v45 = vsel %vm2131_vm5, %v2121_v0, %v3632_v50  ;;  %v1990_v51 = vsel %vm1966_vm0, %v3740_v46, %v3227_v3  ;;  %v2007_v9 = vsel %vm1999_vm1, %v1974_v61, %v3267_v52  ;;  %v659_v0 = vld [vmem:[%s4360_s12 + $0x20] sm:$0xff]  ;;  %v5717_v3 = vld [vmem:[#allocation19_spill] sm:$0xff] }
 0x19d   : > { %v3637_v38 = vunpack.i.h.bf16 %v3635_v18  ;;  %v3636_v53 = vunpack.i.l.bf16 %v3635_v18  ;;  %v1915_v37 = vpop.permute.xlu0 %1914  ;;  %v2023_v58 = vsel %vm1999_vm1, %v1990_v51, %v3307_v19  ;;  %v2040_v1 = vsel %vm2032_vm2, %v2007_v9, %v3347_v10  ;;  %v5719_v19 = vld [vmem:[#allocation29_spill] sm:$0xff]  ;;  %v5721_v61 = vld [vmem:[#allocation39_spill] sm:$0xff] }
 0x19e   : > { %v2283_v43 = vsel %vm2032_vm2, %v2251_v24, %v1915_v37  ;;  %1678 = vrot.lane.b32.xlu1 %v627_v16, %s3835_s8  ;;  %v2056_v62 = vsel %vm2032_vm2, %v2023_v58, %v3387_v5  ;;  %v2073_v48 = vsel %vm2065_vm3, %v2040_v1, %v3427_v23  ;;  %v3311_v52 = vunpack.i.l.bf16 %v5717_v3  ;;  %v689_v46 = vld [vmem:[%s4360_s12 + $0x21] sm:$0xff] }
 0x19f   : > { %1646 = vrot.lane.b32.xlu0 %v2939_v35, %s3835_s8  ;;  %3034 = vmatprep.mubr.msk.f32.mxu1 %vm2065_vm3, %v2283_v43  ;;  %v2171_v56 = vsel %vm2164_vm6, %v2138_v4, %v3636_v53  ;;  %v2187_v2 = vsel %vm2164_vm6, %v2154_v45, %v3637_v38  ;;  %v2089_v40 = vsel %vm2065_vm3, %v2056_v62, %v3467_v8  ;;  %v2970_v4 = vld [vmem:[%s3936_s7 + $0xe0] sm:$0xff]  ;;  %v3391_v10 = vunpack.i.l.bf16 %v5719_v19 }
 0x1a0   : > { %v1665_v60 = vpop.permute.xlu1 %1664  ;;  %2515 = vmatmul.mubr.f32.gmra.mxu0 %v2171_v56  ;;  %2595 = vmatmul.mubr.f32.gmra.mxu1 %v2187_v2  ;;  %v2106_v54 = vsel %vm2098_vm4, %v2073_v48, %v3507_v44  ;;  %v2122_v35 = vsel %vm2098_vm4, %v2089_v40, %v3547_v57  ;;  %v3718_v56 = vpack.i.bf16 %v5088_v39, %v5064_v27  ;;  %v2998_v2 = vld [vmem:[%s3936_s7 + $0xe1] sm:$0xff]  ;;  %v5718_v27 = vld [vmem:[#allocation24_spill] sm:$0xff]  ;;  %v3471_v8 = vunpack.i.l.bf16 %v5721_v61 }
 0x1a1   : > { %v1633_v21 = vpop.permute.xlu0 %1632  ;;  %v2220_v50 = vsel %vm1966_vm0, %v2918_v28, %v1665_v60  ;;  %v564_v60 = vld [vmem:[%s4360_s12 + $0xa] sm:$0xff]  ;;  %v3351_v39 = vunpack.i.l.bf16 %v5718_v27  ;;  %v5722_v44 = vld [vmem:[#allocation44_spill] sm:$0xff]  ;;  %v3742_v51 = vld [vmem:[%s3936_s7 + $0x120] sm:$0xff] }
 0x1a2   : > { %1804 = vrot.lane.b32.xlu1 %v658_v47, %s3836_s9  ;;  %v2204_v41 = vsel %vm1966_vm0, %v2902_v12, %v1633_v21  ;;  %v2880_v47 = vld [vmem:[%s3936_s7 + $0xca] sm:$0xff]  ;;  %v3271_v12 = vunpack.i.l.bf16 %v5716_v25  ;;  %v1991_v9 = vsel %vm1966_vm0, %v3742_v51, %v3231_v15  ;;  %v5723_v28 = vld [vmem:[#allocation49_spill] sm:$0xff] }
 0x1a3   : > { %1772 = vrot.lane.b32.xlu0 %v2969_v36, %s3836_s9  ;;  %v5714_v36 = vld [vmem:[#allocation6_spill] sm:$0xff] }
 0x1a4   : > { %v1791_v14 = vpop.permute.xlu1 %1790  ;;  %v3191_v21 = vunpack.i.l.bf16 %v5714_v36 }
 0x1a5   : > { %v1759_v42 = vpop.permute.xlu0 %1758  ;;  %v2252_v16 = vsel %vm1999_vm1, %v2220_v50, %v1791_v14 }
 0x1a6   : > { %1898 = vrot.lane.b32.xlu1 %v2997_v22, %s3837_s10  ;;  %v2236_v31 = vsel %vm1999_vm1, %v2204_v41, %v1759_v42  ;;  %v3723_v42 = vpack.i.bf16 %v564_v60, %v2880_v47  ;;  %v3741_v41 = vld [vmem:[%s3936_s7 + $0x60] sm:$0xff]  ;;  %v3272_v47 = vunpack.i.h.bf16 %v5716_v25 }
 0x1a7   : > { %3709 = vrot.lane.b32.xlu0 %v3708_v32, %s3841_s11  ;;  %v2903_v32 = vld [vmem:[%s3936_s7 + $0x7b] sm:$0xff]  ;;  %v1975_v13 = vsel %vm1966_vm0, %v3741_v41, %v3191_v21  ;;  %v3312_v21 = vunpack.i.h.bf16 %v5717_v3 }
 0x1a8   : > { %v1885_v33 = vpop.permute.xlu1 %1884  ;;  %v2008_v57 = vsel %vm1999_vm1, %v1975_v13, %v3271_v12 }
 0x1a9   : > { %v2268_v30 = vsel %vm2032_vm2, %v2236_v31, %v1885_v33  ;;  %v3640_v59 = vpop.permute.xlu0 %3639  ;;  %v3511_v31 = vunpack.i.l.bf16 %v5722_v44 }
 0x1aa   : > { %v3642_v55 = vunpack.i.h.bf16 %v3640_v59  ;;  %v3641_v29 = vunpack.i.l.bf16 %v3640_v59  ;;  %3714 = vrot.lane.b32.xlu1 %v3713_v6, %s3842_s5  ;;  %3019 = vmatprep.mubr.msk.f32.mxu0 %vm2065_vm3, %v2268_v30  ;;  %v5720_v6 = vld [vmem:[#allocation34_spill] sm:$0xff]  ;;  %v3551_v30 = vunpack.i.l.bf16 %v5723_v28  ;;  %v2919_v59 = vld [vmem:[%s3936_s7 + $0x13b] sm:$0xff] }
 0x1ab   : > { %1930 = vrot.lane.b32.xlu0 %v688_v49, %s3837_s10  ;;  %v3431_v5 = vunpack.i.l.bf16 %v5720_v6  ;;  %v3432_v15 = vunpack.i.h.bf16 %v5720_v6 }
 0x1ac   : > { %v3645_v11 = vpop.permute.xlu1 %3644  ;;  %v2139_v24 = vsel %vm2131_vm5, %v2106_v54, %v3641_v29  ;;  %v2155_v38 = vsel %vm2131_vm5, %v2122_v35, %v3642_v55  ;;  %v2024_v55 = vsel %vm1999_vm1, %v1991_v9, %v3311_v52  ;;  %v2041_v29 = vsel %vm2032_vm2, %v2008_v57, %v3351_v39 }
 0x1ad   : > { %v3647_v7 = vunpack.i.h.bf16 %v3645_v11  ;;  %v3646_v20 = vunpack.i.l.bf16 %v3645_v11  ;;  %v1917_v18 = vpop.permute.xlu0 %1916  ;;  %v2074_v40 = vsel %vm2065_vm3, %v2041_v29, %v3431_v5  ;;  %v3472_v52 = vunpack.i.h.bf16 %v5721_v61 }
 0x1ae   : > { %v2284_v34 = vsel %vm2032_vm2, %v2252_v16, %v1917_v18  ;;  %1680 = vrot.lane.b32.xlu1 %v628_v26, %s3835_s8  ;;  %v2057_v26 = vsel %vm2032_vm2, %v2024_v55, %v3391_v10  ;;  %v2107_v54 = vsel %vm2098_vm4, %v2074_v40, %v3511_v31  ;;  %v2920_v10 = vld [vmem:[%s3936_s7 + $0x143] sm:$0xff] }
 0x1af   : > { %1648 = vrot.lane.b32.xlu0 %v2940_v63, %s3835_s8  ;;  %3035 = vmatprep.mubr.msk.f32.mxu1 %vm2065_vm3, %v2284_v34  ;;  %v2172_v53 = vsel %vm2164_vm6, %v2139_v24, %v3646_v20  ;;  %v2188_v37 = vsel %vm2164_vm6, %v2155_v38, %v3647_v7  ;;  %v2090_v50 = vsel %vm2065_vm3, %v2057_v26, %v3471_v8  ;;  %v5724_v26 = vld [vmem:[#allocation5_spill] sm:$0xff]  ;;  %s268_s8 = sand.u32 1, %s3817_s16  }
 0x1b0   : > { %v1667_v43 = vpop.permute.xlu1 %1666  ;;  %2520 = vmatmul.mubr.f32.gmra.mxu0 %v2172_v53  ;;  %2600 = vmatmul.mubr.f32.gmra.mxu1 %v2188_v37  ;;  %v2123_v35 = vsel %vm2098_vm4, %v2090_v50, %v3551_v30  ;;  %v3196_v40 = vunpack.i.l.bf16 %v5724_v26  ;;  %v2905_v50 = vld [vmem:[%s3936_s7 + $0x93] sm:$0xff] }
 0x1b1   : > { %v1635_v45 = vpop.permute.xlu0 %1634  ;;  %v2221_v11 = vsel %vm1966_vm0, %v2919_v59, %v1667_v43 }
 0x1b2   : > { %1806 = vrot.lane.b32.xlu1 %v659_v0, %s3836_s9  ;;  %v2205_v23 = vsel %vm1966_vm0, %v2903_v32, %v1635_v45  ;;  %v2904_v45 = vld [vmem:[%s3936_s7 + $0x83] sm:$0xff]  ;;  %v3352_v32 = vunpack.i.h.bf16 %v5718_v27 }
 0x1b3   : > { %1774 = vrot.lane.b32.xlu0 %v2970_v4, %s3836_s9  ;;  %v3192_v4 = vunpack.i.h.bf16 %v5714_v36  ;;  %v3743_v36 = vld [vmem:[%s3936_s7 + $0x68] sm:$0xff]  ;;  %s2802_s9 = sshll.u32 %s268_s8, 8 }
 0x1b4   : > { %v1793_v22 = vpop.permute.xlu1 %1792  ;;  %s5377_s22 = scalar_lea.vmem [#allocation2], %s2802_s9 }
 0x1b5   : > { %v1761_v14 = vpop.permute.xlu0 %1760  ;;  %v2253_v16 = vsel %vm1999_vm1, %v2221_v11, %v1793_v22  ;;  %v3392_v22 = vunpack.i.h.bf16 %v5719_v19  ;;  %v3552_v19 = vunpack.i.h.bf16 %v5723_v28 }
 0x1b6   : > { %1900 = vrot.lane.b32.xlu1 %v2998_v2, %s3837_s10  ;;  %v2237_v33 = vsel %vm1999_vm1, %v2205_v23, %v1761_v14  ;;  %v3232_v2 = vunpack.i.h.bf16 %v5715_v17  ;;  %v1976_v14 = vsel %vm1966_vm0, %v3743_v36, %v3192_v4  ;;  %v3512_v17 = vunpack.i.h.bf16 %v5722_v44  ;;  %v3745_v4 = vld [vmem:[%s3936_s7 + $0x78] sm:$0xff] }
 0x1b7   : > { %3719 = vrot.lane.b32.xlu0 %v3718_v56, %s3841_s11  ;;  %v2009_v27 = vsel %vm1999_vm1, %v1976_v14, %v3272_v47  ;;  %v5732_v47 = vld [vmem:[#allocation43_spill] sm:$0xff]  ;;  %v5733_v36 = vld [vmem:[#allocation48_spill] sm:$0xff] }
 0x1b8   : > { %v1887_v49 = vpop.permute.xlu1 %1886  ;;  %v2042_v41 = vsel %vm2032_vm2, %v2009_v27, %v3352_v32  ;;  %v3556_v14 = vunpack.i.l.bf16 %v5733_v36 }
 0x1b9   : > { %v2269_v58 = vsel %vm2032_vm2, %v2237_v33, %v1887_v49  ;;  %v3650_v1 = vpop.permute.xlu0 %3649  ;;  %v2075_v44 = vsel %vm2065_vm3, %v2042_v41, %v3432_v15 }
 0x1ba   : > { %v3652_v62 = vunpack.i.h.bf16 %v3650_v1  ;;  %v3651_v48 = vunpack.i.l.bf16 %v3650_v1  ;;  %3724 = vrot.lane.b32.xlu1 %v3723_v42, %s3842_s5  ;;  %3020 = vmatprep.mubr.msk.f32.mxu0 %vm2065_vm3, %v2269_v58  ;;  %v3744_v42 = vld [vmem:[%s3936_s7 + $0x128] sm:$0xff]  ;;  %s3843_s5 = smov [#allocation2]  }
 0x1bb   : > { %1932 = vrot.lane.b32.xlu0 %v689_v46, %s3837_s10  ;;  %v1992_v3 = vsel %vm1966_vm0, %v3744_v42, %v3232_v2  ;;  %v2108_v46 = vsel %vm2098_vm4, %v2075_v44, %v3512_v17  ;;  %s3761_s6 = sshll.u32 %s3843_s5, 4  ;;  %s3762_s6 = int_to_ptr.vmem [resolvable:$false] %s3761_s6 }
 0x1bc   : > { %v3655_v63 = vpop.permute.xlu1 %3654  ;;  %v2140_v24 = vsel %vm2131_vm5, %v2107_v54, %v3651_v48  ;;  %v2156_v38 = vsel %vm2131_vm5, %v2123_v35, %v3652_v62  ;;  %v2025_v23 = vsel %vm1999_vm1, %v1992_v3, %v3312_v21  ;;  %s3763_s13 = scalar_lea.vmem %s3762_s6, 8192 }
 0x1bd   : > { %v3657_v7 = vunpack.i.h.bf16 %v3655_v63  ;;  %v3656_v20 = vunpack.i.l.bf16 %v3655_v63  ;;  %v1919_v18 = vpop.permute.xlu0 %1918  ;;  %v2058_v8 = vsel %vm2032_vm2, %v2025_v23, %v3392_v22  ;;  %v5725_v63 = vld [vmem:[#allocation9_spill] sm:$0xff]  ;;  %v3746_v22 = vld [vmem:[%s3936_s7 + $0x138] sm:$0xff] }
 0x1be   : > { %v2285_v34 = vsel %vm2032_vm2, %v2253_v16, %v1919_v18  ;;  %v2091_v31 = vsel %vm2065_vm3, %v2058_v8, %v3472_v52  ;;  %v3236_v54 = vunpack.i.l.bf16 %v5725_v63  ;;  %v5726_v16 = vld [vmem:[#allocation13_spill] sm:$0xff]  ;;  %v5727_v18 = vld [vmem:[#allocation18_spill] sm:$0xff]  ;;  %v2921_v52 = vld [vmem:[%s3936_s7 + $0x153] sm:$0xff] }
 0x1bf   : > { %3036 = vmatprep.mubr.msk.f32.mxu1 %vm2065_vm3, %v2285_v34  ;;  %v2173_v53 = vsel %vm2164_vm6, %v2140_v24, %v3656_v20  ;;  %v2189_v37 = vsel %vm2164_vm6, %v2156_v38, %v3657_v7  ;;  %v2124_v30 = vsel %vm2098_vm4, %v2091_v31, %v3552_v19  ;;  %v3276_v7 = vunpack.i.l.bf16 %v5726_v16  ;;  %v5728_v34 = vld [vmem:[#allocation23_spill] sm:$0xff]  ;;  %v5729_v38 = vld [vmem:[#allocation28_spill] sm:$0xff] }
 0x1c0   : > { %v1669_v0 = vpop.permute.xlu1 %1668  ;;  %2525 = vmatmul.mubr.f32.gmra.mxu0 %v2173_v53  ;;  %2605 = vmatmul.mubr.f32.gmra.mxu1 %v2189_v37  ;;  %v3316_v35 = vunpack.i.l.bf16 %v5727_v18  ;;  %v3356_v24 = vunpack.i.l.bf16 %v5728_v34  ;;  %v3396_v53 = vunpack.i.l.bf16 %v5729_v38  ;;  %v5730_v37 = vld [vmem:[#allocation33_spill] sm:$0xff]  ;;  %v1993_v15 = vsel %vm1966_vm0, %v3746_v22, %v3236_v54 }
 0x1c1   : > { %v1637_v43 = vpop.permute.xlu0 %1636  ;;  %v2222_v33 = vsel %vm1966_vm0, %v2920_v10, %v1669_v0  ;;  %v3436_v0 = vunpack.i.l.bf16 %v5730_v37 }
 0x1c2   : > { %v2206_v12 = vsel %vm1966_vm0, %v2904_v45, %v1637_v43  ;;  %v1977_v45 = vsel %vm1966_vm0, %v3745_v4, %v3196_v40  ;;  %v3397_v40 = vunpack.i.h.bf16 %v5729_v38  ;;  %v2922_v38 = vld [vmem:[%s3936_s7 + $0x15b] sm:$0xff] }
 0x1c4   : > { %v1795_v56 = vpop.permute.xlu1 %1794 }
 0x1c5   : > { %v1763_v60 = vpop.permute.xlu0 %1762  ;;  %v2254_v51 = vsel %vm1999_vm1, %v2222_v33, %v1795_v56  ;;  %v5731_v56 = vld [vmem:[#allocation38_spill] sm:$0xff] }
 0x1c6   : > { %v2238_v25 = vsel %vm1999_vm1, %v2206_v12, %v1763_v60  ;;  %v3476_v2 = vunpack.i.l.bf16 %v5731_v56  ;;  %v3516_v60 = vunpack.i.l.bf16 %v5732_v47  ;;  %v2010_v12 = vsel %vm1999_vm1, %v1977_v45, %v3276_v7 }
 0x1c7   : > { %v2043_v42 = vsel %vm2032_vm2, %v2010_v12, %v3356_v24  ;;  %v3477_v7 = vunpack.i.h.bf16 %v5731_v56  ;;  %v3557_v24 = vunpack.i.h.bf16 %v5733_v36 }
 0x1c8   : > { %v1889_v39 = vpop.permute.xlu1 %1888  ;;  %v2076_v10 = vsel %vm2065_vm3, %v2043_v42, %v3436_v0 }
 0x1c9   : > { %v2270_v6 = vsel %vm2032_vm2, %v2238_v25, %v1889_v39  ;;  %v3660_v5 = vpop.permute.xlu0 %3659  ;;  %v2026_v39 = vsel %vm1999_vm1, %v1993_v15, %v3316_v35  ;;  %v2109_v41 = vsel %vm2098_vm4, %v2076_v10, %v3516_v60  ;;  %v3748_v35 = vld [vmem:[%s3936_s7 + $0x140] sm:$0xff] }
 0x1ca   : > { %v3662_v13 = vunpack.i.h.bf16 %v3660_v5  ;;  %v3661_v61 = vunpack.i.l.bf16 %v3660_v5  ;;  %3021 = vmatprep.mubr.msk.f32.mxu0 %vm2065_vm3, %v2270_v6  ;;  %v2059_v19 = vsel %vm2032_vm2, %v2026_v39, %v3396_v53 }
 0x1cb   : > { %v2092_v6 = vsel %vm2065_vm3, %v2059_v19, %v3476_v2  ;;  %v5734_v19 = vld [vmem:[#allocation8_spill] sm:$0xff] }
 0x1cc   : > { %v3665_v49 = vpop.permute.xlu1 %3664  ;;  %v2141_v58 = vsel %vm2131_vm5, %v2108_v46, %v3661_v61  ;;  %v2157_v1 = vsel %vm2131_vm5, %v2124_v30, %v3662_v13  ;;  %v2125_v31 = vsel %vm2098_vm4, %v2092_v6, %v3556_v14  ;;  %v3197_v30 = vunpack.i.h.bf16 %v5724_v26  ;;  %v3747_v26 = vld [vmem:[%s3936_s7 + $0x80] sm:$0xff]  ;;  %v2907_v6 = vld [vmem:[%s3936_s7 + $0xab] sm:$0xff] }
 0x1cd   : > { %v3667_v9 = vunpack.i.h.bf16 %v3665_v49  ;;  %v3666_v57 = vunpack.i.l.bf16 %v3665_v49  ;;  %v1921_v28 = vpop.permute.xlu0 %1920  ;;  %v3201_v10 = vunpack.i.l.bf16 %v5734_v19 }
 0x1ce   : > { %v2286_v59 = vsel %vm2032_vm2, %v2254_v51, %v1921_v28  ;;  %v1978_v54 = vsel %vm1966_vm0, %v3747_v26, %v3197_v30  ;;  %v3749_v30 = vld [vmem:[%s3936_s7 + $0x90] sm:$0xff] }
 0x1cf   : > { %3037 = vmatprep.mubr.msk.f32.mxu1 %vm2065_vm3, %v2286_v59  ;;  %v2174_v55 = vsel %vm2164_vm6, %v2141_v58, %v3666_v57  ;;  %v2190_v29 = vsel %vm2164_vm6, %v2157_v1, %v3667_v9  ;;  %v2906_v59 = vld [vmem:[%s3936_s7 + $0x9b] sm:$0xff]  ;;  %v3237_v1 = vunpack.i.h.bf16 %v5725_v63  ;;  %v3517_v63 = vunpack.i.h.bf16 %v5732_v47  ;;  %v5743_v26 = vld [vmem:[#allocation51_spill] sm:$0xff] }
 0x1d0   : > { %v1671_v62 = vpop.permute.xlu1 %1670  ;;  %2530 = vmatmul.mubr.f32.gmra.mxu0 %v2174_v55  ;;  %2610 = vmatmul.mubr.f32.gmra.mxu1 %v2190_v29  ;;  %v3277_v55 = vunpack.i.h.bf16 %v5726_v16 }
 0x1d1   : > { %v1639_v48 = vpop.permute.xlu0 %1638  ;;  %v2223_v5 = vsel %vm1966_vm0, %v2921_v52, %v1671_v62  ;;  %v3317_v62 = vunpack.i.h.bf16 %v5727_v18  ;;  %v1994_v18 = vsel %vm1966_vm0, %v3748_v35, %v3237_v1 }
 0x1d2   : > { %v2207_v43 = vsel %vm1966_vm0, %v2905_v50, %v1639_v48  ;;  %v3357_v48 = vunpack.i.h.bf16 %v5728_v34  ;;  %v3437_v50 = vunpack.i.h.bf16 %v5730_v37  ;;  %v2011_v34 = vsel %vm1999_vm1, %v1978_v54, %v3277_v55  ;;  %v5742_v55 = vld [vmem:[#allocation46_spill] sm:$0xff] }
 0x1d3   : > { %v2027_v0 = vsel %vm1999_vm1, %v1994_v18, %v3317_v62  ;;  %v3561_v54 = vunpack.i.l.bf16 %v5743_v26 }
 0x1d4   : > { %v1797_v11 = vpop.permute.xlu1 %1796  ;;  %v2060_v56 = vsel %vm2032_vm2, %v2027_v0, %v3397_v40  ;;  %v3750_v40 = vld [vmem:[%s3936_s7 + $0x150] sm:$0xff] }
 0x1d5   : > { %v1765_v20 = vpop.permute.xlu0 %1764  ;;  %v2255_v13 = vsel %vm1999_vm1, %v2223_v5, %v1797_v11  ;;  %v2093_v47 = vsel %vm2065_vm3, %v2060_v56, %v3477_v7  ;;  %v2923_v7 = vld [vmem:[%s3936_s7 + $0x16b] sm:$0xff] }
 0x1d6   : > { %v2239_v21 = vsel %vm1999_vm1, %v2207_v43, %v1765_v20  ;;  %v2044_v43 = vsel %vm2032_vm2, %v2011_v34, %v3357_v48  ;;  %v2126_v14 = vsel %vm2098_vm4, %v2093_v47, %v3557_v24 }
 0x1d7   : > { %v2077_v2 = vsel %vm2065_vm3, %v2044_v43, %v3437_v50 }
 0x1d8   : > { %v1891_v32 = vpop.permute.xlu1 %1890 }
 0x1d9   : > { %v2271_v17 = vsel %vm2032_vm2, %v2239_v21, %v1891_v32  ;;  %v3670_v25 = vpop.permute.xlu0 %3669  ;;  %v2110_v32 = vsel %vm2098_vm4, %v2077_v2, %v3517_v63 }
 0x1da   : > { %v3672_v3 = vunpack.i.h.bf16 %v3670_v25  ;;  %v3671_v27 = vunpack.i.l.bf16 %v3670_v25  ;;  %3022 = vmatprep.mubr.msk.f32.mxu0 %vm2065_vm3, %v2271_v17 }
 0x1dc   : > { %v3675_v23 = vpop.permute.xlu1 %3674  ;;  %v2142_v49 = vsel %vm2131_vm5, %v2109_v41, %v3671_v27  ;;  %v2158_v46 = vsel %vm2131_vm5, %v2125_v31, %v3672_v3 }
 0x1dd   : > { %v3677_v61 = vunpack.i.h.bf16 %v3675_v23  ;;  %v3676_v8 = vunpack.i.l.bf16 %v3675_v23  ;;  %v1923_v44 = vpop.permute.xlu0 %1922  ;;  %v5735_v23 = vld [vmem:[#allocation12_spill] sm:$0xff] }
 0x1de   : > { %v2287_v33 = vsel %vm2032_vm2, %v2255_v13, %v1923_v44  ;;  %v3241_v41 = vunpack.i.l.bf16 %v5735_v23  ;;  %v5736_v13 = vld [vmem:[#allocation16_spill] sm:$0xff]  ;;  %v5737_v44 = vld [vmem:[#allocation21_spill] sm:$0xff] }
 0x1df   : > { %3038 = vmatprep.mubr.msk.f32.mxu1 %vm2065_vm3, %v2287_v33  ;;  %v2175_v51 = vsel %vm2164_vm6, %v2142_v49, %v3676_v8  ;;  %v2191_v9 = vsel %vm2164_vm6, %v2158_v46, %v3677_v61  ;;  %v3281_v61 = vunpack.i.l.bf16 %v5736_v13  ;;  %v3321_v31 = vunpack.i.l.bf16 %v5737_v44  ;;  %v5738_v33 = vld [vmem:[#allocation26_spill] sm:$0xff]  ;;  %v5739_v46 = vld [vmem:[#allocation31_spill] sm:$0xff] }
 0x1e0   : > { %v1673_v57 = vpop.permute.xlu1 %1672  ;;  %2535 = vmatmul.mubr.f32.gmra.mxu0 %v2175_v51  ;;  %2615 = vmatmul.mubr.f32.gmra.mxu1 %v2191_v9  ;;  %v3361_v49 = vunpack.i.l.bf16 %v5738_v33  ;;  %v3401_v51 = vunpack.i.l.bf16 %v5739_v46  ;;  %v5740_v9 = vld [vmem:[#allocation36_spill] sm:$0xff]  ;;  %v1995_v50 = vsel %vm1966_vm0, %v3750_v40, %v3241_v41  ;;  %v3282_v41 = vunpack.i.h.bf16 %v5736_v13 }
 0x1e1   : > { %v1641_v28 = vpop.permute.xlu0 %1640  ;;  %v2224_v60 = vsel %vm1966_vm0, %v2922_v38, %v1673_v57  ;;  %v3441_v57 = vunpack.i.l.bf16 %v5740_v9 }
 0x1e2   : > { %v2208_v11 = vsel %vm1966_vm0, %v2906_v59, %v1641_v28  ;;  %v1979_v59 = vsel %vm1966_vm0, %v3749_v30, %v3201_v10  ;;  %v2908_v10 = vld [vmem:[%s3936_s7 + $0xb3] sm:$0xff] }
 0x1e4   : > { %v1799_v58 = vpop.permute.xlu1 %1798 }
 0x1e5   : > { %v1767_v29 = vpop.permute.xlu0 %1766  ;;  %v2256_v22 = vsel %vm1999_vm1, %v2224_v60, %v1799_v58  ;;  %v5741_v58 = vld [vmem:[#allocation41_spill] sm:$0xff] }
 0x1e6   : > { %v2240_v16 = vsel %vm1999_vm1, %v2208_v11, %v1767_v29  ;;  %v3481_v1 = vunpack.i.l.bf16 %v5741_v58  ;;  %v3521_v29 = vunpack.i.l.bf16 %v5742_v55  ;;  %v2012_v11 = vsel %vm1999_vm1, %v1979_v59, %v3281_v61 }
 0x1e7   : > { %v2045_v35 = vsel %vm2032_vm2, %v2012_v11, %v3361_v49  ;;  %v3402_v49 = vunpack.i.h.bf16 %v5739_v46  ;;  %v3482_v30 = vunpack.i.h.bf16 %v5741_v58  ;;  %v3562_v46 = vunpack.i.h.bf16 %v5743_v26 }
 0x1e8   : > { %v1893_v20 = vpop.permute.xlu1 %1892  ;;  %v2078_v38 = vsel %vm2065_vm3, %v2045_v35, %v3441_v57  ;;  %v3751_v57 = vld [vmem:[%s3936_s7 + $0x98] sm:$0xff] }
 0x1e9   : > { %v2272_v53 = vsel %vm2032_vm2, %v2240_v16, %v1893_v20  ;;  %v3680_v37 = vpop.permute.xlu0 %3679  ;;  %v2028_v20 = vsel %vm1999_vm1, %v1995_v50, %v3321_v31  ;;  %v2111_v43 = vsel %vm2098_vm4, %v2078_v38, %v3521_v29  ;;  %v3362_v31 = vunpack.i.h.bf16 %v5738_v33 }
 0x1ea   : > { %v3682_v4 = vunpack.i.h.bf16 %v3680_v37  ;;  %v3681_v45 = vunpack.i.l.bf16 %v3680_v37  ;;  %3023 = vmatprep.mubr.msk.f32.mxu0 %vm2065_vm3, %v2272_v53  ;;  %v2061_v24 = vsel %vm2032_vm2, %v2028_v20, %v3401_v51  ;;  %v3442_v51 = vunpack.i.h.bf16 %v5740_v9  ;;  %v2924_v9 = vld [vmem:[%s3936_s7 + $0x173] sm:$0xff] }
 0x1eb   : > { %v2094_v53 = vsel %vm2065_vm3, %v2061_v24, %v3481_v1  ;;  %v3752_v1 = vld [vmem:[%s3936_s7 + $0x158] sm:$0xff] }
 0x1ec   : > { %v3685_v21 = vpop.permute.xlu1 %3684  ;;  %v2143_v17 = vsel %vm2131_vm5, %v2110_v32, %v3681_v45  ;;  %v2159_v25 = vsel %vm2131_vm5, %v2126_v14, %v3682_v4  ;;  %v2127_v47 = vsel %vm2098_vm4, %v2094_v53, %v3561_v54 }
 0x1ed   : > { %v3687_v15 = vunpack.i.h.bf16 %v3685_v21  ;;  %v3686_v12 = vunpack.i.l.bf16 %v3685_v21  ;;  %v1925_v36 = vpop.permute.xlu0 %1924  ;;  %v5368_v21 = vld [vmem:[%s5608_s3] ss:$0 sm:$0xff] }
 0x1ee   : > { %v2288_v52 = vsel %vm2032_vm2, %v2256_v22, %v1925_v36 }
 0x1ef   : > { %3039 = vmatprep.mubr.msk.f32.mxu1 %vm2065_vm3, %v2288_v52  ;;  %v2176_v39 = vsel %vm2164_vm6, %v2143_v17, %v3686_v12  ;;  %v2192_v42 = vsel %vm2164_vm6, %v2159_v25, %v3687_v15 }
 0x1f0   : > { %v1675_v3 = vpop.permute.xlu1 %1674  ;;  %2540 = vmatmul.mubr.f32.gmra.mxu0 %v2176_v39  ;;  %2620 = vmatmul.mubr.f32.gmra.mxu1 %v2192_v42 }
 0x1f1   : > { %v1643_v27 = vpop.permute.xlu0 %1642  ;;  %v2225_v37 = vsel %vm1966_vm0, %v2923_v7, %v1675_v3 }
 0x1f2   : > { %v2209_v28 = vsel %vm1966_vm0, %v2907_v6, %v1643_v27  ;;  %v3202_v27 = vunpack.i.h.bf16 %v5734_v19 }
 0x1f4   : > { %v1801_v5 = vpop.permute.xlu1 %1800 }
 0x1f5   : > { %v1769_v8 = vpop.permute.xlu0 %1768  ;;  %v2257_v4 = vsel %vm1999_vm1, %v2225_v37, %v1801_v5  ;;  %v3242_v5 = vunpack.i.h.bf16 %v5735_v23  ;;  %v3522_v23 = vunpack.i.h.bf16 %v5742_v55 }
 0x1f6   : > { %v2241_v62 = vsel %vm1999_vm1, %v2209_v28, %v1769_v8  ;;  %v3322_v8 = vunpack.i.h.bf16 %v5737_v44  ;;  %v1980_v28 = vsel %vm1966_vm0, %v3751_v57, %v3202_v27  ;;  %v5748_v27 = vld [vmem:[#allocation25_spill] sm:$0xff] }
 0x1f7   : > { %v1996_v44 = vsel %vm1966_vm0, %v3752_v1, %v3242_v5  ;;  %v2013_v33 = vsel %vm1999_vm1, %v1980_v28, %v3282_v41  ;;  %v5750_v41 = vld [vmem:[#allocation35_spill] sm:$0xff]  ;;  %v5752_v57 = vld [vmem:[#allocation45_spill] sm:$0xff] }
 0x1f8   : > { %v1895_v48 = vpop.permute.xlu1 %1894  ;;  %v2046_v58 = vsel %vm2032_vm2, %v2013_v33, %v3362_v31  ;;  %v3753_v31 = vld [vmem:[%s3936_s7 + $0xa8] sm:$0xff]  ;;  %v3526_v28 = vunpack.i.l.bf16 %v5752_v57 }
 0x1f9   : > { %v2273_v63 = vsel %vm2032_vm2, %v2241_v62, %v1895_v48  ;;  %v3690_v16 = vpop.permute.xlu0 %3689  ;;  %v2029_v48 = vsel %vm1999_vm1, %v1996_v44, %v3322_v8  ;;  %v2079_v11 = vsel %vm2065_vm3, %v2046_v58, %v3442_v51  ;;  %v5751_v51 = vld [vmem:[#allocation40_spill] sm:$0xff]  ;;  %v5753_v44 = vld [vmem:[#allocation50_spill] sm:$0xff] }
 0x1fa   : > { %v3692_v18 = vunpack.i.h.bf16 %v3690_v16  ;;  %v3691_v34 = vunpack.i.l.bf16 %v3690_v16  ;;  %3024 = vmatprep.mubr.msk.f32.mxu0 %vm2065_vm3, %v2273_v63  ;;  %v2062_v50 = vsel %vm2032_vm2, %v2029_v48, %v3402_v49  ;;  %v2112_v63 = vsel %vm2098_vm4, %v2079_v11, %v3522_v23 }
 0x1fb   : > { %v2095_v54 = vsel %vm2065_vm3, %v2062_v50, %v3482_v30  ;;  %v3566_v33 = vunpack.i.l.bf16 %v5753_v44 }
 0x1fc   : > { %v3695_v0 = vpop.permute.xlu1 %3694  ;;  %v2144_v32 = vsel %vm2131_vm5, %v2111_v43, %v3691_v34  ;;  %v2160_v22 = vsel %vm2131_vm5, %v2127_v47, %v3692_v18  ;;  %v2128_v34 = vsel %vm2098_vm4, %v2095_v54, %v3562_v46  ;;  %v595_v46 = vld [vmem:[%s4360_s12 + $0x3] sm:$0xff] }
 0x1fd   : > { %v3697_v45 = vunpack.i.h.bf16 %v3695_v0  ;;  %v3696_v56 = vunpack.i.l.bf16 %v3695_v0  ;;  %v1927_v2 = vpop.permute.xlu0 %1926 }
 0x1fe   : > { %v2289_v60 = vsel %vm2032_vm2, %v2257_v4, %v1927_v2 }
 0x1ff   : > { %3040 = vmatprep.mubr.msk.f32.mxu1 %vm2065_vm3, %v2289_v60  ;;  %v2177_v15 = vsel %vm2164_vm6, %v2144_v32, %v3696_v56  ;;  %v2193_v12 = vsel %vm2164_vm6, %v2160_v22, %v3697_v45  ;;  %v5744_v22 = vld [vmem:[#allocation7_spill] sm:$0xff] }
 0x200   : > { %v1677_v36 = vpop.permute.xlu1 %1676  ;;  %v2486_v14 = vpop.f32.mrf.mxu0  ;;  %2545 = vmatmul.mubr.f32.gmra.mxu0 %v2177_v15  ;;  %2625 = vmatmul.mubr.f32.gmra.mxu1 %v2193_v12  ;;  %v3206_v15 = vunpack.i.l.bf16 %v5744_v22  ;;  %v2909_v12 = vld [vmem:[%s3936_s7 + $0xc3] sm:$0xff] }
 0x201   : > { %v1645_v52 = vpop.permute.xlu0 %1644  ;;  %v2487_v17 = vadd.f32 %v5368_v21, %v2486_v14  ;;  %v2566_v25 = vpop.f32.mrf.mxu1  ;;  %v2226_v26 = vsel %vm1966_vm0, %v2924_v9, %v1677_v36  ;;  %v5745_v14 = vld [vmem:[#allocation11_spill] sm:$0xff] }
 0x202   : > { %v2567_v39 = vadd.f32 %v5368_v21, %v2566_v25  ;;  %v2488_v42 = vpop.f32.mrf.mxu0  ;;  %v2210_v19 = vsel %vm1966_vm0, %v2908_v10, %v1645_v52  ;;  %v3246_v52 = vunpack.i.l.bf16 %v5745_v14  ;;  %v3366_v10 = vunpack.i.l.bf16 %v5748_v27 }
 0x203   : > { %2645 = vst [vmem:[%s5377_s22] sm:$0xff] %v2487_v17  ;;  %v2568_v3 = vpop.f32.mrf.mxu1  ;;  %v5746_v17 = vld [vmem:[#allocation15_spill] sm:$0xff]  ;;  %v5747_v42 = vld [vmem:[#allocation20_spill] sm:$0xff]  ;;  %v1981_v49 = vsel %vm1966_vm0, %v3753_v31, %v3206_v15  ;;  %v3487_v31 = vunpack.i.h.bf16 %v5751_v51 }
 0x204   : > { %2661 = vst [vmem:[%s5377_s22 + $0x80] sm:$0xff] %v2567_v39  ;;  %v1803_v6 = vpop.permute.xlu1 %1802  ;;  %v3286_v25 = vunpack.i.l.bf16 %v5746_v17  ;;  %v3326_v3 = vunpack.i.l.bf16 %v5747_v42  ;;  %v2910_v15 = vld [vmem:[%s3936_s7 + $0xcb] sm:$0xff] }
 0x205   : > { %v1771_v61 = vpop.permute.xlu0 %1770  ;;  %v2258_v16 = vsel %vm1999_vm1, %v2226_v26, %v1803_v6  ;;  %v5749_v6 = vld [vmem:[#allocation30_spill] sm:$0xff] }
 0x206   : > { %v2242_v13 = vsel %vm1999_vm1, %v2210_v19, %v1771_v61  ;;  %v3406_v5 = vunpack.i.l.bf16 %v5749_v6  ;;  %v3446_v61 = vunpack.i.l.bf16 %v5750_v41  ;;  %v3486_v19 = vunpack.i.l.bf16 %v5751_v51 }
 0x207   : > { %v2014_v1 = vsel %vm1999_vm1, %v1981_v49, %v3286_v25 }
 0x208   : > { %v1897_v59 = vpop.permute.xlu1 %1896  ;;  %v2047_v48 = vsel %vm2032_vm2, %v2014_v1, %v3366_v10  ;;  %v3407_v10 = vunpack.i.h.bf16 %v5749_v6  ;;  %v3567_v6 = vunpack.i.h.bf16 %v5753_v44 }
 0x209   : > { %v2274_v29 = vsel %vm2032_vm2, %v2242_v13, %v1897_v59  ;;  %v3700_v62 = vpop.permute.xlu0 %3699  ;;  %v3754_v13 = vld [vmem:[%s3936_s7 + $0x168] sm:$0xff]  ;;  %v2080_v50 = vsel %vm2065_vm3, %v2047_v48, %v3446_v61  ;;  %v3755_v61 = vld [vmem:[%s3936_s7 + $0xb0] sm:$0xff] }
 0x20a   : > { %v3702_v40 = vunpack.i.h.bf16 %v3700_v62  ;;  %v3701_v55 = vunpack.i.l.bf16 %v3700_v62  ;;  %3025 = vmatprep.mubr.msk.f32.mxu0 %vm2065_vm3, %v2274_v29  ;;  %v1997_v59 = vsel %vm1966_vm0, %v3754_v13, %v3246_v52  ;;  %v3287_v52 = vunpack.i.h.bf16 %v5746_v17 }
 0x20b   : > { %v2030_v62 = vsel %vm1999_vm1, %v1997_v59, %v3326_v3  ;;  %v3367_v3 = vunpack.i.h.bf16 %v5748_v27 }
 0x20c   : > { %v3705_v7 = vpop.permute.xlu1 %3704  ;;  %v2145_v38 = vsel %vm2131_vm5, %v2112_v63, %v3701_v55  ;;  %v2161_v53 = vsel %vm2131_vm5, %v2128_v34, %v3702_v40  ;;  %v2063_v55 = vsel %vm2032_vm2, %v2030_v62, %v3406_v5  ;;  %v3447_v5 = vunpack.i.h.bf16 %v5750_v41  ;;  %v596_v41 = vld [vmem:[%s4360_s12 + $0xb] sm:$0xff]  ;;  %s2694_s12 = sshll.u32 %s5377_s22, 4  ;;  %s5552_s12 = int_to_ptr.vmem [resolvable:$true] %s2694_s12 }
 0x20d   : > { %v3707_v20 = vunpack.i.h.bf16 %v3705_v7  ;;  %v3706_v35 = vunpack.i.l.bf16 %v3705_v7  ;;  %v1929_v18 = vpop.permute.xlu0 %1928  ;;  %v2096_v11 = vsel %vm2065_vm3, %v2063_v55, %v3486_v19  ;;  %v2113_v7 = vsel %vm2098_vm4, %v2080_v50, %v3526_v28  ;;  %v3756_v19 = vld [vmem:[%s3936_s7 + $0x170] sm:$0xff]  ;;  %s3051_s7 = sshll.u32 %s3825_s18, 12  ;;  %s5560_s18 = scalar_lea.sflag [#allocation3], %s268_s8 }
 0x20e   : > { %v2290_v24 = vsel %vm2032_vm2, %v2258_v16, %v1929_v18  ;;  %v2129_v18 = vsel %vm2098_vm4, %v2096_v11, %v3566_v33  ;;  %s5550_s29 = scalar_lea.hbm %s5609_s4, %s3051_s7  ;;  %s3757_s30 = scalar_lea.vmem %s5552_s12, 4096 }
 0x20f   : > { %3041 = vmatprep.mubr.msk.f32.mxu1 %vm2065_vm3, %v2290_v24  ;;  %v2178_v37 = vsel %vm2164_vm6, %v2145_v38, %v3706_v35  ;;  %v2194_v0 = vsel %vm2164_vm6, %v2161_v53, %v3707_v20  ;;  %p3758_p12 = scmp.ne.s32.totalorder %s5552_s12, %s3757_s30  ;;  %p3764_p1 = scmp.lt.s32.totalorder %s5552_s12, %s3762_s6 }
 0x210   : > { %v1679_v43 = vpop.permute.xlu1 %1678  ;;  %v2491_v4 = vpop.f32.mrf.mxu0  ;;  %2550 = vmatmul.mubr.f32.gmra.mxu0 %v2178_v37  ;;  %2630 = vmatmul.mubr.f32.gmra.mxu1 %v2194_v0  ;;  %p3765_p2 = scmp.lt.s32.totalorder %s3763_s13, %s3757_s30 }
 0x211   : > { %v1647_v45 = vpop.permute.xlu0 %1646  ;;  %v2492_v56 = vadd.f32 %v5368_v21, %v2491_v4  ;;  %v2571_v2 = vpop.f32.mrf.mxu1  ;;  %v2227_v54 = vsel %vm1966_vm0, %v595_v46, %v1679_v43  ;;  %p3759_p13 = pnand %p3758_p12, %p3911_p4 }
 0x212   : > { %v2572_v47 = vadd.f32 %v5368_v21, %v2571_v2  ;;  %v2493_v60 = vpop.f32.mrf.mxu0  ;;  %v2211_v8 = vsel %vm1966_vm0, %v2909_v12, %v1647_v45  ;;  %p3766_p3 = por %p3765_p2, %p3764_p1 }
 0x213   : > { %2646 = vst [vmem:[%s5377_s22 + $0x8] sm:$0xff] %v2492_v56  ;;  %v2573_v32 = vpop.f32.mrf.mxu1  ;;  %p3760_p0 = pneg %p3759_p13 }
 0x214   : > { %2662 = vst [vmem:[%s5377_s22 + $0x88] sm:$0xff] %v2572_v47  ;;  %v1805_v36 = vpop.permute.xlu1 %1804  ;;  %v3207_v32 = vunpack.i.h.bf16 %v5744_v22 }
 0x215   : > { %v1773_v39 = vpop.permute.xlu0 %1772  ;;  %v2259_v63 = vsel %vm1999_vm1, %v2227_v54, %v1805_v36  ;;  %v3247_v36 = vunpack.i.h.bf16 %v5745_v14  ;;  %v3527_v14 = vunpack.i.h.bf16 %v5752_v57  ;;  %p3767_p5 = pnand %p3766_p3, %p3760_p0 }
 0x216   : > { %v2243_v30 = vsel %vm1999_vm1, %v2211_v8, %v1773_v39  ;;  %v3327_v39 = vunpack.i.h.bf16 %v5747_v42  ;;  %v1982_v8 = vsel %vm1966_vm0, %v3755_v61, %v3207_v32 }
 0x217   : > { %v1998_v42 = vsel %vm1966_vm0, %v3756_v19, %v3247_v36  ;;  %v2015_v27 = vsel %vm1999_vm1, %v1982_v8, %v3287_v52 }
 0x218   : > { %v1899_v23 = vpop.permute.xlu1 %1898  ;;  %v2048_v51 = vsel %vm2032_vm2, %v2015_v27, %v3367_v3 }
 0x219   : > { %v2275_v9 = vsel %vm2032_vm2, %v2243_v30, %v1899_v23  ;;  %v3710_v29 = vpop.permute.xlu0 %3709  ;;  %v2031_v23 = vsel %vm1999_vm1, %v1998_v42, %v3327_v39  ;;  %v2081_v1 = vsel %vm2065_vm3, %v2048_v51, %v3447_v5 }
 0x21a   : > { %v3712_v58 = vunpack.i.h.bf16 %v3710_v29  ;;  %v3711_v40 = vunpack.i.l.bf16 %v3710_v29  ;;  %3026 = vmatprep.mubr.msk.f32.mxu0 %vm2065_vm3, %v2275_v9  ;;  %v2064_v59 = vsel %vm2032_vm2, %v2031_v23, %v3407_v10  ;;  %v2114_v9 = vsel %vm2098_vm4, %v2081_v1, %v3527_v14 }
 0x21b   : > { %v2097_v33 = vsel %vm2065_vm3, %v2064_v59, %v3487_v31 }
 0x21c   : > { %v3715_v26 = vpop.permute.xlu1 %3714  ;;  %v2146_v24 = vsel %vm2131_vm5, %v2113_v7, %v3711_v40  ;;  %v2162_v38 = vsel %vm2131_vm5, %v2129_v18, %v3712_v58  ;;  %v2130_v40 = vsel %vm2098_vm4, %v2097_v33, %v3567_v6 }
 0x21d   : > { %v3717_v16 = vunpack.i.h.bf16 %v3715_v26  ;;  %v3716_v20 = vunpack.i.l.bf16 %v3715_v26  ;;  %v1931_v35 = vpop.permute.xlu0 %1930 }
 0x21e   : > { %v2291_v34 = vsel %vm2032_vm2, %v2259_v63, %v1931_v35 }
 0x21f   : > { %3042 = vmatprep.mubr.msk.f32.mxu1 %vm2065_vm3, %v2291_v34  ;;  %v2179_v53 = vsel %vm2164_vm6, %v2146_v24, %v3716_v20  ;;  %v2195_v37 = vsel %vm2164_vm6, %v2162_v38, %v3717_v16 }
 0x220   : > { %v1681_v0 = vpop.permute.xlu1 %1680  ;;  %v2496_v43 = vpop.f32.mrf.mxu0  ;;  %2555 = vmatmul.mubr.f32.gmra.mxu0 %v2179_v53  ;;  %2635 = vmatmul.mubr.f32.gmra.mxu1 %v2195_v37 }
 0x221   : > { %v1649_v4 = vpop.permute.xlu0 %1648  ;;  %v2497_v45 = vadd.f32 %v5368_v21, %v2496_v43  ;;  %v2576_v56 = vpop.f32.mrf.mxu1  ;;  %v2228_v44 = vsel %vm1966_vm0, %v596_v41, %v1681_v0 }
 0x222   : > { %v2577_v2 = vadd.f32 %v5368_v21, %v2576_v56  ;;  %v2498_v47 = vpop.f32.mrf.mxu0  ;;  %v2212_v22 = vsel %vm1966_vm0, %v2910_v15, %v1649_v4 }
 0x223   : > { %2647 = vst [vmem:[%s5377_s22 + $0x10] sm:$0xff] %v2497_v45  ;;  %v2578_v60 = vpop.f32.mrf.mxu1 }
 0x224   : > { %2663 = vst [vmem:[%s5377_s22 + $0x90] sm:$0xff] %v2577_v2  ;;  %v1807_v12 = vpop.permute.xlu1 %1806 }
 0x225   : > { %v1775_v25 = vpop.permute.xlu0 %1774  ;;  %v2260_v29 = vsel %vm1999_vm1, %v2228_v44, %v1807_v12 }
 0x226   : > { %v2244_v17 = vsel %vm1999_vm1, %v2212_v22, %v1775_v25 }
 0x228   : > { %v1901_v49 = vpop.permute.xlu1 %1900 }
 0x229   : > { %v2276_v28 = vsel %vm2032_vm2, %v2244_v17, %v1901_v49  ;;  %v3720_v30 = vpop.permute.xlu0 %3719 }
 0x22a   : > { %v3722_v13 = vunpack.i.h.bf16 %v3720_v30  ;;  %v3721_v57 = vunpack.i.l.bf16 %v3720_v30  ;;  %3027 = vmatprep.mubr.msk.f32.mxu0 %vm2065_vm3, %v2276_v28 }
 0x22c   : > { %v3725_v46 = vpop.permute.xlu1 %3724  ;;  %v2147_v50 = vsel %vm2131_vm5, %v2114_v9, %v3721_v57  ;;  %v2163_v11 = vsel %vm2131_vm5, %v2130_v40, %v3722_v13 }
 0x22d   : > { %v3727_v62 = vunpack.i.h.bf16 %v3725_v46  ;;  %v3726_v48 = vunpack.i.l.bf16 %v3725_v46  ;;  %v1933_v58 = vpop.permute.xlu0 %1932 }
 0x22e   : > { %v2292_v55 = vsel %vm2032_vm2, %v2260_v29, %v1933_v58 }
 0x22f   : > { %3043 = vmatprep.mubr.msk.f32.mxu1 %vm2065_vm3, %v2292_v55  ;;  %v2180_v54 = vsel %vm2164_vm6, %v2147_v50, %v3726_v48  ;;  %v2196_v26 = vsel %vm2164_vm6, %v2163_v11, %v3727_v62 }
 0x230   : > { %v2501_v7 = vpop.f32.mrf.mxu0  ;;  %2560 = vmatmul.mubr.f32.gmra.mxu0 %v2180_v54  ;;  %v2581_v63 = vpop.f32.mrf.mxu1  ;;  %2640 = vmatmul.mubr.f32.gmra.mxu1 %v2196_v26 }
 0x231   : > { %v2502_v16 = vadd.f32 %v5368_v21, %v2501_v7  ;;  %v2582_v20 = vadd.f32 %v5368_v21, %v2581_v63 }
 0x232   : > { %v2503_v35 = vpop.f32.mrf.mxu0  ;;  %v2583_v18 = vpop.f32.mrf.mxu1 }
 0x233   : > { %2648 = vst [vmem:[%s5377_s22 + $0x18] sm:$0xff] %v2502_v16  ;;  %2664 = vst [vmem:[%s5377_s22 + $0x98] sm:$0xff] %v2582_v20 }
 0x240   : > { %v2506_v34 = vpop.f32.mrf.mxu0  ;;  %v2586_v24 = vpop.f32.mrf.mxu1 }
 0x241   : > { %v2507_v38 = vadd.f32 %v5368_v21, %v2506_v34  ;;  %v2587_v53 = vadd.f32 %v5368_v21, %v2586_v24 }
 0x242   : > { %v2508_v37 = vpop.f32.mrf.mxu0  ;;  %v2588_v0 = vpop.f32.mrf.mxu1 }
 0x243   : > { %2649 = vst [vmem:[%s5377_s22 + $0x20] sm:$0xff] %v2507_v38  ;;  %2665 = vst [vmem:[%s5377_s22 + $0xa0] sm:$0xff] %v2587_v53 }
 0x250   : > { %v2511_v43 = vpop.f32.mrf.mxu0  ;;  %v2591_v4 = vpop.f32.mrf.mxu1 }
 0x251   : > { %v2512_v45 = vadd.f32 %v5368_v21, %v2511_v43  ;;  %v2592_v56 = vadd.f32 %v5368_v21, %v2591_v4 }
 0x252   : > { %v2513_v2 = vpop.f32.mrf.mxu0  ;;  %v2593_v47 = vpop.f32.mrf.mxu1 }
 0x253   : > { %2650 = vst [vmem:[%s5377_s22 + $0x28] sm:$0xff] %v2512_v45  ;;  %2666 = vst [vmem:[%s5377_s22 + $0xa8] sm:$0xff] %v2592_v56 }
 0x260   : > { %v2516_v60 = vpop.f32.mrf.mxu0  ;;  %v2596_v32 = vpop.f32.mrf.mxu1 }
 0x261   : > { %v2517_v15 = vadd.f32 %v5368_v21, %v2516_v60  ;;  %v2597_v12 = vadd.f32 %v5368_v21, %v2596_v32 }
 0x262   : > { %v2518_v36 = vpop.f32.mrf.mxu0  ;;  %v2598_v52 = vpop.f32.mrf.mxu1 }
 0x263   : > { %2651 = vst [vmem:[%s5377_s22 + $0x30] sm:$0xff] %v2517_v15  ;;  %2667 = vst [vmem:[%s5377_s22 + $0xb0] sm:$0xff] %v2597_v12 }
 0x270   : > { %v2521_v25 = vpop.f32.mrf.mxu0  ;;  %v2601_v39 = vpop.f32.mrf.mxu1 }
 0x271   : > { %v2522_v3 = vadd.f32 %v5368_v21, %v2521_v25  ;;  %v2602_v10 = vadd.f32 %v5368_v21, %v2601_v39 }
 0x272   : > { %v2523_v5 = vpop.f32.mrf.mxu0  ;;  %v2603_v22 = vpop.f32.mrf.mxu1 }
 0x273   : > { %2652 = vst [vmem:[%s5377_s22 + $0x38] sm:$0xff] %v2522_v3  ;;  %2668 = vst [vmem:[%s5377_s22 + $0xb8] sm:$0xff] %v2602_v10 }
 0x280   : > { %v2526_v61 = vpop.f32.mrf.mxu0  ;;  %v2606_v8 = vpop.f32.mrf.mxu1 }
 0x281   : > { %v2527_v31 = vadd.f32 %v5368_v21, %v2526_v61  ;;  %v2607_v14 = vadd.f32 %v5368_v21, %v2606_v8 }
 0x282   : > { %v2528_v17 = vpop.f32.mrf.mxu0  ;;  %v2608_v49 = vpop.f32.mrf.mxu1 }
 0x283   : > { %2653 = vst [vmem:[%s5377_s22 + $0x40] sm:$0xff] %v2527_v31  ;;  %2669 = vst [vmem:[%s5377_s22 + $0xc0] sm:$0xff] %v2607_v14 }
 0x290   : > { %v2531_v19 = vpop.f32.mrf.mxu0  ;;  %v2611_v42 = vpop.f32.mrf.mxu1 }
 0x291   : > { %v2532_v27 = vadd.f32 %v5368_v21, %v2531_v19  ;;  %v2612_v6 = vadd.f32 %v5368_v21, %v2611_v42 }
 0x292   : > { %v2533_v41 = vpop.f32.mrf.mxu0  ;;  %v2613_v28 = vpop.f32.mrf.mxu1 }
 0x293   : > { %2654 = vst [vmem:[%s5377_s22 + $0x48] sm:$0xff] %v2532_v27  ;;  %2670 = vst [vmem:[%s5377_s22 + $0xc8] sm:$0xff] %v2612_v6 }
 0x2a0   : > { %v2536_v30 = vpop.f32.mrf.mxu0  ;;  %v2616_v23 = vpop.f32.mrf.mxu1 }
 0x2a1   : > { %v2537_v51 = vadd.f32 %v5368_v21, %v2536_v30  ;;  %v2617_v13 = vadd.f32 %v5368_v21, %v2616_v23 }
 0x2a2   : > { %v2538_v57 = vpop.f32.mrf.mxu0  ;;  %v2618_v59 = vpop.f32.mrf.mxu1 }
 0x2a3   : > { %2655 = vst [vmem:[%s5377_s22 + $0x50] sm:$0xff] %v2537_v51  ;;  %2671 = vst [vmem:[%s5377_s22 + $0xd0] sm:$0xff] %v2617_v13 }
 0x2b0   : > { %v2541_v1 = vpop.f32.mrf.mxu0  ;;  %v2621_v33 = vpop.f32.mrf.mxu1 }
 0x2b1   : > { %v2542_v44 = vadd.f32 %v5368_v21, %v2541_v1  ;;  %v2622_v46 = vadd.f32 %v5368_v21, %v2621_v33 }
 0x2b2   : > { %v2543_v9 = vpop.f32.mrf.mxu0  ;;  %v2623_v29 = vpop.f32.mrf.mxu1 }
 0x2b3   : > { %2656 = vst [vmem:[%s5377_s22 + $0x58] sm:$0xff] %v2542_v44  ;;  %2672 = vst [vmem:[%s5377_s22 + $0xd8] sm:$0xff] %v2622_v46 }
 0x2c0   : > { %v2546_v62 = vpop.f32.mrf.mxu0  ;;  %v2626_v48 = vpop.f32.mrf.mxu1 }
 0x2c1   : > { %v2547_v58 = vadd.f32 %v5368_v21, %v2546_v62  ;;  %v2627_v40 = vadd.f32 %v5368_v21, %v2626_v48 }
 0x2c2   : > { %v2548_v55 = vpop.f32.mrf.mxu0  ;;  %v2628_v50 = vpop.f32.mrf.mxu1 }
 0x2c3   : > { %2657 = vst [vmem:[%s5377_s22 + $0x60] sm:$0xff] %v2547_v58  ;;  %2673 = vst [vmem:[%s5377_s22 + $0xe0] sm:$0xff] %v2627_v40 }
 0x2d0   : > { %v2551_v11 = vpop.f32.mrf.mxu0  ;;  %v2631_v54 = vpop.f32.mrf.mxu1 }
 0x2d1   : > { %v2552_v26 = vadd.f32 %v5368_v21, %v2551_v11  ;;  %v2632_v7 = vadd.f32 %v5368_v21, %v2631_v54 }
 0x2d2   : > { %v2553_v63 = vpop.f32.mrf.mxu0  ;;  %v2633_v16 = vpop.f32.mrf.mxu1 }
 0x2d3   : > { %2658 = vst [vmem:[%s5377_s22 + $0x68] sm:$0xff] %v2552_v26  ;;  %2674 = vst [vmem:[%s5377_s22 + $0xe8] sm:$0xff] %v2632_v7 }
 0x2e0   : > { %v2556_v20 = vpop.f32.mrf.mxu0  ;;  %v2636_v35 = vpop.f32.mrf.mxu1 }
 0x2e1   : > { %v2557_v18 = vadd.f32 %v5368_v21, %v2556_v20  ;;  %v2637_v34 = vadd.f32 %v5368_v21, %v2636_v35 }
 0x2e2   : > { %v2558_v24 = vpop.f32.mrf.mxu0  ;;  %v2638_v38 = vpop.f32.mrf.mxu1 }
 0x2e3   : > { %2659 = vst [vmem:[%s5377_s22 + $0x70] sm:$0xff] %v2557_v18  ;;  %2675 = vst [vmem:[%s5377_s22 + $0xf0] sm:$0xff] %v2637_v34 }
 0x2f0   : > { %v2561_v53 = vpop.f32.mrf.mxu0  ;;  %v2641_v37 = vpop.f32.mrf.mxu1 }
 0x2f1   : > { %v2562_v0 = vadd.f32 %v5368_v21, %v2561_v53  ;;  %v2642_v43 = vadd.f32 %v5368_v21, %v2641_v37 }
 0x2f2   : > { %v2563_v4 = vpop.f32.mrf.mxu0  ;;  %v2643_v45 = vpop.f32.mrf.mxu1 }
 0x2f3   : > { %2660 = vst [vmem:[%s5377_s22 + $0x78] sm:$0xff] %v2562_v0  ;;  %2676 = vst [vmem:[%s5377_s22 + $0xf8] sm:$0xff] %v2642_v43 }
 0x2f4   : > { %3770 = shalt.err (!%p3767_p5)
}
 0x2f5   : > { %s3771_s14 = scalar_lea.hbm %s5550_s29, 4096  ;;  %s3775_s9 = scalar_lea.hbm %s5609_s4, 8192 }
 0x2f6   : > { %p3772_p6 = scmp.ne.s32.totalorder %s5550_s29, %s3771_s14  ;;  %p3776_p10 = scmp.lt.s32.totalorder %s5550_s29, %s5609_s4 }
 0x2f7   : > { %p3777_p11 = scmp.lt.s32.totalorder %s3775_s9, %s3771_s14 }
 0x2f8   : > { %p3773_p7 = pnand %p3772_p6, %p3911_p4 }
 0x2f9   : > { %p3778_p12 = por %p3777_p11, %p3776_p10 }
 0x2fa   : > { %p3774_p9 = pneg %p3773_p7 }
 0x2fc   : > { %p3779_p13 = pnand %p3778_p12, %p3774_p9 }
 0x2fe   : > { %3782 = shalt.err (!%p3779_p13)
}
 0x2ff   : > { %s3844_s22 = smov 128   ;;  %s3845_s7 = smov 8  }
 0x300   : > { %3102 = dma.vmem_to_hbm [thread:$0]  (%p3911_p4), %s5552_s12, 4096, %s5550_s29, %s5560_s18, %s3844_s22, %s3844_s22, %s3845_s7  }
 0x301 PF: > { %p3109_p0 = scmp.ge.s32.totalorder %s3833_s20, 2  ;;  %s2709_s24 = sand.u32 1, %s3813_s15  }
 0x302   : > { %s2710_s26 = scalar_lea.sflag [#allocation3], %s2709_s24 }
 0x303   : > { %p3105_p1 = pnand %p3109_p0, %p3918_p8 }
 0x305   : > { %p3106_p2 = pneg %p3105_p1 }
 0x307   : > { %3808 = dma.done.wait (%p3106_p2), %s2710_s26, 4096  }
 0x308   : > { %3810 = vsyncadd (%p3106_p2), %s2710_s26, 4294963200  ;;  %s17_s20 = sadd.s32 1, %s3833_s20   ;;  %s5754_s15 = smov %s3817_s16 }
 0x309   : > { %p14_p3 = scmp.ge.s32.totalorder %s17_s20, 4   ;;  %s5755_s16 = smov %s3821_s17 }
 0x30a   : > { %s5756_s17 = smov %s3924_s28  ;;  %s5757_s18 = smov %s3829_s19 }
 0x30b   : > { %s5758_s19 = smov %s5760_s23  ;;  %16 = sbr.rel (!%p14_p3) target bundleno = 4 (0x4), region = 76 }
 0x310   :  { %2715 = vsyncpa [#allocation3], 1 }
 0x311   :  { %2717 = vsyncpa [#allocation3 + $0x1], 1 }

</bundles_post_ra>
